<compile_context>
chip_gen: v7x
topology: tpu7x:2x2x1
jax: 0.10.0
libtpu: 0.0.40
codegen_flags: <defaults>
</compile_context>

<pallas_src>
import functools

import jax
import jax.numpy as jnp
from jax import lax
from jax.experimental import pallas as pl
from jax.experimental.pallas import tpu as pltpu


def _round_up(x, m):
    return ((x + m - 1) // m) * m


def _full_spec(shape):
    """BlockSpec covering the whole array as a single block."""
    nd = len(shape)
    return pl.BlockSpec(tuple(shape), lambda i, _nd=nd: (0,) * _nd)


# ----------------------------------------------------------------------------
# Fully fused network kernel:
#   for each layer l:
#     gi  = X_l @ Wi_cat[l] + bi_cat[l]          (all timesteps, one matmul)
#     for t in 0..T-1 (serial):
#       gh = h @ Wh_cat[l]                       (one fused (Bp,Hp)@(Hp,3Hp))
#       r,z,n gates; h = (1-z)*n + z*h           (VPU/EUP)
#     X_{l+1} = per-timestep h outputs (VMEM scratch)
#   logits = X_L @ fc_w + fc_b
# ----------------------------------------------------------------------------
def fused_gru_fc_kernel(x_ref, h0_ref, *refs, num_layers, t, bp, hp, cp, dp):
    n_w = 4 * num_layers
    layer_refs = refs[:n_w]
    fcw_ref, fcb_ref = refs[n_w], refs[n_w + 1]
    out_ref, hout_ref = refs[n_w + 2], refs[n_w + 3]
    gi_scr, act_scr, h_scr = refs[n_w + 4], refs[n_w + 5], refs[n_w + 6]

    g3 = 3 * hp

    for l in range(num_layers):
        wi_ref, wh_ref, bi_ref, bhn_ref = layer_refs[4 * l:4 * l + 4]

        # Hoisted, gate-fused input projection over ALL timesteps at once.
        if l == 0:
            xin = x_ref[...].reshape(t * bp, dp)          # (T*Bp, Dp)
        else:
            xin = act_scr[...].reshape(t * bp, hp)        # (T*Bp, Hp)
        gi = (jnp.dot(xin, wi_ref[...],
                      preferred_element_type=jnp.float32)
              + bi_ref[...])                              # (T*Bp, 3Hp)
        gi_scr[...] = gi.reshape(t, bp, g3)

        # Serial time recurrence; hidden state lives in VMEM scratch.
        h_scr[...] = h0_ref[l]
        wh = wh_ref[...]                                   # (Hp, 3Hp), resident
        bhn = bhn_ref[...]                                 # (1, Hp)

        def step(s, carry):
            gi_s = gi_scr[s]                               # (Bp, 3Hp)
            h = h_scr[...]                                 # (Bp, Hp)
            gh = jnp.dot(h, wh, preferred_element_type=jnp.float32)
            r = jax.nn.sigmoid(gi_s[:, :hp] + gh[:, :hp])
            z = jax.nn.sigmoid(gi_s[:, hp:2 * hp] + gh[:, hp:2 * hp])
            n = jnp.tanh(gi_s[:, 2 * hp:] + r * (gh[:, 2 * hp:] + bhn))
            h_new = (1.0 - z) * n + z * h
            h_scr[...] = h_new
            act_scr[s] = h_new
            return carry

        lax.fori_loop(0, t, step, 0, unroll=True)
        hout_ref[l] = h_scr[...]

    # FC head over all timesteps (lane-dense padded Cp columns).
    act_flat = act_scr[...].reshape(t * bp, hp)
    logits = (jnp.dot(act_flat, fcw_ref[...],
                      preferred_element_type=jnp.float32)
              + fcb_ref[...])
    out_ref[...] = logits.reshape(t, bp, cp)


# ----------------------------------------------------------------------------
# Network.forward equivalent (single pallas_call)
# ----------------------------------------------------------------------------
def network_forward(x, hidden, params):
    """x: (B, T, D); hidden: (L, B, H).  Returns (out (B,T,C), hidden (L,B,H))."""
    B, T, Din = x.shape
    H = params["hidden_size"]
    Hp = params["hp"]
    C = params["num_classes"]
    Cp = params["cp"]
    Dp = params["dp"]
    L = len(params["gru"])
    Bp = _round_up(max(B, 8), 8)                 # f32 sublane minimum

    # Tiny one-time transpose / zero-pads outside the kernel.
    x_tm = jnp.transpose(x, (1, 0, 2))                         # (T, B, Din)
    x_tm = jnp.pad(x_tm, ((0, 0), (0, Bp - B), (0, Dp - Din)))  # (T, Bp, Dp)
    h0 = jnp.pad(hidden, ((0, 0), (0, Bp - B), (0, Hp - H)))    # (L, Bp, Hp)

    flat_w = []
    for p in params["gru"]:
        flat_w += [p["wi_cat"], p["wh_cat"], p["bi_cat"], p["bh_n"]]
    flat_w += [params["fc_w"], params["fc_b"]]

    kernel = functools.partial(fused_gru_fc_kernel, num_layers=L,
                               t=T, bp=Bp, hp=Hp, cp=Cp, dp=Dp)

    in_specs = ([_full_spec(x_tm.shape), _full_spec(h0.shape)]
                + [_full_spec(w.shape) for w in flat_w])

    out, hout = pl.pallas_call(
        kernel,
        out_shape=(jax.ShapeDtypeStruct((T, Bp, Cp), jnp.float32),
                   jax.ShapeDtypeStruct((L, Bp, Hp), jnp.float32)),
        grid_spec=pltpu.PrefetchScalarGridSpec(
            num_scalar_prefetch=0,
            grid=(1,),
            in_specs=in_specs,
            out_specs=[_full_spec((T, Bp, Cp)), _full_spec((L, Bp, Hp))],
            scratch_shapes=[
                pltpu.VMEM((T, Bp, 3 * Hp), jnp.float32),   # gi (per layer)
                pltpu.VMEM((T, Bp, Hp), jnp.float32),       # layer activations
                pltpu.VMEM((Bp, Hp), jnp.float32),          # carried hidden
            ]),
        compiler_params=pltpu.CompilerParams(
            dimension_semantics=("arbitrary",),
            vmem_limit_bytes=32 * 1024 * 1024),
    )(x_tm, h0, *flat_w)

    out_btc = jnp.transpose(out[:, :B, :C], (1, 0, 2))          # (B, T, C)
    new_h = hout[:, :B, :H]                                     # (L, B, H)
    return out_btc, new_h


# ----------------------------------------------------------------------------
# Parameter construction: PyTorch nn.GRU / nn.Linear layouts, repacked into
# gate-concatenated, zero-padded (lane-dense) kernel layouts.
# ----------------------------------------------------------------------------
def init_params(key, input_dim, hidden_size, num_layers, num_classes):
    H = hidden_size
    Hp = _round_up(H, 128)
    Cp = _round_up(num_classes, 128)
    Dp = _round_up(input_dim, 128)
    params = {"gru": [], "hidden_size": H, "hp": Hp,
              "num_classes": num_classes, "cp": Cp, "dp": Dp}
    bound = H ** -0.5

    for l in range(num_layers):
        din_real = input_dim if l == 0 else H
        din_pack = Dp if l == 0 else Hp
        key, k1, k2, k3, k4 = jax.random.split(key, 5)
        w_ih = jax.random.uniform(k1, (3 * H, din_real), jnp.float32, -bound, bound)
        w_hh = jax.random.uniform(k2, (3 * H, H), jnp.float32, -bound, bound)
        b_ih = jax.random.uniform(k3, (3 * H,), jnp.float32, -bound, bound)
        b_hh = jax.random.uniform(k4, (3 * H,), jnp.float32, -bound, bound)

        wi_cat = jnp.zeros((din_pack, 3 * Hp), jnp.float32)
        wh_cat = jnp.zeros((Hp, 3 * Hp), jnp.float32)
        bi_cat = jnp.zeros((1, 3 * Hp), jnp.float32)
        bh_n = jnp.zeros((1, Hp), jnp.float32)
        for g in range(3):                                   # gate order: r, z, n
            wi_cat = wi_cat.at[:din_real, g * Hp:g * Hp + H].set(
                w_ih[g * H:(g + 1) * H].T)
            wh_cat = wh_cat.at[:H, g * Hp:g * Hp + H].set(
                w_hh[g * H:(g + 1) * H].T)
            bg = b_ih[g * H:(g + 1) * H]
            if g < 2:                                        # fold b_hh for r, z
                bg = bg + b_hh[g * H:(g + 1) * H]
            bi_cat = bi_cat.at[0, g * Hp:g * Hp + H].set(bg)
        bh_n = bh_n.at[0, :H].set(b_hh[2 * H:3 * H])

        params["gru"].append({
            "wi_cat": wi_cat, "wh_cat": wh_cat, "bi_cat": bi_cat, "bh_n": bh_n,
            "raw": {"w_ih": w_ih, "w_hh": w_hh, "b_ih": b_ih, "b_hh": b_hh},
        })

    key, k1, k2 = jax.random.split(key, 3)
    w_fc = jax.random.uniform(k1, (num_classes, H), jnp.float32, -bound, bound)
    b_fc = jax.random.uniform(k2, (num_classes,), jnp.float32, -bound, bound)
    fc_w = jnp.zeros((Hp, Cp), jnp.float32).at[:H, :num_classes].set(w_fc.T)
    fc_b = jnp.zeros((1, Cp), jnp.float32).at[0, :num_classes].set(b_fc)
    params["fc_w"] = fc_w
    params["fc_b"] = fc_b
    params["raw_fc_w"] = w_fc
    params["raw_fc_b"] = b_fc
    return params


# ----------------------------------------------------------------------------
# Pure-JAX reference (PyTorch nn.GRU equations, raw weight layout) for checks.
# ----------------------------------------------------------------------------
def reference_forward(x, hidden, params):
    B, T, _ = x.shape
    H = params["hidden_size"]
    layer_in = x
    new_hidden = []
    for l, p in enumerate(params["gru"]):
        raw = p["raw"]
        h = hidden[l]
        outs = []
        for t in range(T):
            xt = layer_in[:, t, :]
            gi = xt @ raw["w_ih"].T + raw["b_ih"]
            gh = h @ raw["w_hh"].T + raw["b_hh"]
            r = jax.nn.sigmoid(gi[:, :H] + gh[:, :H])
            z = jax.nn.sigmoid(gi[:, H:2 * H] + gh[:, H:2 * H])
            n = jnp.tanh(gi[:, 2 * H:] + r * gh[:, 2 * H:])
            h = (1.0 - z) * n + z * h
            outs.append(h)
        layer_in = jnp.stack(outs, axis=1)
        new_hidden.append(h)
    out = layer_in @ params["raw_fc_w"].T + params["raw_fc_b"]
    return out, jnp.stack(new_hidden, axis=0)


if __name__ == "__main__":
    # Small shapes consistent with the module's forward.
    B, T = 2, 8               # batchSize, sequence length
    INPUT_DIM = 4             # ARGS.inputdim
    HIDDEN = 32               # ARGS.hiddenDimSize
    NUM_LAYERS = 2            # ARGS.numLayers
    NUM_CLASSES = 5           # ARGS.numberOfOutputCodes

    key = jax.random.PRNGKey(0)
    key, kx, kh, kp = jax.random.split(key, 4)
    x = jax.random.normal(kx, (B, T, INPUT_DIM), jnp.float32)
    hidden0 = jax.random.normal(kh, (NUM_LAYERS, B, HIDDEN), jnp.float32)
    params = init_params(kp, INPUT_DIM, HIDDEN, NUM_LAYERS, NUM_CLASSES)

    out, hidden = network_forward(x, hidden0, params)
    out = jax.block_until_ready(out)
    hidden = jax.block_until_ready(hidden)

    ref_out, ref_hidden = reference_forward(x, hidden0, params)
    assert out.shape == (B, T, NUM_CLASSES)
    assert hidden.shape == (NUM_LAYERS, B, HIDDEN)
    assert jnp.allclose(out, ref_out, atol=1e-3, rtol=1e-3)
    assert jnp.allclose(hidden, ref_hidden, atol=1e-3, rtol=1e-3)

    print("KERNEL_OK")
</pallas_src>

<mosaic_0001>
module attributes {stable_mosaic.version = 11 : i64} {
  func.func @fused_gru_fc_kernel(%arg0: i32, %arg1: memref<8x8x128xf32, #tpu.memory_space<vmem>>, %arg2: memref<2x8x128xf32, #tpu.memory_space<vmem>>, %arg3: memref<128x384xf32, #tpu.memory_space<vmem>>, %arg4: memref<128x384xf32, #tpu.memory_space<vmem>>, %arg5: memref<1x384xf32, #tpu.memory_space<vmem>>, %arg6: memref<1x128xf32, #tpu.memory_space<vmem>>, %arg7: memref<128x384xf32, #tpu.memory_space<vmem>>, %arg8: memref<128x384xf32, #tpu.memory_space<vmem>>, %arg9: memref<1x384xf32, #tpu.memory_space<vmem>>, %arg10: memref<1x128xf32, #tpu.memory_space<vmem>>, %arg11: memref<128x128xf32, #tpu.memory_space<vmem>>, %arg12: memref<1x128xf32, #tpu.memory_space<vmem>>, %arg13: memref<8x8x128xf32, #tpu.memory_space<vmem>>, %arg14: memref<2x8x128xf32, #tpu.memory_space<vmem>>, %arg15: memref<8x8x384xf32, #tpu.memory_space<vmem>>, %arg16: memref<8x8x128xf32, #tpu.memory_space<vmem>>, %arg17: memref<8x128xf32, #tpu.memory_space<vmem>>) attributes {dimension_semantics = [#tpu.dimension_semantics<arbitrary>], iteration_bounds = array<i64: 1>, scalar_prefetch = 0 : i64, scratch_operands = 3 : i64, tpu.core_type = #tpu.core_type<tc>, window_params = [{pipeline_mode = #tpu.pipeline_mode<synchronous>, transform_indices = @transform_0, window_bounds = array<i64: 8, 8, 128>}, {pipeline_mode = #tpu.pipeline_mode<synchronous>, transform_indices = @transform_1, window_bounds = array<i64: 2, 8, 128>}, {pipeline_mode = #tpu.pipeline_mode<synchronous>, transform_indices = @transform_2, window_bounds = array<i64: 128, 384>}, {pipeline_mode = #tpu.pipeline_mode<synchronous>, transform_indices = @transform_3, window_bounds = array<i64: 128, 384>}, {pipeline_mode = #tpu.pipeline_mode<synchronous>, transform_indices = @transform_4, window_bounds = array<i64: 1, 384>}, {pipeline_mode = #tpu.pipeline_mode<synchronous>, transform_indices = @transform_5, window_bounds = array<i64: 1, 128>}, {pipeline_mode = #tpu.pipeline_mode<synchronous>, transform_indices = @transform_6, window_bounds = array<i64: 128, 384>}, {pipeline_mode = #tpu.pipeline_mode<synchronous>, transform_indices = @transform_7, window_bounds = array<i64: 128, 384>}, {pipeline_mode = #tpu.pipeline_mode<synchronous>, transform_indices = @transform_8, window_bounds = array<i64: 1, 384>}, {pipeline_mode = #tpu.pipeline_mode<synchronous>, transform_indices = @transform_9, window_bounds = array<i64: 1, 128>}, {pipeline_mode = #tpu.pipeline_mode<synchronous>, transform_indices = @transform_10, window_bounds = array<i64: 128, 128>}, {pipeline_mode = #tpu.pipeline_mode<synchronous>, transform_indices = @transform_11, window_bounds = array<i64: 1, 128>}, {pipeline_mode = #tpu.pipeline_mode<synchronous>, transform_indices = @transform_12, window_bounds = array<i64: 8, 8, 128>}, {pipeline_mode = #tpu.pipeline_mode<synchronous>, transform_indices = @transform_13, window_bounds = array<i64: 2, 8, 128>}]} {
    %c0 = arith.constant 0 : index
    %c0_0 = arith.constant 0 : index
    %c0_1 = arith.constant 0 : index
    %0 = vector.load %arg1[%c0, %c0_0, %c0_1] : memref<8x8x128xf32, #tpu.memory_space<vmem>>, vector<8x8x128xf32>
    %1 = vector.shape_cast %0 : vector<8x8x128xf32> to vector<64x128xf32>
    %c0_2 = arith.constant 0 : index
    %c0_3 = arith.constant 0 : index
    %2 = vector.load %arg3[%c0_2, %c0_3] : memref<128x384xf32, #tpu.memory_space<vmem>>, vector<128x384xf32>
    %cst = arith.constant dense<0.000000e+00> : vector<64x384xf32>
    %3 = tpu.matmul %1, %2, %cst {dimension_numbers = #tpu.dot_dimension_numbers<[1], [0], [0], [1], [0, 0, 1, 1], [], []>} : vector<64x128xf32>, vector<128x384xf32>, vector<64x384xf32> -> vector<64x384xf32>
    %c0_4 = arith.constant 0 : index
    %c0_5 = arith.constant 0 : index
    %4 = vector.load %arg5[%c0_4, %c0_5] : memref<1x384xf32, #tpu.memory_space<vmem>>, vector<1x384xf32>
    %5 = vector.broadcast %4 : vector<1x384xf32> to vector<64x384xf32>
    %6 = arith.addf %3, %5 : vector<64x384xf32>
    %7 = vector.shape_cast %6 : vector<64x384xf32> to vector<8x8x384xf32>
    %c0_6 = arith.constant 0 : index
    %c0_7 = arith.constant 0 : index
    %c0_8 = arith.constant 0 : index
    %8 = vector.load %arg15[%c0_6, %c0_7, %c0_8] : memref<8x8x384xf32, #tpu.memory_space<vmem>>, vector<8x8x384xf32>
    tpu.vector_store %arg15[%c0_6, %c0_7, %c0_8], %7 {strides = array<i32>} : memref<8x8x384xf32, #tpu.memory_space<vmem>>, vector<8x8x384xf32>,
    %c0_9 = arith.constant 0 : index
    %c0_10 = arith.constant 0 : index
    %c0_11 = arith.constant 0 : index
    %9 = vector.load %arg2[%c0_9, %c0_10, %c0_11] : memref<2x8x128xf32, #tpu.memory_space<vmem>>, vector<1x8x128xf32>
    %10 = vector.shape_cast %9 : vector<1x8x128xf32> to vector<8x128xf32>
    %c0_12 = arith.constant 0 : index
    %c0_13 = arith.constant 0 : index
    %11 = vector.load %arg17[%c0_12, %c0_13] : memref<8x128xf32, #tpu.memory_space<vmem>>, vector<8x128xf32>
    tpu.vector_store %arg17[%c0_12, %c0_13], %10 {strides = array<i32>} : memref<8x128xf32, #tpu.memory_space<vmem>>, vector<8x128xf32>,
    %c0_14 = arith.constant 0 : index
    %c0_15 = arith.constant 0 : index
    %12 = vector.load %arg4[%c0_14, %c0_15] : memref<128x384xf32, #tpu.memory_space<vmem>>, vector<128x384xf32>
    %c0_16 = arith.constant 0 : index
    %c0_17 = arith.constant 0 : index
    %13 = vector.load %arg6[%c0_16, %c0_17] : memref<1x128xf32, #tpu.memory_space<vmem>>, vector<1x128xf32>
    %c0_i32 = arith.constant 0 : i32
    %14 = arith.index_cast %c0_i32 : i32 to index
    %c0_18 = arith.constant 0 : index
    %c0_19 = arith.constant 0 : index
    %15 = vector.load %arg15[%14, %c0_18, %c0_19] : memref<8x8x384xf32, #tpu.memory_space<vmem>>, vector<1x8x384xf32>
    %16 = vector.shape_cast %15 : vector<1x8x384xf32> to vector<8x384xf32>
    %c0_20 = arith.constant 0 : index
    %c0_21 = arith.constant 0 : index
    %17 = vector.load %arg17[%c0_20, %c0_21] : memref<8x128xf32, #tpu.memory_space<vmem>>, vector<8x128xf32>
    %cst_22 = arith.constant dense<0.000000e+00> : vector<8x384xf32>
    %18 = tpu.matmul %17, %12, %cst_22 {dimension_numbers = #tpu.dot_dimension_numbers<[1], [0], [0], [1], [0, 0, 1, 1], [], []>} : vector<8x128xf32>, vector<128x384xf32>, vector<8x384xf32> -> vector<8x384xf32>
    %19 = vector.extract_strided_slice %16 {offsets = [0, 0], sizes = [8, 128], strides = [1, 1]} : vector<8x384xf32> to vector<8x128xf32>
    %20 = vector.extract_strided_slice %18 {offsets = [0, 0], sizes = [8, 128], strides = [1, 1]} : vector<8x384xf32> to vector<8x128xf32>
    %21 = arith.addf %19, %20 : vector<8x128xf32>
    %22 = arith.negf %21 : vector<8x128xf32>
    %23 = math.exp %22 : vector<8x128xf32>
    %cst_23 = arith.constant 1.000000e+00 : f32
    %24 = vector.broadcast %cst_23 : f32 to vector<8x128xf32>
    %25 = arith.addf %24, %23 : vector<8x128xf32>
    %26 = arith.divf %24, %25 : vector<8x128xf32>
    %27 = vector.extract_strided_slice %16 {offsets = [0, 128], sizes = [8, 128], strides = [1, 1]} : vector<8x384xf32> to vector<8x128xf32>
    %28 = vector.extract_strided_slice %18 {offsets = [0, 128], sizes = [8, 128], strides = [1, 1]} : vector<8x384xf32> to vector<8x128xf32>
    %29 = arith.addf %27, %28 : vector<8x128xf32>
    %30 = arith.negf %29 : vector<8x128xf32>
    %31 = math.exp %30 : vector<8x128xf32>
    %cst_24 = arith.constant 1.000000e+00 : f32
    %32 = vector.broadcast %cst_24 : f32 to vector<8x128xf32>
    %33 = arith.addf %32, %31 : vector<8x128xf32>
    %34 = arith.divf %32, %33 : vector<8x128xf32>
    %35 = vector.extract_strided_slice %16 {offsets = [0, 256], sizes = [8, 128], strides = [1, 1]} : vector<8x384xf32> to vector<8x128xf32>
    %36 = vector.extract_strided_slice %18 {offsets = [0, 256], sizes = [8, 128], strides = [1, 1]} : vector<8x384xf32> to vector<8x128xf32>
    %37 = vector.broadcast %13 : vector<1x128xf32> to vector<8x128xf32>
    %38 = arith.addf %36, %37 : vector<8x128xf32>
    %39 = arith.mulf %26, %38 : vector<8x128xf32>
    %40 = arith.addf %35, %39 : vector<8x128xf32>
    %41 = math.tanh %40 : vector<8x128xf32>
    %cst_25 = arith.constant 1.000000e+00 : f32
    %42 = vector.broadcast %cst_25 : f32 to vector<8x128xf32>
    %43 = arith.subf %42, %34 : vector<8x128xf32>
    %44 = arith.mulf %43, %41 : vector<8x128xf32>
    %45 = arith.mulf %34, %17 : vector<8x128xf32>
    %46 = arith.addf %44, %45 : vector<8x128xf32>
    %c0_26 = arith.constant 0 : index
    %c0_27 = arith.constant 0 : index
    %47 = vector.load %arg17[%c0_26, %c0_27] : memref<8x128xf32, #tpu.memory_space<vmem>>, vector<8x128xf32>
    tpu.vector_store %arg17[%c0_26, %c0_27], %46 {strides = array<i32>} : memref<8x128xf32, #tpu.memory_space<vmem>>, vector<8x128xf32>,
    %48 = arith.index_cast %c0_i32 : i32 to index
    %c0_28 = arith.constant 0 : index
    %c0_29 = arith.constant 0 : index
    %49 = vector.load %arg16[%48, %c0_28, %c0_29] : memref<8x8x128xf32, #tpu.memory_space<vmem>>, vector<1x8x128xf32>
    %50 = vector.shape_cast %49 : vector<1x8x128xf32> to vector<8x128xf32>
    %51 = vector.shape_cast %46 : vector<8x128xf32> to vector<1x8x128xf32>
    tpu.vector_store %arg16[%48, %c0_28, %c0_29], %51 {strides = array<i32>} : memref<8x8x128xf32, #tpu.memory_space<vmem>>, vector<1x8x128xf32>,
    %c1_i32 = arith.constant 1 : i32
    %52 = arith.index_cast %c1_i32 : i32 to index
    %c0_30 = arith.constant 0 : index
    %c0_31 = arith.constant 0 : index
    %53 = vector.load %arg15[%52, %c0_30, %c0_31] : memref<8x8x384xf32, #tpu.memory_space<vmem>>, vector<1x8x384xf32>
    %54 = vector.shape_cast %53 : vector<1x8x384xf32> to vector<8x384xf32>
    %c0_32 = arith.constant 0 : index
    %c0_33 = arith.constant 0 : index
    %55 = vector.load %arg17[%c0_32, %c0_33] : memref<8x128xf32, #tpu.memory_space<vmem>>, vector<8x128xf32>
    %cst_34 = arith.constant dense<0.000000e+00> : vector<8x384xf32>
    %56 = tpu.matmul %55, %12, %cst_34 {dimension_numbers = #tpu.dot_dimension_numbers<[1], [0], [0], [1], [0, 0, 1, 1], [], []>} : vector<8x128xf32>, vector<128x384xf32>, vector<8x384xf32> -> vector<8x384xf32>
    %57 = vector.extract_strided_slice %54 {offsets = [0, 0], sizes = [8, 128], strides = [1, 1]} : vector<8x384xf32> to vector<8x128xf32>
    %58 = vector.extract_strided_slice %56 {offsets = [0, 0], sizes = [8, 128], strides = [1, 1]} : vector<8x384xf32> to vector<8x128xf32>
    %59 = arith.addf %57, %58 : vector<8x128xf32>
    %60 = arith.negf %59 : vector<8x128xf32>
    %61 = math.exp %60 : vector<8x128xf32>
    %cst_35 = arith.constant 1.000000e+00 : f32
    %62 = vector.broadcast %cst_35 : f32 to vector<8x128xf32>
    %63 = arith.addf %62, %61 : vector<8x128xf32>
    %64 = arith.divf %62, %63 : vector<8x128xf32>
    %65 = vector.extract_strided_slice %54 {offsets = [0, 128], sizes = [8, 128], strides = [1, 1]} : vector<8x384xf32> to vector<8x128xf32>
    %66 = vector.extract_strided_slice %56 {offsets = [0, 128], sizes = [8, 128], strides = [1, 1]} : vector<8x384xf32> to vector<8x128xf32>
    %67 = arith.addf %65, %66 : vector<8x128xf32>
    %68 = arith.negf %67 : vector<8x128xf32>
    %69 = math.exp %68 : vector<8x128xf32>
    %cst_36 = arith.constant 1.000000e+00 : f32
    %70 = vector.broadcast %cst_36 : f32 to vector<8x128xf32>
    %71 = arith.addf %70, %69 : vector<8x128xf32>
    %72 = arith.divf %70, %71 : vector<8x128xf32>
    %73 = vector.extract_strided_slice %54 {offsets = [0, 256], sizes = [8, 128], strides = [1, 1]} : vector<8x384xf32> to vector<8x128xf32>
    %74 = vector.extract_strided_slice %56 {offsets = [0, 256], sizes = [8, 128], strides = [1, 1]} : vector<8x384xf32> to vector<8x128xf32>
    %75 = vector.broadcast %13 : vector<1x128xf32> to vector<8x128xf32>
    %76 = arith.addf %74, %75 : vector<8x128xf32>
    %77 = arith.mulf %64, %76 : vector<8x128xf32>
    %78 = arith.addf %73, %77 : vector<8x128xf32>
    %79 = math.tanh %78 : vector<8x128xf32>
    %cst_37 = arith.constant 1.000000e+00 : f32
    %80 = vector.broadcast %cst_37 : f32 to vector<8x128xf32>
    %81 = arith.subf %80, %72 : vector<8x128xf32>
    %82 = arith.mulf %81, %79 : vector<8x128xf32>
    %83 = arith.mulf %72, %55 : vector<8x128xf32>
    %84 = arith.addf %82, %83 : vector<8x128xf32>
    %c0_38 = arith.constant 0 : index
    %c0_39 = arith.constant 0 : index
    %85 = vector.load %arg17[%c0_38, %c0_39] : memref<8x128xf32, #tpu.memory_space<vmem>>, vector<8x128xf32>
    tpu.vector_store %arg17[%c0_38, %c0_39], %84 {strides = array<i32>} : memref<8x128xf32, #tpu.memory_space<vmem>>, vector<8x128xf32>,
    %86 = arith.index_cast %c1_i32 : i32 to index
    %c0_40 = arith.constant 0 : index
    %c0_41 = arith.constant 0 : index
    %87 = vector.load %arg16[%86, %c0_40, %c0_41] : memref<8x8x128xf32, #tpu.memory_space<vmem>>, vector<1x8x128xf32>
    %88 = vector.shape_cast %87 : vector<1x8x128xf32> to vector<8x128xf32>
    %89 = vector.shape_cast %84 : vector<8x128xf32> to vector<1x8x128xf32>
    tpu.vector_store %arg16[%86, %c0_40, %c0_41], %89 {strides = array<i32>} : memref<8x8x128xf32, #tpu.memory_space<vmem>>, vector<1x8x128xf32>,
    %c2_i32 = arith.constant 2 : i32
    %90 = arith.index_cast %c2_i32 : i32 to index
    %c0_42 = arith.constant 0 : index
    %c0_43 = arith.constant 0 : index
    %91 = vector.load %arg15[%90, %c0_42, %c0_43] : memref<8x8x384xf32, #tpu.memory_space<vmem>>, vector<1x8x384xf32>
    %92 = vector.shape_cast %91 : vector<1x8x384xf32> to vector<8x384xf32>
    %c0_44 = arith.constant 0 : index
    %c0_45 = arith.constant 0 : index
    %93 = vector.load %arg17[%c0_44, %c0_45] : memref<8x128xf32, #tpu.memory_space<vmem>>, vector<8x128xf32>
    %cst_46 = arith.constant dense<0.000000e+00> : vector<8x384xf32>
    %94 = tpu.matmul %93, %12, %cst_46 {dimension_numbers = #tpu.dot_dimension_numbers<[1], [0], [0], [1], [0, 0, 1, 1], [], []>} : vector<8x128xf32>, vector<128x384xf32>, vector<8x384xf32> -> vector<8x384xf32>
    %95 = vector.extract_strided_slice %92 {offsets = [0, 0], sizes = [8, 128], strides = [1, 1]} : vector<8x384xf32> to vector<8x128xf32>
    %96 = vector.extract_strided_slice %94 {offsets = [0, 0], sizes = [8, 128], strides = [1, 1]} : vector<8x384xf32> to vector<8x128xf32>
    %97 = arith.addf %95, %96 : vector<8x128xf32>
    %98 = arith.negf %97 : vector<8x128xf32>
    %99 = math.exp %98 : vector<8x128xf32>
    %cst_47 = arith.constant 1.000000e+00 : f32
    %100 = vector.broadcast %cst_47 : f32 to vector<8x128xf32>
    %101 = arith.addf %100, %99 : vector<8x128xf32>
    %102 = arith.divf %100, %101 : vector<8x128xf32>
    %103 = vector.extract_strided_slice %92 {offsets = [0, 128], sizes = [8, 128], strides = [1, 1]} : vector<8x384xf32> to vector<8x128xf32>
    %104 = vector.extract_strided_slice %94 {offsets = [0, 128], sizes = [8, 128], strides = [1, 1]} : vector<8x384xf32> to vector<8x128xf32>
    %105 = arith.addf %103, %104 : vector<8x128xf32>
    %106 = arith.negf %105 : vector<8x128xf32>
    %107 = math.exp %106 : vector<8x128xf32>
    %cst_48 = arith.constant 1.000000e+00 : f32
    %108 = vector.broadcast %cst_48 : f32 to vector<8x128xf32>
    %109 = arith.addf %108, %107 : vector<8x128xf32>
    %110 = arith.divf %108, %109 : vector<8x128xf32>
    %111 = vector.extract_strided_slice %92 {offsets = [0, 256], sizes = [8, 128], strides = [1, 1]} : vector<8x384xf32> to vector<8x128xf32>
    %112 = vector.extract_strided_slice %94 {offsets = [0, 256], sizes = [8, 128], strides = [1, 1]} : vector<8x384xf32> to vector<8x128xf32>
    %113 = vector.broadcast %13 : vector<1x128xf32> to vector<8x128xf32>
    %114 = arith.addf %112, %113 : vector<8x128xf32>
    %115 = arith.mulf %102, %114 : vector<8x128xf32>
    %116 = arith.addf %111, %115 : vector<8x128xf32>
    %117 = math.tanh %116 : vector<8x128xf32>
    %cst_49 = arith.constant 1.000000e+00 : f32
    %118 = vector.broadcast %cst_49 : f32 to vector<8x128xf32>
    %119 = arith.subf %118, %110 : vector<8x128xf32>
    %120 = arith.mulf %119, %117 : vector<8x128xf32>
    %121 = arith.mulf %110, %93 : vector<8x128xf32>
    %122 = arith.addf %120, %121 : vector<8x128xf32>
    %c0_50 = arith.constant 0 : index
    %c0_51 = arith.constant 0 : index
    %123 = vector.load %arg17[%c0_50, %c0_51] : memref<8x128xf32, #tpu.memory_space<vmem>>, vector<8x128xf32>
    tpu.vector_store %arg17[%c0_50, %c0_51], %122 {strides = array<i32>} : memref<8x128xf32, #tpu.memory_space<vmem>>, vector<8x128xf32>,
    %124 = arith.index_cast %c2_i32 : i32 to index
    %c0_52 = arith.constant 0 : index
    %c0_53 = arith.constant 0 : index
    %125 = vector.load %arg16[%124, %c0_52, %c0_53] : memref<8x8x128xf32, #tpu.memory_space<vmem>>, vector<1x8x128xf32>
    %126 = vector.shape_cast %125 : vector<1x8x128xf32> to vector<8x128xf32>
    %127 = vector.shape_cast %122 : vector<8x128xf32> to vector<1x8x128xf32>
    tpu.vector_store %arg16[%124, %c0_52, %c0_53], %127 {strides = array<i32>} : memref<8x8x128xf32, #tpu.memory_space<vmem>>, vector<1x8x128xf32>,
    %c3_i32 = arith.constant 3 : i32
    %128 = arith.index_cast %c3_i32 : i32 to index
    %c0_54 = arith.constant 0 : index
    %c0_55 = arith.constant 0 : index
    %129 = vector.load %arg15[%128, %c0_54, %c0_55] : memref<8x8x384xf32, #tpu.memory_space<vmem>>, vector<1x8x384xf32>
    %130 = vector.shape_cast %129 : vector<1x8x384xf32> to vector<8x384xf32>
    %c0_56 = arith.constant 0 : index
    %c0_57 = arith.constant 0 : index
    %131 = vector.load %arg17[%c0_56, %c0_57] : memref<8x128xf32, #tpu.memory_space<vmem>>, vector<8x128xf32>
    %cst_58 = arith.constant dense<0.000000e+00> : vector<8x384xf32>
    %132 = tpu.matmul %131, %12, %cst_58 {dimension_numbers = #tpu.dot_dimension_numbers<[1], [0], [0], [1], [0, 0, 1, 1], [], []>} : vector<8x128xf32>, vector<128x384xf32>, vector<8x384xf32> -> vector<8x384xf32>
    %133 = vector.extract_strided_slice %130 {offsets = [0, 0], sizes = [8, 128], strides = [1, 1]} : vector<8x384xf32> to vector<8x128xf32>
    %134 = vector.extract_strided_slice %132 {offsets = [0, 0], sizes = [8, 128], strides = [1, 1]} : vector<8x384xf32> to vector<8x128xf32>
    %135 = arith.addf %133, %134 : vector<8x128xf32>
    %136 = arith.negf %135 : vector<8x128xf32>
    %137 = math.exp %136 : vector<8x128xf32>
    %cst_59 = arith.constant 1.000000e+00 : f32
    %138 = vector.broadcast %cst_59 : f32 to vector<8x128xf32>
    %139 = arith.addf %138, %137 : vector<8x128xf32>
    %140 = arith.divf %138, %139 : vector<8x128xf32>
    %141 = vector.extract_strided_slice %130 {offsets = [0, 128], sizes = [8, 128], strides = [1, 1]} : vector<8x384xf32> to vector<8x128xf32>
    %142 = vector.extract_strided_slice %132 {offsets = [0, 128], sizes = [8, 128], strides = [1, 1]} : vector<8x384xf32> to vector<8x128xf32>
    %143 = arith.addf %141, %142 : vector<8x128xf32>
    %144 = arith.negf %143 : vector<8x128xf32>
    %145 = math.exp %144 : vector<8x128xf32>
    %cst_60 = arith.constant 1.000000e+00 : f32
    %146 = vector.broadcast %cst_60 : f32 to vector<8x128xf32>
    %147 = arith.addf %146, %145 : vector<8x128xf32>
    %148 = arith.divf %146, %147 : vector<8x128xf32>
    %149 = vector.extract_strided_slice %130 {offsets = [0, 256], sizes = [8, 128], strides = [1, 1]} : vector<8x384xf32> to vector<8x128xf32>
    %150 = vector.extract_strided_slice %132 {offsets = [0, 256], sizes = [8, 128], strides = [1, 1]} : vector<8x384xf32> to vector<8x128xf32>
    %151 = vector.broadcast %13 : vector<1x128xf32> to vector<8x128xf32>
    %152 = arith.addf %150, %151 : vector<8x128xf32>
    %153 = arith.mulf %140, %152 : vector<8x128xf32>
    %154 = arith.addf %149, %153 : vector<8x128xf32>
    %155 = math.tanh %154 : vector<8x128xf32>
    %cst_61 = arith.constant 1.000000e+00 : f32
    %156 = vector.broadcast %cst_61 : f32 to vector<8x128xf32>
    %157 = arith.subf %156, %148 : vector<8x128xf32>
    %158 = arith.mulf %157, %155 : vector<8x128xf32>
    %159 = arith.mulf %148, %131 : vector<8x128xf32>
    %160 = arith.addf %158, %159 : vector<8x128xf32>
    %c0_62 = arith.constant 0 : index
    %c0_63 = arith.constant 0 : index
    %161 = vector.load %arg17[%c0_62, %c0_63] : memref<8x128xf32, #tpu.memory_space<vmem>>, vector<8x128xf32>
    tpu.vector_store %arg17[%c0_62, %c0_63], %160 {strides = array<i32>} : memref<8x128xf32, #tpu.memory_space<vmem>>, vector<8x128xf32>,
    %162 = arith.index_cast %c3_i32 : i32 to index
    %c0_64 = arith.constant 0 : index
    %c0_65 = arith.constant 0 : index
    %163 = vector.load %arg16[%162, %c0_64, %c0_65] : memref<8x8x128xf32, #tpu.memory_space<vmem>>, vector<1x8x128xf32>
    %164 = vector.shape_cast %163 : vector<1x8x128xf32> to vector<8x128xf32>
    %165 = vector.shape_cast %160 : vector<8x128xf32> to vector<1x8x128xf32>
    tpu.vector_store %arg16[%162, %c0_64, %c0_65], %165 {strides = array<i32>} : memref<8x8x128xf32, #tpu.memory_space<vmem>>, vector<1x8x128xf32>,
    %c4_i32 = arith.constant 4 : i32
    %166 = arith.index_cast %c4_i32 : i32 to index
    %c0_66 = arith.constant 0 : index
    %c0_67 = arith.constant 0 : index
    %167 = vector.load %arg15[%166, %c0_66, %c0_67] : memref<8x8x384xf32, #tpu.memory_space<vmem>>, vector<1x8x384xf32>
    %168 = vector.shape_cast %167 : vector<1x8x384xf32> to vector<8x384xf32>
    %c0_68 = arith.constant 0 : index
    %c0_69 = arith.constant 0 : index
    %169 = vector.load %arg17[%c0_68, %c0_69] : memref<8x128xf32, #tpu.memory_space<vmem>>, vector<8x128xf32>
    %cst_70 = arith.constant dense<0.000000e+00> : vector<8x384xf32>
    %170 = tpu.matmul %169, %12, %cst_70 {dimension_numbers = #tpu.dot_dimension_numbers<[1], [0], [0], [1], [0, 0, 1, 1], [], []>} : vector<8x128xf32>, vector<128x384xf32>, vector<8x384xf32> -> vector<8x384xf32>
    %171 = vector.extract_strided_slice %168 {offsets = [0, 0], sizes = [8, 128], strides = [1, 1]} : vector<8x384xf32> to vector<8x128xf32>
    %172 = vector.extract_strided_slice %170 {offsets = [0, 0], sizes = [8, 128], strides = [1, 1]} : vector<8x384xf32> to vector<8x128xf32>
    %173 = arith.addf %171, %172 : vector<8x128xf32>
    %174 = arith.negf %173 : vector<8x128xf32>
    %175 = math.exp %174 : vector<8x128xf32>
    %cst_71 = arith.constant 1.000000e+00 : f32
    %176 = vector.broadcast %cst_71 : f32 to vector<8x128xf32>
    %177 = arith.addf %176, %175 : vector<8x128xf32>
    %178 = arith.divf %176, %177 : vector<8x128xf32>
    %179 = vector.extract_strided_slice %168 {offsets = [0, 128], sizes = [8, 128], strides = [1, 1]} : vector<8x384xf32> to vector<8x128xf32>
    %180 = vector.extract_strided_slice %170 {offsets = [0, 128], sizes = [8, 128], strides = [1, 1]} : vector<8x384xf32> to vector<8x128xf32>
    %181 = arith.addf %179, %180 : vector<8x128xf32>
    %182 = arith.negf %181 : vector<8x128xf32>
    %183 = math.exp %182 : vector<8x128xf32>
    %cst_72 = arith.constant 1.000000e+00 : f32
    %184 = vector.broadcast %cst_72 : f32 to vector<8x128xf32>
    %185 = arith.addf %184, %183 : vector<8x128xf32>
    %186 = arith.divf %184, %185 : vector<8x128xf32>
    %187 = vector.extract_strided_slice %168 {offsets = [0, 256], sizes = [8, 128], strides = [1, 1]} : vector<8x384xf32> to vector<8x128xf32>
    %188 = vector.extract_strided_slice %170 {offsets = [0, 256], sizes = [8, 128], strides = [1, 1]} : vector<8x384xf32> to vector<8x128xf32>
    %189 = vector.broadcast %13 : vector<1x128xf32> to vector<8x128xf32>
    %190 = arith.addf %188, %189 : vector<8x128xf32>
    %191 = arith.mulf %178, %190 : vector<8x128xf32>
    %192 = arith.addf %187, %191 : vector<8x128xf32>
    %193 = math.tanh %192 : vector<8x128xf32>
    %cst_73 = arith.constant 1.000000e+00 : f32
    %194 = vector.broadcast %cst_73 : f32 to vector<8x128xf32>
    %195 = arith.subf %194, %186 : vector<8x128xf32>
    %196 = arith.mulf %195, %193 : vector<8x128xf32>
    %197 = arith.mulf %186, %169 : vector<8x128xf32>
    %198 = arith.addf %196, %197 : vector<8x128xf32>
    %c0_74 = arith.constant 0 : index
    %c0_75 = arith.constant 0 : index
    %199 = vector.load %arg17[%c0_74, %c0_75] : memref<8x128xf32, #tpu.memory_space<vmem>>, vector<8x128xf32>
    tpu.vector_store %arg17[%c0_74, %c0_75], %198 {strides = array<i32>} : memref<8x128xf32, #tpu.memory_space<vmem>>, vector<8x128xf32>,
    %200 = arith.index_cast %c4_i32 : i32 to index
    %c0_76 = arith.constant 0 : index
    %c0_77 = arith.constant 0 : index
    %201 = vector.load %arg16[%200, %c0_76, %c0_77] : memref<8x8x128xf32, #tpu.memory_space<vmem>>, vector<1x8x128xf32>
    %202 = vector.shape_cast %201 : vector<1x8x128xf32> to vector<8x128xf32>
    %203 = vector.shape_cast %198 : vector<8x128xf32> to vector<1x8x128xf32>
    tpu.vector_store %arg16[%200, %c0_76, %c0_77], %203 {strides = array<i32>} : memref<8x8x128xf32, #tpu.memory_space<vmem>>, vector<1x8x128xf32>,
    %c5_i32 = arith.constant 5 : i32
    %204 = arith.index_cast %c5_i32 : i32 to index
    %c0_78 = arith.constant 0 : index
    %c0_79 = arith.constant 0 : index
    %205 = vector.load %arg15[%204, %c0_78, %c0_79] : memref<8x8x384xf32, #tpu.memory_space<vmem>>, vector<1x8x384xf32>
    %206 = vector.shape_cast %205 : vector<1x8x384xf32> to vector<8x384xf32>
    %c0_80 = arith.constant 0 : index
    %c0_81 = arith.constant 0 : index
    %207 = vector.load %arg17[%c0_80, %c0_81] : memref<8x128xf32, #tpu.memory_space<vmem>>, vector<8x128xf32>
    %cst_82 = arith.constant dense<0.000000e+00> : vector<8x384xf32>
    %208 = tpu.matmul %207, %12, %cst_82 {dimension_numbers = #tpu.dot_dimension_numbers<[1], [0], [0], [1], [0, 0, 1, 1], [], []>} : vector<8x128xf32>, vector<128x384xf32>, vector<8x384xf32> -> vector<8x384xf32>
    %209 = vector.extract_strided_slice %206 {offsets = [0, 0], sizes = [8, 128], strides = [1, 1]} : vector<8x384xf32> to vector<8x128xf32>
    %210 = vector.extract_strided_slice %208 {offsets = [0, 0], sizes = [8, 128], strides = [1, 1]} : vector<8x384xf32> to vector<8x128xf32>
    %211 = arith.addf %209, %210 : vector<8x128xf32>
    %212 = arith.negf %211 : vector<8x128xf32>
    %213 = math.exp %212 : vector<8x128xf32>
    %cst_83 = arith.constant 1.000000e+00 : f32
    %214 = vector.broadcast %cst_83 : f32 to vector<8x128xf32>
    %215 = arith.addf %214, %213 : vector<8x128xf32>
    %216 = arith.divf %214, %215 : vector<8x128xf32>
    %217 = vector.extract_strided_slice %206 {offsets = [0, 128], sizes = [8, 128], strides = [1, 1]} : vector<8x384xf32> to vector<8x128xf32>
    %218 = vector.extract_strided_slice %208 {offsets = [0, 128], sizes = [8, 128], strides = [1, 1]} : vector<8x384xf32> to vector<8x128xf32>
    %219 = arith.addf %217, %218 : vector<8x128xf32>
    %220 = arith.negf %219 : vector<8x128xf32>
    %221 = math.exp %220 : vector<8x128xf32>
    %cst_84 = arith.constant 1.000000e+00 : f32
    %222 = vector.broadcast %cst_84 : f32 to vector<8x128xf32>
    %223 = arith.addf %222, %221 : vector<8x128xf32>
    %224 = arith.divf %222, %223 : vector<8x128xf32>
    %225 = vector.extract_strided_slice %206 {offsets = [0, 256], sizes = [8, 128], strides = [1, 1]} : vector<8x384xf32> to vector<8x128xf32>
    %226 = vector.extract_strided_slice %208 {offsets = [0, 256], sizes = [8, 128], strides = [1, 1]} : vector<8x384xf32> to vector<8x128xf32>
    %227 = vector.broadcast %13 : vector<1x128xf32> to vector<8x128xf32>
    %228 = arith.addf %226, %227 : vector<8x128xf32>
    %229 = arith.mulf %216, %228 : vector<8x128xf32>
    %230 = arith.addf %225, %229 : vector<8x128xf32>
    %231 = math.tanh %230 : vector<8x128xf32>
    %cst_85 = arith.constant 1.000000e+00 : f32
    %232 = vector.broadcast %cst_85 : f32 to vector<8x128xf32>
    %233 = arith.subf %232, %224 : vector<8x128xf32>
    %234 = arith.mulf %233, %231 : vector<8x128xf32>
    %235 = arith.mulf %224, %207 : vector<8x128xf32>
    %236 = arith.addf %234, %235 : vector<8x128xf32>
    %c0_86 = arith.constant 0 : index
    %c0_87 = arith.constant 0 : index
    %237 = vector.load %arg17[%c0_86, %c0_87] : memref<8x128xf32, #tpu.memory_space<vmem>>, vector<8x128xf32>
    tpu.vector_store %arg17[%c0_86, %c0_87], %236 {strides = array<i32>} : memref<8x128xf32, #tpu.memory_space<vmem>>, vector<8x128xf32>,
    %238 = arith.index_cast %c5_i32 : i32 to index
    %c0_88 = arith.constant 0 : index
    %c0_89 = arith.constant 0 : index
    %239 = vector.load %arg16[%238, %c0_88, %c0_89] : memref<8x8x128xf32, #tpu.memory_space<vmem>>, vector<1x8x128xf32>
    %240 = vector.shape_cast %239 : vector<1x8x128xf32> to vector<8x128xf32>
    %241 = vector.shape_cast %236 : vector<8x128xf32> to vector<1x8x128xf32>
    tpu.vector_store %arg16[%238, %c0_88, %c0_89], %241 {strides = array<i32>} : memref<8x8x128xf32, #tpu.memory_space<vmem>>, vector<1x8x128xf32>,
    %c6_i32 = arith.constant 6 : i32
    %242 = arith.index_cast %c6_i32 : i32 to index
    %c0_90 = arith.constant 0 : index
    %c0_91 = arith.constant 0 : index
    %243 = vector.load %arg15[%242, %c0_90, %c0_91] : memref<8x8x384xf32, #tpu.memory_space<vmem>>, vector<1x8x384xf32>
    %244 = vector.shape_cast %243 : vector<1x8x384xf32> to vector<8x384xf32>
    %c0_92 = arith.constant 0 : index
    %c0_93 = arith.constant 0 : index
    %245 = vector.load %arg17[%c0_92, %c0_93] : memref<8x128xf32, #tpu.memory_space<vmem>>, vector<8x128xf32>
    %cst_94 = arith.constant dense<0.000000e+00> : vector<8x384xf32>
    %246 = tpu.matmul %245, %12, %cst_94 {dimension_numbers = #tpu.dot_dimension_numbers<[1], [0], [0], [1], [0, 0, 1, 1], [], []>} : vector<8x128xf32>, vector<128x384xf32>, vector<8x384xf32> -> vector<8x384xf32>
    %247 = vector.extract_strided_slice %244 {offsets = [0, 0], sizes = [8, 128], strides = [1, 1]} : vector<8x384xf32> to vector<8x128xf32>
    %248 = vector.extract_strided_slice %246 {offsets = [0, 0], sizes = [8, 128], strides = [1, 1]} : vector<8x384xf32> to vector<8x128xf32>
    %249 = arith.addf %247, %248 : vector<8x128xf32>
    %250 = arith.negf %249 : vector<8x128xf32>
    %251 = math.exp %250 : vector<8x128xf32>
    %cst_95 = arith.constant 1.000000e+00 : f32
    %252 = vector.broadcast %cst_95 : f32 to vector<8x128xf32>
    %253 = arith.addf %252, %251 : vector<8x128xf32>
    %254 = arith.divf %252, %253 : vector<8x128xf32>
    %255 = vector.extract_strided_slice %244 {offsets = [0, 128], sizes = [8, 128], strides = [1, 1]} : vector<8x384xf32> to vector<8x128xf32>
    %256 = vector.extract_strided_slice %246 {offsets = [0, 128], sizes = [8, 128], strides = [1, 1]} : vector<8x384xf32> to vector<8x128xf32>
    %257 = arith.addf %255, %256 : vector<8x128xf32>
    %258 = arith.negf %257 : vector<8x128xf32>
    %259 = math.exp %258 : vector<8x128xf32>
    %cst_96 = arith.constant 1.000000e+00 : f32
    %260 = vector.broadcast %cst_96 : f32 to vector<8x128xf32>
    %261 = arith.addf %260, %259 : vector<8x128xf32>
    %262 = arith.divf %260, %261 : vector<8x128xf32>
    %263 = vector.extract_strided_slice %244 {offsets = [0, 256], sizes = [8, 128], strides = [1, 1]} : vector<8x384xf32> to vector<8x128xf32>
    %264 = vector.extract_strided_slice %246 {offsets = [0, 256], sizes = [8, 128], strides = [1, 1]} : vector<8x384xf32> to vector<8x128xf32>
    %265 = vector.broadcast %13 : vector<1x128xf32> to vector<8x128xf32>
    %266 = arith.addf %264, %265 : vector<8x128xf32>
    %267 = arith.mulf %254, %266 : vector<8x128xf32>
    %268 = arith.addf %263, %267 : vector<8x128xf32>
    %269 = math.tanh %268 : vector<8x128xf32>
    %cst_97 = arith.constant 1.000000e+00 : f32
    %270 = vector.broadcast %cst_97 : f32 to vector<8x128xf32>
    %271 = arith.subf %270, %262 : vector<8x128xf32>
    %272 = arith.mulf %271, %269 : vector<8x128xf32>
    %273 = arith.mulf %262, %245 : vector<8x128xf32>
    %274 = arith.addf %272, %273 : vector<8x128xf32>
    %c0_98 = arith.constant 0 : index
    %c0_99 = arith.constant 0 : index
    %275 = vector.load %arg17[%c0_98, %c0_99] : memref<8x128xf32, #tpu.memory_space<vmem>>, vector<8x128xf32>
    tpu.vector_store %arg17[%c0_98, %c0_99], %274 {strides = array<i32>} : memref<8x128xf32, #tpu.memory_space<vmem>>, vector<8x128xf32>,
    %276 = arith.index_cast %c6_i32 : i32 to index
    %c0_100 = arith.constant 0 : index
    %c0_101 = arith.constant 0 : index
    %277 = vector.load %arg16[%276, %c0_100, %c0_101] : memref<8x8x128xf32, #tpu.memory_space<vmem>>, vector<1x8x128xf32>
    %278 = vector.shape_cast %277 : vector<1x8x128xf32> to vector<8x128xf32>
    %279 = vector.shape_cast %274 : vector<8x128xf32> to vector<1x8x128xf32>
    tpu.vector_store %arg16[%276, %c0_100, %c0_101], %279 {strides = array<i32>} : memref<8x8x128xf32, #tpu.memory_space<vmem>>, vector<1x8x128xf32>,
    %c7_i32 = arith.constant 7 : i32
    %280 = arith.index_cast %c7_i32 : i32 to index
    %c0_102 = arith.constant 0 : index
    %c0_103 = arith.constant 0 : index
    %281 = vector.load %arg15[%280, %c0_102, %c0_103] : memref<8x8x384xf32, #tpu.memory_space<vmem>>, vector<1x8x384xf32>
    %282 = vector.shape_cast %281 : vector<1x8x384xf32> to vector<8x384xf32>
    %c0_104 = arith.constant 0 : index
    %c0_105 = arith.constant 0 : index
    %283 = vector.load %arg17[%c0_104, %c0_105] : memref<8x128xf32, #tpu.memory_space<vmem>>, vector<8x128xf32>
    %cst_106 = arith.constant dense<0.000000e+00> : vector<8x384xf32>
    %284 = tpu.matmul %283, %12, %cst_106 {dimension_numbers = #tpu.dot_dimension_numbers<[1], [0], [0], [1], [0, 0, 1, 1], [], []>} : vector<8x128xf32>, vector<128x384xf32>, vector<8x384xf32> -> vector<8x384xf32>
    %285 = vector.extract_strided_slice %282 {offsets = [0, 0], sizes = [8, 128], strides = [1, 1]} : vector<8x384xf32> to vector<8x128xf32>
    %286 = vector.extract_strided_slice %284 {offsets = [0, 0], sizes = [8, 128], strides = [1, 1]} : vector<8x384xf32> to vector<8x128xf32>
    %287 = arith.addf %285, %286 : vector<8x128xf32>
    %288 = arith.negf %287 : vector<8x128xf32>
    %289 = math.exp %288 : vector<8x128xf32>
    %cst_107 = arith.constant 1.000000e+00 : f32
    %290 = vector.broadcast %cst_107 : f32 to vector<8x128xf32>
    %291 = arith.addf %290, %289 : vector<8x128xf32>
    %292 = arith.divf %290, %291 : vector<8x128xf32>
    %293 = vector.extract_strided_slice %282 {offsets = [0, 128], sizes = [8, 128], strides = [1, 1]} : vector<8x384xf32> to vector<8x128xf32>
    %294 = vector.extract_strided_slice %284 {offsets = [0, 128], sizes = [8, 128], strides = [1, 1]} : vector<8x384xf32> to vector<8x128xf32>
    %295 = arith.addf %293, %294 : vector<8x128xf32>
    %296 = arith.negf %295 : vector<8x128xf32>
    %297 = math.exp %296 : vector<8x128xf32>
    %cst_108 = arith.constant 1.000000e+00 : f32
    %298 = vector.broadcast %cst_108 : f32 to vector<8x128xf32>
    %299 = arith.addf %298, %297 : vector<8x128xf32>
    %300 = arith.divf %298, %299 : vector<8x128xf32>
    %301 = vector.extract_strided_slice %282 {offsets = [0, 256], sizes = [8, 128], strides = [1, 1]} : vector<8x384xf32> to vector<8x128xf32>
    %302 = vector.extract_strided_slice %284 {offsets = [0, 256], sizes = [8, 128], strides = [1, 1]} : vector<8x384xf32> to vector<8x128xf32>
    %303 = vector.broadcast %13 : vector<1x128xf32> to vector<8x128xf32>
    %304 = arith.addf %302, %303 : vector<8x128xf32>
    %305 = arith.mulf %292, %304 : vector<8x128xf32>
    %306 = arith.addf %301, %305 : vector<8x128xf32>
    %307 = math.tanh %306 : vector<8x128xf32>
    %cst_109 = arith.constant 1.000000e+00 : f32
    %308 = vector.broadcast %cst_109 : f32 to vector<8x128xf32>
    %309 = arith.subf %308, %300 : vector<8x128xf32>
    %310 = arith.mulf %309, %307 : vector<8x128xf32>
    %311 = arith.mulf %300, %283 : vector<8x128xf32>
    %312 = arith.addf %310, %311 : vector<8x128xf32>
    %c0_110 = arith.constant 0 : index
    %c0_111 = arith.constant 0 : index
    %313 = vector.load %arg17[%c0_110, %c0_111] : memref<8x128xf32, #tpu.memory_space<vmem>>, vector<8x128xf32>
    tpu.vector_store %arg17[%c0_110, %c0_111], %312 {strides = array<i32>} : memref<8x128xf32, #tpu.memory_space<vmem>>, vector<8x128xf32>,
    %314 = arith.index_cast %c7_i32 : i32 to index
    %c0_112 = arith.constant 0 : index
    %c0_113 = arith.constant 0 : index
    %315 = vector.load %arg16[%314, %c0_112, %c0_113] : memref<8x8x128xf32, #tpu.memory_space<vmem>>, vector<1x8x128xf32>
    %316 = vector.shape_cast %315 : vector<1x8x128xf32> to vector<8x128xf32>
    %317 = vector.shape_cast %312 : vector<8x128xf32> to vector<1x8x128xf32>
    tpu.vector_store %arg16[%314, %c0_112, %c0_113], %317 {strides = array<i32>} : memref<8x8x128xf32, #tpu.memory_space<vmem>>, vector<1x8x128xf32>,
    %c8_i32 = arith.constant 8 : i32
    %c0_114 = arith.constant 0 : index
    %c0_115 = arith.constant 0 : index
    %318 = vector.load %arg17[%c0_114, %c0_115] : memref<8x128xf32, #tpu.memory_space<vmem>>, vector<8x128xf32>
    %c0_116 = arith.constant 0 : index
    %c0_117 = arith.constant 0 : index
    %c0_118 = arith.constant 0 : index
    %319 = vector.load %arg14[%c0_116, %c0_117, %c0_118] : memref<2x8x128xf32, #tpu.memory_space<vmem>>, vector<1x8x128xf32>
    %320 = vector.shape_cast %319 : vector<1x8x128xf32> to vector<8x128xf32>
    %321 = vector.shape_cast %318 : vector<8x128xf32> to vector<1x8x128xf32>
    tpu.vector_store %arg14[%c0_116, %c0_117, %c0_118], %321 {strides = array<i32>} : memref<2x8x128xf32, #tpu.memory_space<vmem>>, vector<1x8x128xf32>,
    %c0_119 = arith.constant 0 : index
    %c0_120 = arith.constant 0 : index
    %c0_121 = arith.constant 0 : index
    %322 = vector.load %arg16[%c0_119, %c0_120, %c0_121] : memref<8x8x128xf32, #tpu.memory_space<vmem>>, vector<8x8x128xf32>
    %323 = vector.shape_cast %322 : vector<8x8x128xf32> to vector<64x128xf32>
    %c0_122 = arith.constant 0 : index
    %c0_123 = arith.constant 0 : index
    %324 = vector.load %arg7[%c0_122, %c0_123] : memref<128x384xf32, #tpu.memory_space<vmem>>, vector<128x384xf32>
    %cst_124 = arith.constant dense<0.000000e+00> : vector<64x384xf32>
    %325 = tpu.matmul %323, %324, %cst_124 {dimension_numbers = #tpu.dot_dimension_numbers<[1], [0], [0], [1], [0, 0, 1, 1], [], []>} : vector<64x128xf32>, vector<128x384xf32>, vector<64x384xf32> -> vector<64x384xf32>
    %c0_125 = arith.constant 0 : index
    %c0_126 = arith.constant 0 : index
    %326 = vector.load %arg9[%c0_125, %c0_126] : memref<1x384xf32, #tpu.memory_space<vmem>>, vector<1x384xf32>
    %327 = vector.broadcast %326 : vector<1x384xf32> to vector<64x384xf32>
    %328 = arith.addf %325, %327 : vector<64x384xf32>
    %329 = vector.shape_cast %328 : vector<64x384xf32> to vector<8x8x384xf32>
    %c0_127 = arith.constant 0 : index
    %c0_128 = arith.constant 0 : index
    %c0_129 = arith.constant 0 : index
    %330 = vector.load %arg15[%c0_127, %c0_128, %c0_129] : memref<8x8x384xf32, #tpu.memory_space<vmem>>, vector<8x8x384xf32>
    tpu.vector_store %arg15[%c0_127, %c0_128, %c0_129], %329 {strides = array<i32>} : memref<8x8x384xf32, #tpu.memory_space<vmem>>, vector<8x8x384xf32>,
    %c1 = arith.constant 1 : index
    %c0_130 = arith.constant 0 : index
    %c0_131 = arith.constant 0 : index
    %331 = vector.load %arg2[%c1, %c0_130, %c0_131] : memref<2x8x128xf32, #tpu.memory_space<vmem>>, vector<1x8x128xf32>
    %332 = vector.shape_cast %331 : vector<1x8x128xf32> to vector<8x128xf32>
    %c0_132 = arith.constant 0 : index
    %c0_133 = arith.constant 0 : index
    %333 = vector.load %arg17[%c0_132, %c0_133] : memref<8x128xf32, #tpu.memory_space<vmem>>, vector<8x128xf32>
    tpu.vector_store %arg17[%c0_132, %c0_133], %332 {strides = array<i32>} : memref<8x128xf32, #tpu.memory_space<vmem>>, vector<8x128xf32>,
    %c0_134 = arith.constant 0 : index
    %c0_135 = arith.constant 0 : index
    %334 = vector.load %arg8[%c0_134, %c0_135] : memref<128x384xf32, #tpu.memory_space<vmem>>, vector<128x384xf32>
    %c0_136 = arith.constant 0 : index
    %c0_137 = arith.constant 0 : index
    %335 = vector.load %arg10[%c0_136, %c0_137] : memref<1x128xf32, #tpu.memory_space<vmem>>, vector<1x128xf32>
    %c0_i32_138 = arith.constant 0 : i32
    %336 = arith.index_cast %c0_i32_138 : i32 to index
    %c0_139 = arith.constant 0 : index
    %c0_140 = arith.constant 0 : index
    %337 = vector.load %arg15[%336, %c0_139, %c0_140] : memref<8x8x384xf32, #tpu.memory_space<vmem>>, vector<1x8x384xf32>
    %338 = vector.shape_cast %337 : vector<1x8x384xf32> to vector<8x384xf32>
    %c0_141 = arith.constant 0 : index
    %c0_142 = arith.constant 0 : index
    %339 = vector.load %arg17[%c0_141, %c0_142] : memref<8x128xf32, #tpu.memory_space<vmem>>, vector<8x128xf32>
    %cst_143 = arith.constant dense<0.000000e+00> : vector<8x384xf32>
    %340 = tpu.matmul %339, %334, %cst_143 {dimension_numbers = #tpu.dot_dimension_numbers<[1], [0], [0], [1], [0, 0, 1, 1], [], []>} : vector<8x128xf32>, vector<128x384xf32>, vector<8x384xf32> -> vector<8x384xf32>
    %341 = vector.extract_strided_slice %338 {offsets = [0, 0], sizes = [8, 128], strides = [1, 1]} : vector<8x384xf32> to vector<8x128xf32>
    %342 = vector.extract_strided_slice %340 {offsets = [0, 0], sizes = [8, 128], strides = [1, 1]} : vector<8x384xf32> to vector<8x128xf32>
    %343 = arith.addf %341, %342 : vector<8x128xf32>
    %344 = arith.negf %343 : vector<8x128xf32>
    %345 = math.exp %344 : vector<8x128xf32>
    %cst_144 = arith.constant 1.000000e+00 : f32
    %346 = vector.broadcast %cst_144 : f32 to vector<8x128xf32>
    %347 = arith.addf %346, %345 : vector<8x128xf32>
    %348 = arith.divf %346, %347 : vector<8x128xf32>
    %349 = vector.extract_strided_slice %338 {offsets = [0, 128], sizes = [8, 128], strides = [1, 1]} : vector<8x384xf32> to vector<8x128xf32>
    %350 = vector.extract_strided_slice %340 {offsets = [0, 128], sizes = [8, 128], strides = [1, 1]} : vector<8x384xf32> to vector<8x128xf32>
    %351 = arith.addf %349, %350 : vector<8x128xf32>
    %352 = arith.negf %351 : vector<8x128xf32>
    %353 = math.exp %352 : vector<8x128xf32>
    %cst_145 = arith.constant 1.000000e+00 : f32
    %354 = vector.broadcast %cst_145 : f32 to vector<8x128xf32>
    %355 = arith.addf %354, %353 : vector<8x128xf32>
    %356 = arith.divf %354, %355 : vector<8x128xf32>
    %357 = vector.extract_strided_slice %338 {offsets = [0, 256], sizes = [8, 128], strides = [1, 1]} : vector<8x384xf32> to vector<8x128xf32>
    %358 = vector.extract_strided_slice %340 {offsets = [0, 256], sizes = [8, 128], strides = [1, 1]} : vector<8x384xf32> to vector<8x128xf32>
    %359 = vector.broadcast %335 : vector<1x128xf32> to vector<8x128xf32>
    %360 = arith.addf %358, %359 : vector<8x128xf32>
    %361 = arith.mulf %348, %360 : vector<8x128xf32>
    %362 = arith.addf %357, %361 : vector<8x128xf32>
    %363 = math.tanh %362 : vector<8x128xf32>
    %cst_146 = arith.constant 1.000000e+00 : f32
    %364 = vector.broadcast %cst_146 : f32 to vector<8x128xf32>
    %365 = arith.subf %364, %356 : vector<8x128xf32>
    %366 = arith.mulf %365, %363 : vector<8x128xf32>
    %367 = arith.mulf %356, %339 : vector<8x128xf32>
    %368 = arith.addf %366, %367 : vector<8x128xf32>
    %c0_147 = arith.constant 0 : index
    %c0_148 = arith.constant 0 : index
    %369 = vector.load %arg17[%c0_147, %c0_148] : memref<8x128xf32, #tpu.memory_space<vmem>>, vector<8x128xf32>
    tpu.vector_store %arg17[%c0_147, %c0_148], %368 {strides = array<i32>} : memref<8x128xf32, #tpu.memory_space<vmem>>, vector<8x128xf32>,
    %370 = arith.index_cast %c0_i32_138 : i32 to index
    %c0_149 = arith.constant 0 : index
    %c0_150 = arith.constant 0 : index
    %371 = vector.load %arg16[%370, %c0_149, %c0_150] : memref<8x8x128xf32, #tpu.memory_space<vmem>>, vector<1x8x128xf32>
    %372 = vector.shape_cast %371 : vector<1x8x128xf32> to vector<8x128xf32>
    %373 = vector.shape_cast %368 : vector<8x128xf32> to vector<1x8x128xf32>
    tpu.vector_store %arg16[%370, %c0_149, %c0_150], %373 {strides = array<i32>} : memref<8x8x128xf32, #tpu.memory_space<vmem>>, vector<1x8x128xf32>,
    %c1_i32_151 = arith.constant 1 : i32
    %374 = arith.index_cast %c1_i32_151 : i32 to index
    %c0_152 = arith.constant 0 : index
    %c0_153 = arith.constant 0 : index
    %375 = vector.load %arg15[%374, %c0_152, %c0_153] : memref<8x8x384xf32, #tpu.memory_space<vmem>>, vector<1x8x384xf32>
    %376 = vector.shape_cast %375 : vector<1x8x384xf32> to vector<8x384xf32>
    %c0_154 = arith.constant 0 : index
    %c0_155 = arith.constant 0 : index
    %377 = vector.load %arg17[%c0_154, %c0_155] : memref<8x128xf32, #tpu.memory_space<vmem>>, vector<8x128xf32>
    %cst_156 = arith.constant dense<0.000000e+00> : vector<8x384xf32>
    %378 = tpu.matmul %377, %334, %cst_156 {dimension_numbers = #tpu.dot_dimension_numbers<[1], [0], [0], [1], [0, 0, 1, 1], [], []>} : vector<8x128xf32>, vector<128x384xf32>, vector<8x384xf32> -> vector<8x384xf32>
    %379 = vector.extract_strided_slice %376 {offsets = [0, 0], sizes = [8, 128], strides = [1, 1]} : vector<8x384xf32> to vector<8x128xf32>
    %380 = vector.extract_strided_slice %378 {offsets = [0, 0], sizes = [8, 128], strides = [1, 1]} : vector<8x384xf32> to vector<8x128xf32>
    %381 = arith.addf %379, %380 : vector<8x128xf32>
    %382 = arith.negf %381 : vector<8x128xf32>
    %383 = math.exp %382 : vector<8x128xf32>
    %cst_157 = arith.constant 1.000000e+00 : f32
    %384 = vector.broadcast %cst_157 : f32 to vector<8x128xf32>
    %385 = arith.addf %384, %383 : vector<8x128xf32>
    %386 = arith.divf %384, %385 : vector<8x128xf32>
    %387 = vector.extract_strided_slice %376 {offsets = [0, 128], sizes = [8, 128], strides = [1, 1]} : vector<8x384xf32> to vector<8x128xf32>
    %388 = vector.extract_strided_slice %378 {offsets = [0, 128], sizes = [8, 128], strides = [1, 1]} : vector<8x384xf32> to vector<8x128xf32>
    %389 = arith.addf %387, %388 : vector<8x128xf32>
    %390 = arith.negf %389 : vector<8x128xf32>
    %391 = math.exp %390 : vector<8x128xf32>
    %cst_158 = arith.constant 1.000000e+00 : f32
    %392 = vector.broadcast %cst_158 : f32 to vector<8x128xf32>
    %393 = arith.addf %392, %391 : vector<8x128xf32>
    %394 = arith.divf %392, %393 : vector<8x128xf32>
    %395 = vector.extract_strided_slice %376 {offsets = [0, 256], sizes = [8, 128], strides = [1, 1]} : vector<8x384xf32> to vector<8x128xf32>
    %396 = vector.extract_strided_slice %378 {offsets = [0, 256], sizes = [8, 128], strides = [1, 1]} : vector<8x384xf32> to vector<8x128xf32>
    %397 = vector.broadcast %335 : vector<1x128xf32> to vector<8x128xf32>
    %398 = arith.addf %396, %397 : vector<8x128xf32>
    %399 = arith.mulf %386, %398 : vector<8x128xf32>
    %400 = arith.addf %395, %399 : vector<8x128xf32>
    %401 = math.tanh %400 : vector<8x128xf32>
    %cst_159 = arith.constant 1.000000e+00 : f32
    %402 = vector.broadcast %cst_159 : f32 to vector<8x128xf32>
    %403 = arith.subf %402, %394 : vector<8x128xf32>
    %404 = arith.mulf %403, %401 : vector<8x128xf32>
    %405 = arith.mulf %394, %377 : vector<8x128xf32>
    %406 = arith.addf %404, %405 : vector<8x128xf32>
    %c0_160 = arith.constant 0 : index
    %c0_161 = arith.constant 0 : index
    %407 = vector.load %arg17[%c0_160, %c0_161] : memref<8x128xf32, #tpu.memory_space<vmem>>, vector<8x128xf32>
    tpu.vector_store %arg17[%c0_160, %c0_161], %406 {strides = array<i32>} : memref<8x128xf32, #tpu.memory_space<vmem>>, vector<8x128xf32>,
    %408 = arith.index_cast %c1_i32_151 : i32 to index
    %c0_162 = arith.constant 0 : index
    %c0_163 = arith.constant 0 : index
    %409 = vector.load %arg16[%408, %c0_162, %c0_163] : memref<8x8x128xf32, #tpu.memory_space<vmem>>, vector<1x8x128xf32>
    %410 = vector.shape_cast %409 : vector<1x8x128xf32> to vector<8x128xf32>
    %411 = vector.shape_cast %406 : vector<8x128xf32> to vector<1x8x128xf32>
    tpu.vector_store %arg16[%408, %c0_162, %c0_163], %411 {strides = array<i32>} : memref<8x8x128xf32, #tpu.memory_space<vmem>>, vector<1x8x128xf32>,
    %c2_i32_164 = arith.constant 2 : i32
    %412 = arith.index_cast %c2_i32_164 : i32 to index
    %c0_165 = arith.constant 0 : index
    %c0_166 = arith.constant 0 : index
    %413 = vector.load %arg15[%412, %c0_165, %c0_166] : memref<8x8x384xf32, #tpu.memory_space<vmem>>, vector<1x8x384xf32>
    %414 = vector.shape_cast %413 : vector<1x8x384xf32> to vector<8x384xf32>
    %c0_167 = arith.constant 0 : index
    %c0_168 = arith.constant 0 : index
    %415 = vector.load %arg17[%c0_167, %c0_168] : memref<8x128xf32, #tpu.memory_space<vmem>>, vector<8x128xf32>
    %cst_169 = arith.constant dense<0.000000e+00> : vector<8x384xf32>
    %416 = tpu.matmul %415, %334, %cst_169 {dimension_numbers = #tpu.dot_dimension_numbers<[1], [0], [0], [1], [0, 0, 1, 1], [], []>} : vector<8x128xf32>, vector<128x384xf32>, vector<8x384xf32> -> vector<8x384xf32>
    %417 = vector.extract_strided_slice %414 {offsets = [0, 0], sizes = [8, 128], strides = [1, 1]} : vector<8x384xf32> to vector<8x128xf32>
    %418 = vector.extract_strided_slice %416 {offsets = [0, 0], sizes = [8, 128], strides = [1, 1]} : vector<8x384xf32> to vector<8x128xf32>
    %419 = arith.addf %417, %418 : vector<8x128xf32>
    %420 = arith.negf %419 : vector<8x128xf32>
    %421 = math.exp %420 : vector<8x128xf32>
    %cst_170 = arith.constant 1.000000e+00 : f32
    %422 = vector.broadcast %cst_170 : f32 to vector<8x128xf32>
    %423 = arith.addf %422, %421 : vector<8x128xf32>
    %424 = arith.divf %422, %423 : vector<8x128xf32>
    %425 = vector.extract_strided_slice %414 {offsets = [0, 128], sizes = [8, 128], strides = [1, 1]} : vector<8x384xf32> to vector<8x128xf32>
    %426 = vector.extract_strided_slice %416 {offsets = [0, 128], sizes = [8, 128], strides = [1, 1]} : vector<8x384xf32> to vector<8x128xf32>
    %427 = arith.addf %425, %426 : vector<8x128xf32>
    %428 = arith.negf %427 : vector<8x128xf32>
    %429 = math.exp %428 : vector<8x128xf32>
    %cst_171 = arith.constant 1.000000e+00 : f32
    %430 = vector.broadcast %cst_171 : f32 to vector<8x128xf32>
    %431 = arith.addf %430, %429 : vector<8x128xf32>
    %432 = arith.divf %430, %431 : vector<8x128xf32>
    %433 = vector.extract_strided_slice %414 {offsets = [0, 256], sizes = [8, 128], strides = [1, 1]} : vector<8x384xf32> to vector<8x128xf32>
    %434 = vector.extract_strided_slice %416 {offsets = [0, 256], sizes = [8, 128], strides = [1, 1]} : vector<8x384xf32> to vector<8x128xf32>
    %435 = vector.broadcast %335 : vector<1x128xf32> to vector<8x128xf32>
    %436 = arith.addf %434, %435 : vector<8x128xf32>
    %437 = arith.mulf %424, %436 : vector<8x128xf32>
    %438 = arith.addf %433, %437 : vector<8x128xf32>
    %439 = math.tanh %438 : vector<8x128xf32>
    %cst_172 = arith.constant 1.000000e+00 : f32
    %440 = vector.broadcast %cst_172 : f32 to vector<8x128xf32>
    %441 = arith.subf %440, %432 : vector<8x128xf32>
    %442 = arith.mulf %441, %439 : vector<8x128xf32>
    %443 = arith.mulf %432, %415 : vector<8x128xf32>
    %444 = arith.addf %442, %443 : vector<8x128xf32>
    %c0_173 = arith.constant 0 : index
    %c0_174 = arith.constant 0 : index
    %445 = vector.load %arg17[%c0_173, %c0_174] : memref<8x128xf32, #tpu.memory_space<vmem>>, vector<8x128xf32>
    tpu.vector_store %arg17[%c0_173, %c0_174], %444 {strides = array<i32>} : memref<8x128xf32, #tpu.memory_space<vmem>>, vector<8x128xf32>,
    %446 = arith.index_cast %c2_i32_164 : i32 to index
    %c0_175 = arith.constant 0 : index
    %c0_176 = arith.constant 0 : index
    %447 = vector.load %arg16[%446, %c0_175, %c0_176] : memref<8x8x128xf32, #tpu.memory_space<vmem>>, vector<1x8x128xf32>
    %448 = vector.shape_cast %447 : vector<1x8x128xf32> to vector<8x128xf32>
    %449 = vector.shape_cast %444 : vector<8x128xf32> to vector<1x8x128xf32>
    tpu.vector_store %arg16[%446, %c0_175, %c0_176], %449 {strides = array<i32>} : memref<8x8x128xf32, #tpu.memory_space<vmem>>, vector<1x8x128xf32>,
    %c3_i32_177 = arith.constant 3 : i32
    %450 = arith.index_cast %c3_i32_177 : i32 to index
    %c0_178 = arith.constant 0 : index
    %c0_179 = arith.constant 0 : index
    %451 = vector.load %arg15[%450, %c0_178, %c0_179] : memref<8x8x384xf32, #tpu.memory_space<vmem>>, vector<1x8x384xf32>
    %452 = vector.shape_cast %451 : vector<1x8x384xf32> to vector<8x384xf32>
    %c0_180 = arith.constant 0 : index
    %c0_181 = arith.constant 0 : index
    %453 = vector.load %arg17[%c0_180, %c0_181] : memref<8x128xf32, #tpu.memory_space<vmem>>, vector<8x128xf32>
    %cst_182 = arith.constant dense<0.000000e+00> : vector<8x384xf32>
    %454 = tpu.matmul %453, %334, %cst_182 {dimension_numbers = #tpu.dot_dimension_numbers<[1], [0], [0], [1], [0, 0, 1, 1], [], []>} : vector<8x128xf32>, vector<128x384xf32>, vector<8x384xf32> -> vector<8x384xf32>
    %455 = vector.extract_strided_slice %452 {offsets = [0, 0], sizes = [8, 128], strides = [1, 1]} : vector<8x384xf32> to vector<8x128xf32>
    %456 = vector.extract_strided_slice %454 {offsets = [0, 0], sizes = [8, 128], strides = [1, 1]} : vector<8x384xf32> to vector<8x128xf32>
    %457 = arith.addf %455, %456 : vector<8x128xf32>
    %458 = arith.negf %457 : vector<8x128xf32>
    %459 = math.exp %458 : vector<8x128xf32>
    %cst_183 = arith.constant 1.000000e+00 : f32
    %460 = vector.broadcast %cst_183 : f32 to vector<8x128xf32>
    %461 = arith.addf %460, %459 : vector<8x128xf32>
    %462 = arith.divf %460, %461 : vector<8x128xf32>
    %463 = vector.extract_strided_slice %452 {offsets = [0, 128], sizes = [8, 128], strides = [1, 1]} : vector<8x384xf32> to vector<8x128xf32>
    %464 = vector.extract_strided_slice %454 {offsets = [0, 128], sizes = [8, 128], strides = [1, 1]} : vector<8x384xf32> to vector<8x128xf32>
    %465 = arith.addf %463, %464 : vector<8x128xf32>
    %466 = arith.negf %465 : vector<8x128xf32>
    %467 = math.exp %466 : vector<8x128xf32>
    %cst_184 = arith.constant 1.000000e+00 : f32
    %468 = vector.broadcast %cst_184 : f32 to vector<8x128xf32>
    %469 = arith.addf %468, %467 : vector<8x128xf32>
    %470 = arith.divf %468, %469 : vector<8x128xf32>
    %471 = vector.extract_strided_slice %452 {offsets = [0, 256], sizes = [8, 128], strides = [1, 1]} : vector<8x384xf32> to vector<8x128xf32>
    %472 = vector.extract_strided_slice %454 {offsets = [0, 256], sizes = [8, 128], strides = [1, 1]} : vector<8x384xf32> to vector<8x128xf32>
    %473 = vector.broadcast %335 : vector<1x128xf32> to vector<8x128xf32>
    %474 = arith.addf %472, %473 : vector<8x128xf32>
    %475 = arith.mulf %462, %474 : vector<8x128xf32>
    %476 = arith.addf %471, %475 : vector<8x128xf32>
    %477 = math.tanh %476 : vector<8x128xf32>
    %cst_185 = arith.constant 1.000000e+00 : f32
    %478 = vector.broadcast %cst_185 : f32 to vector<8x128xf32>
    %479 = arith.subf %478, %470 : vector<8x128xf32>
    %480 = arith.mulf %479, %477 : vector<8x128xf32>
    %481 = arith.mulf %470, %453 : vector<8x128xf32>
    %482 = arith.addf %480, %481 : vector<8x128xf32>
    %c0_186 = arith.constant 0 : index
    %c0_187 = arith.constant 0 : index
    %483 = vector.load %arg17[%c0_186, %c0_187] : memref<8x128xf32, #tpu.memory_space<vmem>>, vector<8x128xf32>
    tpu.vector_store %arg17[%c0_186, %c0_187], %482 {strides = array<i32>} : memref<8x128xf32, #tpu.memory_space<vmem>>, vector<8x128xf32>,
    %484 = arith.index_cast %c3_i32_177 : i32 to index
    %c0_188 = arith.constant 0 : index
    %c0_189 = arith.constant 0 : index
    %485 = vector.load %arg16[%484, %c0_188, %c0_189] : memref<8x8x128xf32, #tpu.memory_space<vmem>>, vector<1x8x128xf32>
    %486 = vector.shape_cast %485 : vector<1x8x128xf32> to vector<8x128xf32>
    %487 = vector.shape_cast %482 : vector<8x128xf32> to vector<1x8x128xf32>
    tpu.vector_store %arg16[%484, %c0_188, %c0_189], %487 {strides = array<i32>} : memref<8x8x128xf32, #tpu.memory_space<vmem>>, vector<1x8x128xf32>,
    %c4_i32_190 = arith.constant 4 : i32
    %488 = arith.index_cast %c4_i32_190 : i32 to index
    %c0_191 = arith.constant 0 : index
    %c0_192 = arith.constant 0 : index
    %489 = vector.load %arg15[%488, %c0_191, %c0_192] : memref<8x8x384xf32, #tpu.memory_space<vmem>>, vector<1x8x384xf32>
    %490 = vector.shape_cast %489 : vector<1x8x384xf32> to vector<8x384xf32>
    %c0_193 = arith.constant 0 : index
    %c0_194 = arith.constant 0 : index
    %491 = vector.load %arg17[%c0_193, %c0_194] : memref<8x128xf32, #tpu.memory_space<vmem>>, vector<8x128xf32>
    %cst_195 = arith.constant dense<0.000000e+00> : vector<8x384xf32>
    %492 = tpu.matmul %491, %334, %cst_195 {dimension_numbers = #tpu.dot_dimension_numbers<[1], [0], [0], [1], [0, 0, 1, 1], [], []>} : vector<8x128xf32>, vector<128x384xf32>, vector<8x384xf32> -> vector<8x384xf32>
    %493 = vector.extract_strided_slice %490 {offsets = [0, 0], sizes = [8, 128], strides = [1, 1]} : vector<8x384xf32> to vector<8x128xf32>
    %494 = vector.extract_strided_slice %492 {offsets = [0, 0], sizes = [8, 128], strides = [1, 1]} : vector<8x384xf32> to vector<8x128xf32>
    %495 = arith.addf %493, %494 : vector<8x128xf32>
    %496 = arith.negf %495 : vector<8x128xf32>
    %497 = math.exp %496 : vector<8x128xf32>
    %cst_196 = arith.constant 1.000000e+00 : f32
    %498 = vector.broadcast %cst_196 : f32 to vector<8x128xf32>
    %499 = arith.addf %498, %497 : vector<8x128xf32>
    %500 = arith.divf %498, %499 : vector<8x128xf32>
    %501 = vector.extract_strided_slice %490 {offsets = [0, 128], sizes = [8, 128], strides = [1, 1]} : vector<8x384xf32> to vector<8x128xf32>
    %502 = vector.extract_strided_slice %492 {offsets = [0, 128], sizes = [8, 128], strides = [1, 1]} : vector<8x384xf32> to vector<8x128xf32>
    %503 = arith.addf %501, %502 : vector<8x128xf32>
    %504 = arith.negf %503 : vector<8x128xf32>
    %505 = math.exp %504 : vector<8x128xf32>
    %cst_197 = arith.constant 1.000000e+00 : f32
    %506 = vector.broadcast %cst_197 : f32 to vector<8x128xf32>
    %507 = arith.addf %506, %505 : vector<8x128xf32>
    %508 = arith.divf %506, %507 : vector<8x128xf32>
    %509 = vector.extract_strided_slice %490 {offsets = [0, 256], sizes = [8, 128], strides = [1, 1]} : vector<8x384xf32> to vector<8x128xf32>
    %510 = vector.extract_strided_slice %492 {offsets = [0, 256], sizes = [8, 128], strides = [1, 1]} : vector<8x384xf32> to vector<8x128xf32>
    %511 = vector.broadcast %335 : vector<1x128xf32> to vector<8x128xf32>
    %512 = arith.addf %510, %511 : vector<8x128xf32>
    %513 = arith.mulf %500, %512 : vector<8x128xf32>
    %514 = arith.addf %509, %513 : vector<8x128xf32>
    %515 = math.tanh %514 : vector<8x128xf32>
    %cst_198 = arith.constant 1.000000e+00 : f32
    %516 = vector.broadcast %cst_198 : f32 to vector<8x128xf32>
    %517 = arith.subf %516, %508 : vector<8x128xf32>
    %518 = arith.mulf %517, %515 : vector<8x128xf32>
    %519 = arith.mulf %508, %491 : vector<8x128xf32>
    %520 = arith.addf %518, %519 : vector<8x128xf32>
    %c0_199 = arith.constant 0 : index
    %c0_200 = arith.constant 0 : index
    %521 = vector.load %arg17[%c0_199, %c0_200] : memref<8x128xf32, #tpu.memory_space<vmem>>, vector<8x128xf32>
    tpu.vector_store %arg17[%c0_199, %c0_200], %520 {strides = array<i32>} : memref<8x128xf32, #tpu.memory_space<vmem>>, vector<8x128xf32>,
    %522 = arith.index_cast %c4_i32_190 : i32 to index
    %c0_201 = arith.constant 0 : index
    %c0_202 = arith.constant 0 : index
    %523 = vector.load %arg16[%522, %c0_201, %c0_202] : memref<8x8x128xf32, #tpu.memory_space<vmem>>, vector<1x8x128xf32>
    %524 = vector.shape_cast %523 : vector<1x8x128xf32> to vector<8x128xf32>
    %525 = vector.shape_cast %520 : vector<8x128xf32> to vector<1x8x128xf32>
    tpu.vector_store %arg16[%522, %c0_201, %c0_202], %525 {strides = array<i32>} : memref<8x8x128xf32, #tpu.memory_space<vmem>>, vector<1x8x128xf32>,
    %c5_i32_203 = arith.constant 5 : i32
    %526 = arith.index_cast %c5_i32_203 : i32 to index
    %c0_204 = arith.constant 0 : index
    %c0_205 = arith.constant 0 : index
    %527 = vector.load %arg15[%526, %c0_204, %c0_205] : memref<8x8x384xf32, #tpu.memory_space<vmem>>, vector<1x8x384xf32>
    %528 = vector.shape_cast %527 : vector<1x8x384xf32> to vector<8x384xf32>
    %c0_206 = arith.constant 0 : index
    %c0_207 = arith.constant 0 : index
    %529 = vector.load %arg17[%c0_206, %c0_207] : memref<8x128xf32, #tpu.memory_space<vmem>>, vector<8x128xf32>
    %cst_208 = arith.constant dense<0.000000e+00> : vector<8x384xf32>
    %530 = tpu.matmul %529, %334, %cst_208 {dimension_numbers = #tpu.dot_dimension_numbers<[1], [0], [0], [1], [0, 0, 1, 1], [], []>} : vector<8x128xf32>, vector<128x384xf32>, vector<8x384xf32> -> vector<8x384xf32>
    %531 = vector.extract_strided_slice %528 {offsets = [0, 0], sizes = [8, 128], strides = [1, 1]} : vector<8x384xf32> to vector<8x128xf32>
    %532 = vector.extract_strided_slice %530 {offsets = [0, 0], sizes = [8, 128], strides = [1, 1]} : vector<8x384xf32> to vector<8x128xf32>
    %533 = arith.addf %531, %532 : vector<8x128xf32>
    %534 = arith.negf %533 : vector<8x128xf32>
    %535 = math.exp %534 : vector<8x128xf32>
    %cst_209 = arith.constant 1.000000e+00 : f32
    %536 = vector.broadcast %cst_209 : f32 to vector<8x128xf32>
    %537 = arith.addf %536, %535 : vector<8x128xf32>
    %538 = arith.divf %536, %537 : vector<8x128xf32>
    %539 = vector.extract_strided_slice %528 {offsets = [0, 128], sizes = [8, 128], strides = [1, 1]} : vector<8x384xf32> to vector<8x128xf32>
    %540 = vector.extract_strided_slice %530 {offsets = [0, 128], sizes = [8, 128], strides = [1, 1]} : vector<8x384xf32> to vector<8x128xf32>
    %541 = arith.addf %539, %540 : vector<8x128xf32>
    %542 = arith.negf %541 : vector<8x128xf32>
    %543 = math.exp %542 : vector<8x128xf32>
    %cst_210 = arith.constant 1.000000e+00 : f32
    %544 = vector.broadcast %cst_210 : f32 to vector<8x128xf32>
    %545 = arith.addf %544, %543 : vector<8x128xf32>
    %546 = arith.divf %544, %545 : vector<8x128xf32>
    %547 = vector.extract_strided_slice %528 {offsets = [0, 256], sizes = [8, 128], strides = [1, 1]} : vector<8x384xf32> to vector<8x128xf32>
    %548 = vector.extract_strided_slice %530 {offsets = [0, 256], sizes = [8, 128], strides = [1, 1]} : vector<8x384xf32> to vector<8x128xf32>
    %549 = vector.broadcast %335 : vector<1x128xf32> to vector<8x128xf32>
    %550 = arith.addf %548, %549 : vector<8x128xf32>
    %551 = arith.mulf %538, %550 : vector<8x128xf32>
    %552 = arith.addf %547, %551 : vector<8x128xf32>
    %553 = math.tanh %552 : vector<8x128xf32>
    %cst_211 = arith.constant 1.000000e+00 : f32
    %554 = vector.broadcast %cst_211 : f32 to vector<8x128xf32>
    %555 = arith.subf %554, %546 : vector<8x128xf32>
    %556 = arith.mulf %555, %553 : vector<8x128xf32>
    %557 = arith.mulf %546, %529 : vector<8x128xf32>
    %558 = arith.addf %556, %557 : vector<8x128xf32>
    %c0_212 = arith.constant 0 : index
    %c0_213 = arith.constant 0 : index
    %559 = vector.load %arg17[%c0_212, %c0_213] : memref<8x128xf32, #tpu.memory_space<vmem>>, vector<8x128xf32>
    tpu.vector_store %arg17[%c0_212, %c0_213], %558 {strides = array<i32>} : memref<8x128xf32, #tpu.memory_space<vmem>>, vector<8x128xf32>,
    %560 = arith.index_cast %c5_i32_203 : i32 to index
    %c0_214 = arith.constant 0 : index
    %c0_215 = arith.constant 0 : index
    %561 = vector.load %arg16[%560, %c0_214, %c0_215] : memref<8x8x128xf32, #tpu.memory_space<vmem>>, vector<1x8x128xf32>
    %562 = vector.shape_cast %561 : vector<1x8x128xf32> to vector<8x128xf32>
    %563 = vector.shape_cast %558 : vector<8x128xf32> to vector<1x8x128xf32>
    tpu.vector_store %arg16[%560, %c0_214, %c0_215], %563 {strides = array<i32>} : memref<8x8x128xf32, #tpu.memory_space<vmem>>, vector<1x8x128xf32>,
    %c6_i32_216 = arith.constant 6 : i32
    %564 = arith.index_cast %c6_i32_216 : i32 to index
    %c0_217 = arith.constant 0 : index
    %c0_218 = arith.constant 0 : index
    %565 = vector.load %arg15[%564, %c0_217, %c0_218] : memref<8x8x384xf32, #tpu.memory_space<vmem>>, vector<1x8x384xf32>
    %566 = vector.shape_cast %565 : vector<1x8x384xf32> to vector<8x384xf32>
    %c0_219 = arith.constant 0 : index
    %c0_220 = arith.constant 0 : index
    %567 = vector.load %arg17[%c0_219, %c0_220] : memref<8x128xf32, #tpu.memory_space<vmem>>, vector<8x128xf32>
    %cst_221 = arith.constant dense<0.000000e+00> : vector<8x384xf32>
    %568 = tpu.matmul %567, %334, %cst_221 {dimension_numbers = #tpu.dot_dimension_numbers<[1], [0], [0], [1], [0, 0, 1, 1], [], []>} : vector<8x128xf32>, vector<128x384xf32>, vector<8x384xf32> -> vector<8x384xf32>
    %569 = vector.extract_strided_slice %566 {offsets = [0, 0], sizes = [8, 128], strides = [1, 1]} : vector<8x384xf32> to vector<8x128xf32>
    %570 = vector.extract_strided_slice %568 {offsets = [0, 0], sizes = [8, 128], strides = [1, 1]} : vector<8x384xf32> to vector<8x128xf32>
    %571 = arith.addf %569, %570 : vector<8x128xf32>
    %572 = arith.negf %571 : vector<8x128xf32>
    %573 = math.exp %572 : vector<8x128xf32>
    %cst_222 = arith.constant 1.000000e+00 : f32
    %574 = vector.broadcast %cst_222 : f32 to vector<8x128xf32>
    %575 = arith.addf %574, %573 : vector<8x128xf32>
    %576 = arith.divf %574, %575 : vector<8x128xf32>
    %577 = vector.extract_strided_slice %566 {offsets = [0, 128], sizes = [8, 128], strides = [1, 1]} : vector<8x384xf32> to vector<8x128xf32>
    %578 = vector.extract_strided_slice %568 {offsets = [0, 128], sizes = [8, 128], strides = [1, 1]} : vector<8x384xf32> to vector<8x128xf32>
    %579 = arith.addf %577, %578 : vector<8x128xf32>
    %580 = arith.negf %579 : vector<8x128xf32>
    %581 = math.exp %580 : vector<8x128xf32>
    %cst_223 = arith.constant 1.000000e+00 : f32
    %582 = vector.broadcast %cst_223 : f32 to vector<8x128xf32>
    %583 = arith.addf %582, %581 : vector<8x128xf32>
    %584 = arith.divf %582, %583 : vector<8x128xf32>
    %585 = vector.extract_strided_slice %566 {offsets = [0, 256], sizes = [8, 128], strides = [1, 1]} : vector<8x384xf32> to vector<8x128xf32>
    %586 = vector.extract_strided_slice %568 {offsets = [0, 256], sizes = [8, 128], strides = [1, 1]} : vector<8x384xf32> to vector<8x128xf32>
    %587 = vector.broadcast %335 : vector<1x128xf32> to vector<8x128xf32>
    %588 = arith.addf %586, %587 : vector<8x128xf32>
    %589 = arith.mulf %576, %588 : vector<8x128xf32>
    %590 = arith.addf %585, %589 : vector<8x128xf32>
    %591 = math.tanh %590 : vector<8x128xf32>
    %cst_224 = arith.constant 1.000000e+00 : f32
    %592 = vector.broadcast %cst_224 : f32 to vector<8x128xf32>
    %593 = arith.subf %592, %584 : vector<8x128xf32>
    %594 = arith.mulf %593, %591 : vector<8x128xf32>
    %595 = arith.mulf %584, %567 : vector<8x128xf32>
    %596 = arith.addf %594, %595 : vector<8x128xf32>
    %c0_225 = arith.constant 0 : index
    %c0_226 = arith.constant 0 : index
    %597 = vector.load %arg17[%c0_225, %c0_226] : memref<8x128xf32, #tpu.memory_space<vmem>>, vector<8x128xf32>
    tpu.vector_store %arg17[%c0_225, %c0_226], %596 {strides = array<i32>} : memref<8x128xf32, #tpu.memory_space<vmem>>, vector<8x128xf32>,
    %598 = arith.index_cast %c6_i32_216 : i32 to index
    %c0_227 = arith.constant 0 : index
    %c0_228 = arith.constant 0 : index
    %599 = vector.load %arg16[%598, %c0_227, %c0_228] : memref<8x8x128xf32, #tpu.memory_space<vmem>>, vector<1x8x128xf32>
    %600 = vector.shape_cast %599 : vector<1x8x128xf32> to vector<8x128xf32>
    %601 = vector.shape_cast %596 : vector<8x128xf32> to vector<1x8x128xf32>
    tpu.vector_store %arg16[%598, %c0_227, %c0_228], %601 {strides = array<i32>} : memref<8x8x128xf32, #tpu.memory_space<vmem>>, vector<1x8x128xf32>,
    %c7_i32_229 = arith.constant 7 : i32
    %602 = arith.index_cast %c7_i32_229 : i32 to index
    %c0_230 = arith.constant 0 : index
    %c0_231 = arith.constant 0 : index
    %603 = vector.load %arg15[%602, %c0_230, %c0_231] : memref<8x8x384xf32, #tpu.memory_space<vmem>>, vector<1x8x384xf32>
    %604 = vector.shape_cast %603 : vector<1x8x384xf32> to vector<8x384xf32>
    %c0_232 = arith.constant 0 : index
    %c0_233 = arith.constant 0 : index
    %605 = vector.load %arg17[%c0_232, %c0_233] : memref<8x128xf32, #tpu.memory_space<vmem>>, vector<8x128xf32>
    %cst_234 = arith.constant dense<0.000000e+00> : vector<8x384xf32>
    %606 = tpu.matmul %605, %334, %cst_234 {dimension_numbers = #tpu.dot_dimension_numbers<[1], [0], [0], [1], [0, 0, 1, 1], [], []>} : vector<8x128xf32>, vector<128x384xf32>, vector<8x384xf32> -> vector<8x384xf32>
    %607 = vector.extract_strided_slice %604 {offsets = [0, 0], sizes = [8, 128], strides = [1, 1]} : vector<8x384xf32> to vector<8x128xf32>
    %608 = vector.extract_strided_slice %606 {offsets = [0, 0], sizes = [8, 128], strides = [1, 1]} : vector<8x384xf32> to vector<8x128xf32>
    %609 = arith.addf %607, %608 : vector<8x128xf32>
    %610 = arith.negf %609 : vector<8x128xf32>
    %611 = math.exp %610 : vector<8x128xf32>
    %cst_235 = arith.constant 1.000000e+00 : f32
    %612 = vector.broadcast %cst_235 : f32 to vector<8x128xf32>
    %613 = arith.addf %612, %611 : vector<8x128xf32>
    %614 = arith.divf %612, %613 : vector<8x128xf32>
    %615 = vector.extract_strided_slice %604 {offsets = [0, 128], sizes = [8, 128], strides = [1, 1]} : vector<8x384xf32> to vector<8x128xf32>
    %616 = vector.extract_strided_slice %606 {offsets = [0, 128], sizes = [8, 128], strides = [1, 1]} : vector<8x384xf32> to vector<8x128xf32>
    %617 = arith.addf %615, %616 : vector<8x128xf32>
    %618 = arith.negf %617 : vector<8x128xf32>
    %619 = math.exp %618 : vector<8x128xf32>
    %cst_236 = arith.constant 1.000000e+00 : f32
    %620 = vector.broadcast %cst_236 : f32 to vector<8x128xf32>
    %621 = arith.addf %620, %619 : vector<8x128xf32>
    %622 = arith.divf %620, %621 : vector<8x128xf32>
    %623 = vector.extract_strided_slice %604 {offsets = [0, 256], sizes = [8, 128], strides = [1, 1]} : vector<8x384xf32> to vector<8x128xf32>
    %624 = vector.extract_strided_slice %606 {offsets = [0, 256], sizes = [8, 128], strides = [1, 1]} : vector<8x384xf32> to vector<8x128xf32>
    %625 = vector.broadcast %335 : vector<1x128xf32> to vector<8x128xf32>
    %626 = arith.addf %624, %625 : vector<8x128xf32>
    %627 = arith.mulf %614, %626 : vector<8x128xf32>
    %628 = arith.addf %623, %627 : vector<8x128xf32>
    %629 = math.tanh %628 : vector<8x128xf32>
    %cst_237 = arith.constant 1.000000e+00 : f32
    %630 = vector.broadcast %cst_237 : f32 to vector<8x128xf32>
    %631 = arith.subf %630, %622 : vector<8x128xf32>
    %632 = arith.mulf %631, %629 : vector<8x128xf32>
    %633 = arith.mulf %622, %605 : vector<8x128xf32>
    %634 = arith.addf %632, %633 : vector<8x128xf32>
    %c0_238 = arith.constant 0 : index
    %c0_239 = arith.constant 0 : index
    %635 = vector.load %arg17[%c0_238, %c0_239] : memref<8x128xf32, #tpu.memory_space<vmem>>, vector<8x128xf32>
    tpu.vector_store %arg17[%c0_238, %c0_239], %634 {strides = array<i32>} : memref<8x128xf32, #tpu.memory_space<vmem>>, vector<8x128xf32>,
    %636 = arith.index_cast %c7_i32_229 : i32 to index
    %c0_240 = arith.constant 0 : index
    %c0_241 = arith.constant 0 : index
    %637 = vector.load %arg16[%636, %c0_240, %c0_241] : memref<8x8x128xf32, #tpu.memory_space<vmem>>, vector<1x8x128xf32>
    %638 = vector.shape_cast %637 : vector<1x8x128xf32> to vector<8x128xf32>
    %639 = vector.shape_cast %634 : vector<8x128xf32> to vector<1x8x128xf32>
    tpu.vector_store %arg16[%636, %c0_240, %c0_241], %639 {strides = array<i32>} : memref<8x8x128xf32, #tpu.memory_space<vmem>>, vector<1x8x128xf32>,
    %c8_i32_242 = arith.constant 8 : i32
    %c0_243 = arith.constant 0 : index
    %c0_244 = arith.constant 0 : index
    %640 = vector.load %arg17[%c0_243, %c0_244] : memref<8x128xf32, #tpu.memory_space<vmem>>, vector<8x128xf32>
    %c1_245 = arith.constant 1 : index
    %c0_246 = arith.constant 0 : index
    %c0_247 = arith.constant 0 : index
    %641 = vector.load %arg14[%c1_245, %c0_246, %c0_247] : memref<2x8x128xf32, #tpu.memory_space<vmem>>, vector<1x8x128xf32>
    %642 = vector.shape_cast %641 : vector<1x8x128xf32> to vector<8x128xf32>
    %643 = vector.shape_cast %640 : vector<8x128xf32> to vector<1x8x128xf32>
    tpu.vector_store %arg14[%c1_245, %c0_246, %c0_247], %643 {strides = array<i32>} : memref<2x8x128xf32, #tpu.memory_space<vmem>>, vector<1x8x128xf32>,
    %c0_248 = arith.constant 0 : index
    %c0_249 = arith.constant 0 : index
    %c0_250 = arith.constant 0 : index
    %644 = vector.load %arg16[%c0_248, %c0_249, %c0_250] : memref<8x8x128xf32, #tpu.memory_space<vmem>>, vector<8x8x128xf32>
    %645 = vector.shape_cast %644 : vector<8x8x128xf32> to vector<64x128xf32>
    %c0_251 = arith.constant 0 : index
    %c0_252 = arith.constant 0 : index
    %646 = vector.load %arg11[%c0_251, %c0_252] : memref<128x128xf32, #tpu.memory_space<vmem>>, vector<128x128xf32>
    %cst_253 = arith.constant dense<0.000000e+00> : vector<64x128xf32>
    %647 = tpu.matmul %645, %646, %cst_253 {dimension_numbers = #tpu.dot_dimension_numbers<[1], [0], [0], [1], [0, 0, 1, 1], [], []>} : vector<64x128xf32>, vector<128x128xf32>, vector<64x128xf32> -> vector<64x128xf32>
    %c0_254 = arith.constant 0 : index
    %c0_255 = arith.constant 0 : index
    %648 = vector.load %arg12[%c0_254, %c0_255] : memref<1x128xf32, #tpu.memory_space<vmem>>, vector<1x128xf32>
    %649 = vector.broadcast %648 : vector<1x128xf32> to vector<64x128xf32>
    %650 = arith.addf %647, %649 : vector<64x128xf32>
    %651 = vector.shape_cast %650 : vector<64x128xf32> to vector<8x8x128xf32>
    %c0_256 = arith.constant 0 : index
    %c0_257 = arith.constant 0 : index
    %c0_258 = arith.constant 0 : index
    %652 = vector.load %arg13[%c0_256, %c0_257, %c0_258] : memref<8x8x128xf32, #tpu.memory_space<vmem>>, vector<8x8x128xf32>
    tpu.vector_store %arg13[%c0_256, %c0_257, %c0_258], %651 {strides = array<i32>} : memref<8x8x128xf32, #tpu.memory_space<vmem>>, vector<8x8x128xf32>,
    return
  }
  func.func @transform_0(%arg0: i32) -> (i32, i32, i32) {
    %c0_i32 = arith.constant 0 : i32
    %c0_i32_0 = arith.constant 0 : i32
    %c0_i32_1 = arith.constant 0 : i32
    %c0_i32_2 = arith.constant 0 : i32
    return %c0_i32, %c0_i32_0, %c0_i32_1 : i32, i32, i32
  }
  func.func @transform_1(%arg0: i32) -> (i32, i32, i32) {
    %c0_i32 = arith.constant 0 : i32
    %c0_i32_0 = arith.constant 0 : i32
    %c0_i32_1 = arith.constant 0 : i32
    %c0_i32_2 = arith.constant 0 : i32
    return %c0_i32, %c0_i32_0, %c0_i32_1 : i32, i32, i32
  }
  func.func @transform_2(%arg0: i32) -> (i32, i32) {
    %c0_i32 = arith.constant 0 : i32
    %c0_i32_0 = arith.constant 0 : i32
    %c0_i32_1 = arith.constant 0 : i32
    return %c0_i32, %c0_i32_0 : i32, i32
  }
  func.func @transform_3(%arg0: i32) -> (i32, i32) {
    %c0_i32 = arith.constant 0 : i32
    %c0_i32_0 = arith.constant 0 : i32
    %c0_i32_1 = arith.constant 0 : i32
    return %c0_i32, %c0_i32_0 : i32, i32
  }
  func.func @transform_4(%arg0: i32) -> (i32, i32) {
    %c0_i32 = arith.constant 0 : i32
    %c0_i32_0 = arith.constant 0 : i32
    %c0_i32_1 = arith.constant 0 : i32
    return %c0_i32, %c0_i32_0 : i32, i32
  }
  func.func @transform_5(%arg0: i32) -> (i32, i32) {
    %c0_i32 = arith.constant 0 : i32
    %c0_i32_0 = arith.constant 0 : i32
    %c0_i32_1 = arith.constant 0 : i32
    return %c0_i32, %c0_i32_0 : i32, i32
  }
  func.func @transform_6(%arg0: i32) -> (i32, i32) {
    %c0_i32 = arith.constant 0 : i32
    %c0_i32_0 = arith.constant 0 : i32
    %c0_i32_1 = arith.constant 0 : i32
    return %c0_i32, %c0_i32_0 : i32, i32
  }
  func.func @transform_7(%arg0: i32) -> (i32, i32) {
    %c0_i32 = arith.constant 0 : i32
    %c0_i32_0 = arith.constant 0 : i32
    %c0_i32_1 = arith.constant 0 : i32
    return %c0_i32, %c0_i32_0 : i32, i32
  }
  func.func @transform_8(%arg0: i32) -> (i32, i32) {
    %c0_i32 = arith.constant 0 : i32
    %c0_i32_0 = arith.constant 0 : i32
    %c0_i32_1 = arith.constant 0 : i32
    return %c0_i32, %c0_i32_0 : i32, i32
  }
  func.func @transform_9(%arg0: i32) -> (i32, i32) {
    %c0_i32 = arith.constant 0 : i32
    %c0_i32_0 = arith.constant 0 : i32
    %c0_i32_1 = arith.constant 0 : i32
    return %c0_i32, %c0_i32_0 : i32, i32
  }
  func.func @transform_10(%arg0: i32) -> (i32, i32) {
    %c0_i32 = arith.constant 0 : i32
    %c0_i32_0 = arith.constant 0 : i32
    %c0_i32_1 = arith.constant 0 : i32
    return %c0_i32, %c0_i32_0 : i32, i32
  }
  func.func @transform_11(%arg0: i32) -> (i32, i32) {
    %c0_i32 = arith.constant 0 : i32
    %c0_i32_0 = arith.constant 0 : i32
    %c0_i32_1 = arith.constant 0 : i32
    return %c0_i32, %c0_i32_0 : i32, i32
  }
  func.func @transform_12(%arg0: i32) -> (i32, i32, i32) {
    %c0_i32 = arith.constant 0 : i32
    %c0_i32_0 = arith.constant 0 : i32
    %c0_i32_1 = arith.constant 0 : i32
    %c0_i32_2 = arith.constant 0 : i32
    return %c0_i32, %c0_i32_0, %c0_i32_1 : i32, i32, i32
  }
  func.func @transform_13(%arg0: i32) -> (i32, i32, i32) {
    %c0_i32 = arith.constant 0 : i32
    %c0_i32_0 = arith.constant 0 : i32
    %c0_i32_1 = arith.constant 0 : i32
    %c0_i32_2 = arith.constant 0 : i32
    return %c0_i32, %c0_i32_0, %c0_i32_1 : i32, i32, i32
  }
}

</mosaic_0001>

<bundles_post_ra>
// kernel: tpu_custom_call.1
= control target key start
LH: loop header
LB: loop body
LE: loop exit
PB: predicated region body
PF: predicated region fallthrough
CT: control target
= control target key end

     0   :  { %19 = vsyncpa [#allocation6], 0  ;;  %s7543_s0 = inlined_call_operand.hbm [shape: f32[8,8,128], index: 0, kind: input, shape index: {}]   ;;  %s7544_s1 = inlined_call_operand.hbm [shape: f32[2,8,128], index: 1, kind: input, shape index: {}]   ;;  %s7545_s2 = inlined_call_operand.hbm [shape: f32[128,384], index: 2, kind: input, shape index: {}]   ;;  %s7546_s3 = inlined_call_operand.hbm [shape: f32[128,384], index: 3, kind: input, shape index: {}]   ;;  %s7547_s4 = inlined_call_operand.vmem [shape: f32[1,384], index: 4, kind: input, shape index: {}]   ;;  %s7548_s5 = inlined_call_operand.vmem [shape: f32[1,128], index: 5, kind: input, shape index: {}]   ;;  %s7549_s6 = inlined_call_operand.hbm [shape: f32[128,384], index: 6, kind: input, shape index: {}]   ;;  %s7550_s7 = inlined_call_operand.hbm [shape: f32[128,384], index: 7, kind: input, shape index: {}]   ;;  %s7551_s8 = inlined_call_operand.vmem [shape: f32[1,384], index: 8, kind: input, shape index: {}]   ;;  %s7552_s9 = inlined_call_operand.vmem [shape: f32[1,128], index: 9, kind: input, shape index: {}]   ;;  %s7553_s10 = inlined_call_operand.hbm [shape: f32[128,128], index: 10, kind: input, shape index: {}]   ;;  %s7554_s11 = inlined_call_operand.vmem [shape: f32[1,128], index: 11, kind: input, shape index: {}]   ;;  %s7555_s12 = inlined_call_operand.hbm [shape: f32[8,8,128], index: 12, kind: output, shape index: {0}]   ;;  %s7556_s13 = inlined_call_operand.hbm [shape: f32[2,8,128], index: 13, kind: output, shape index: {1}]  }
   0x1   :  { %20 = vsyncpa [#allocation9], 0 }
   0x2   :  { %21 = vsyncpa [#allocation12], 0 }
   0x3   :  { %22 = vsyncpa [#allocation15], 0 }
   0x4   :  { %23 = vsyncpa [#allocation7], 0 }
   0x5   :  { %24 = vsyncpa [#allocation19], 0  ;;  %s6366_s25 = smov [#allocation8]   ;;  %s6156_s29 = scalar_lea.hbm %s7544_s1, 256 }
   0x6   :  { %s42_s26 = sshll.u32 %s6366_s25, 4  ;;  %p6157_p0 = scmp.ne.s32.totalorder %s7544_s1, %s6156_s29  ;;  %s43_s26 = int_to_ptr.vmem [resolvable:$true] %s42_s26 }
   0x7   :  { %p6160_p1 = scmp.lt.u32.totalorder %s6156_s29, %s7544_s1 }
   0x9   :  { %p6162_p2 = pnand %p6160_p1, %p6157_p0 }
   0xb   :  { %6165 = shalt.err (!%p6162_p2)
}
   0xc   :  { %s6166_s17 = scalar_lea.vmem %s43_s26, 256  ;;  %p6171_p4 = scmp.lt.s32.totalorder %s43_s26, %s43_s26 }
   0xd   :  { %p6167_p3 = scmp.ne.s32.totalorder %s43_s26, %s6166_s17  ;;  %p6172_p5 = scmp.lt.s32.totalorder %s6166_s17, %s6166_s17 }
   0xf   :  { %p6173_p6 = por %p6172_p5, %p6171_p4 }
  0x11   :  { %p6174_p7 = pnand %p6173_p6, %p6167_p3 }
  0x13   :  { %6177 = shalt.err (!%p6174_p7)
}
  0x14   :  { %s6367_s18 = smov 128   ;;  %s6368_s19 = smov 8  }
  0x15   :  { %48 = dma.hbm_to_vmem [thread:$0]  %s7544_s1, 256, %s43_s26, [#allocation9], %s6367_s18, %s6367_s18, %s6368_s19  }
  0x16   :  { %s6369_s22 = smov [#allocation11]   ;;  %s6370_s24 = smov [#allocation14]  }
  0x17   :  { %s66_s23 = sshll.u32 %s6369_s22, 4  ;;  %s94_s25 = sshll.u32 %s6370_s24, 4  ;;  %s67_s23 = int_to_ptr.vmem [resolvable:$true] %s66_s23  ;;  %s95_s25 = int_to_ptr.vmem [resolvable:$true] %s94_s25 }
  0x18   :  { %s6178_s29 = scalar_lea.hbm %s7546_s3, 6144 }
  0x19   :  { %p6179_p8 = scmp.ne.s32.totalorder %s7546_s3, %s6178_s29  ;;  %p6182_p9 = scmp.lt.u32.totalorder %s6178_s29, %s7546_s3 }
  0x1b   :  { %p6184_p10 = pnand %p6182_p9, %p6179_p8 }
  0x1d   :  { %6187 = shalt.err (!%p6184_p10)
}
  0x1e   :  { %s6188_s1 = scalar_lea.vmem %s67_s23, 6144  ;;  %p6193_p12 = scmp.lt.s32.totalorder %s67_s23, %s67_s23 }
  0x1f   :  { %p6189_p11 = scmp.ne.s32.totalorder %s67_s23, %s6188_s1  ;;  %p6194_p13 = scmp.lt.s32.totalorder %s6188_s1, %s6188_s1 }
  0x21   :  { %p6195_p0 = por %p6194_p13, %p6193_p12 }
  0x23   :  { %p6196_p1 = pnand %p6195_p0, %p6189_p11 }
  0x25   :  { %6199 = shalt.err (!%p6196_p1)
}
  0x26   :  { %s6371_s26 = smov 384   ;;  %s6372_s17 = smov 24  }
  0x27   :  { %72 = dma.hbm_to_vmem [thread:$0]  %s7546_s3, 6144, %s67_s23, [#allocation12], %s6371_s26, %s6371_s26, %s6372_s17  }
  0x28   :  { %s6200_s27 = scalar_lea.hbm %s7550_s7, 6144 }
  0x29   :  { %p6201_p2 = scmp.ne.s32.totalorder %s7550_s7, %s6200_s27  ;;  %p6204_p3 = scmp.lt.u32.totalorder %s6200_s27, %s7550_s7 }
  0x2b   :  { %p6206_p4 = pnand %p6204_p3, %p6201_p2 }
  0x2d   :  { %6209 = shalt.err (!%p6206_p4)
}
  0x2e   :  { %s6210_s15 = scalar_lea.vmem %s95_s25, 6144  ;;  %p6215_p6 = scmp.lt.s32.totalorder %s95_s25, %s95_s25 }
  0x2f   :  { %p6211_p5 = scmp.ne.s32.totalorder %s95_s25, %s6210_s15  ;;  %p6216_p7 = scmp.lt.s32.totalorder %s6210_s15, %s6210_s15 }
  0x31   :  { %p6217_p8 = por %p6216_p7, %p6215_p6 }
  0x33   :  { %p6218_p9 = pnand %p6217_p8, %p6211_p5 }
  0x35   :  { %6221 = shalt.err (!%p6218_p9)
}
  0x36   :  { %100 = dma.hbm_to_vmem [thread:$0]  %s7550_s7, 6144, %s95_s25, [#allocation15], %s6371_s26, %s6371_s26, %s6372_s17  }
  0x37   :  { %s6373_s16 = smov [#allocation5]   ;;  %s6374_s20 = smov [#allocation10]  }
  0x38   :  { %s30_s1 = sshll.u32 %s6373_s16, 4  ;;  %s54_s21 = sshll.u32 %s6374_s20, 4  ;;  %s31_s1 = int_to_ptr.vmem [resolvable:$true] %s30_s1  ;;  %s55_s21 = int_to_ptr.vmem [resolvable:$true] %s54_s21 }
  0x39   :  { %s6222_s27 = scalar_lea.hbm %s7543_s0, 1024 }
  0x3a   :  { %p6223_p10 = scmp.ne.s32.totalorder %s7543_s0, %s6222_s27  ;;  %p6226_p11 = scmp.lt.u32.totalorder %s6222_s27, %s7543_s0 }
  0x3c   :  { %p6228_p12 = pnand %p6226_p11, %p6223_p10 }
  0x3e   :  { %6231 = shalt.err (!%p6228_p12)
}
  0x3f   :  { %s6232_s7 = scalar_lea.vmem %s31_s1, 1024  ;;  %p6237_p0 = scmp.lt.s32.totalorder %s31_s1, %s31_s1 }
  0x40   :  { %p6233_p13 = scmp.ne.s32.totalorder %s31_s1, %s6232_s7  ;;  %p6238_p1 = scmp.lt.s32.totalorder %s6232_s7, %s6232_s7 }
  0x42   :  { %p6239_p2 = por %p6238_p1, %p6237_p0 }
  0x44   :  { %p6240_p3 = pnand %p6239_p2, %p6233_p13 }
  0x46   :  { %6243 = shalt.err (!%p6240_p3)
}
  0x47   :  { %36 = dma.hbm_to_vmem [thread:$0]  %s7543_s0, 1024, %s31_s1, [#allocation6], %s6367_s18, %s6367_s18, %s6368_s19  }
  0x48   :  { %s6244_s16 = scalar_lea.hbm %s7545_s2, 6144 }
  0x49   :  { %p6245_p4 = scmp.ne.s32.totalorder %s7545_s2, %s6244_s16  ;;  %p6248_p5 = scmp.lt.u32.totalorder %s6244_s16, %s7545_s2 }
  0x4b   :  { %p6250_p6 = pnand %p6248_p5, %p6245_p4 }
  0x4d   :  { %6253 = shalt.err (!%p6250_p6)
}
  0x4e   :  { %s6254_s28 = scalar_lea.vmem %s55_s21, 6144  ;;  %p6259_p8 = scmp.lt.s32.totalorder %s55_s21, %s55_s21 }
  0x4f   :  { %p6255_p7 = scmp.ne.s32.totalorder %s55_s21, %s6254_s28  ;;  %p6260_p9 = scmp.lt.s32.totalorder %s6254_s28, %s6254_s28 }
  0x51   :  { %p6261_p10 = por %p6260_p9, %p6259_p8 }
  0x53   :  { %p6262_p11 = pnand %p6261_p10, %p6255_p7 }
  0x55   :  { %6265 = shalt.err (!%p6262_p11)
}
  0x56   :  { %60 = dma.hbm_to_vmem [thread:$0]  %s7545_s2, 6144, %s55_s21, [#allocation9], %s6371_s26, %s6371_s26, %s6372_s17  }
  0x57   :  { %s6375_s29 = smov [#allocation13]   ;;  %s6376_s14 = smov [#allocation16]  }
  0x58   :  { %s82_s30 = sshll.u32 %s6375_s29, 4  ;;  %s110_s7 = sshll.u32 %s6376_s14, 4  ;;  %s83_s30 = int_to_ptr.vmem [resolvable:$true] %s82_s30  ;;  %s111_s7 = int_to_ptr.vmem [resolvable:$true] %s110_s7 }
  0x59   :  { %s6266_s3 = scalar_lea.hbm %s7549_s6, 6144 }
  0x5a   :  { %p6267_p12 = scmp.ne.s32.totalorder %s7549_s6, %s6266_s3  ;;  %p6270_p13 = scmp.lt.u32.totalorder %s6266_s3, %s7549_s6 }
  0x5c   :  { %p6272_p0 = pnand %p6270_p13, %p6267_p12 }
  0x5e   :  { %6275 = shalt.err (!%p6272_p0)
}
  0x5f   :  { %s6276_s2 = scalar_lea.vmem %s83_s30, 6144  ;;  %p6281_p2 = scmp.lt.s32.totalorder %s83_s30, %s83_s30 }
  0x60   :  { %p6277_p1 = scmp.ne.s32.totalorder %s83_s30, %s6276_s2  ;;  %p6282_p3 = scmp.lt.s32.totalorder %s6276_s2, %s6276_s2 }
  0x62   :  { %p6283_p4 = por %p6282_p3, %p6281_p2 }
  0x64   :  { %p6284_p5 = pnand %p6283_p4, %p6277_p1 }
  0x66   :  { %6287 = shalt.err (!%p6284_p5)
}
  0x67   :  { %88 = dma.hbm_to_vmem [thread:$0]  %s7549_s6, 6144, %s83_s30, [#allocation12], %s6371_s26, %s6371_s26, %s6372_s17  }
  0x68   :  { %s6288_s0 = scalar_lea.hbm %s7553_s10, 2048 }
  0x69   :  { %p6289_p6 = scmp.ne.s32.totalorder %s7553_s10, %s6288_s0  ;;  %p6292_p7 = scmp.lt.u32.totalorder %s6288_s0, %s7553_s10 }
  0x6b   :  { %p6294_p8 = pnand %p6292_p7, %p6289_p6 }
  0x6d   :  { %6297 = shalt.err (!%p6294_p8)
}
  0x6e   :  { %s6298_s15 = scalar_lea.vmem %s111_s7, 2048  ;;  %p6303_p10 = scmp.lt.s32.totalorder %s111_s7, %s111_s7 }
  0x6f   :  { %p6299_p9 = scmp.ne.s32.totalorder %s111_s7, %s6298_s15  ;;  %p6304_p11 = scmp.lt.s32.totalorder %s6298_s15, %s6298_s15 }
  0x71   :  { %p6305_p12 = por %p6304_p11, %p6303_p10 }
  0x73   :  { %p6306_p13 = pnand %p6305_p12, %p6299_p9 }
  0x75   :  { %6309 = shalt.err (!%p6306_p13)
}
  0x76   :  { %116 = dma.hbm_to_vmem [thread:$0]  %s7553_s10, 2048, %s111_s7, [#allocation15], %s6367_s18, %s6367_s18, %s6368_s19  }
  0x77   :  { %6354 = dma.done.wait [#allocation6], 1024  }
  0x78   :  { %6355 = vsyncadd [#allocation6], 4294966272 }
  0x79   :  { %6356 = dma.done.wait [#allocation9], 6400  }
  0x7a   :  { %6357 = vsyncadd [#allocation9], 4294960896 }
  0x7b   :  { %6358 = dma.done.wait [#allocation12], 12288  }
  0x7c   :  { %6359 = vsyncadd [#allocation12], 4294955008 }
  0x7d   :  { %6360 = dma.done.wait [#allocation15], 8192  }
  0x7e   :  { %6361 = vsyncadd [#allocation15], 4294959104  ;;  %v7560_v0 = vmov 0.0   ;;  %v149_v1 = vld [vmem:[#allocation10 + $0x8] sm:$0xff]  ;;  %v152_v2 = vld [vmem:[#allocation10 + $0x20] sm:$0xff]  ;;  %vm6379_vm0 = vmmov 0  }
  0x7f   :  { %277 = vmatprep.mubr.f32.mxu1 %v7560_v0  ;;  %574 = vmatprep.mubr.f32.mxu0 %v7560_v0  ;;  %v148_v3 = vld [vmem:[#allocation10] sm:$0xff]  ;;  %v4859_v4 = vpack.c.bf16 %v152_v2, %v149_v1  ;;  %v151_v5 = vld [vmem:[#allocation10 + $0x18] sm:$0xff]  ;;  %v458_v6 = vld [vmem:[#allocation11 + $0x8] sm:$0xff] }
  0x80   :  { %v461_v7 = vld [vmem:[#allocation11 + $0x20] sm:$0xff]  ;;  %v4861_v8 = vpack.c.bf16 %v151_v5, %v148_v3  ;;  %v460_v11 = vld [vmem:[#allocation11 + $0x18] sm:$0xff]  ;;  %v158_v14 = vld [vmem:[#allocation10 + $0x50] sm:$0xff] }
  0x81   :  { %v6559_v9 = vpack.c.bf16 %v461_v7, %v458_v6  ;;  %v457_v10 = vld [vmem:[#allocation11] sm:$0xff]  ;;  %v155_v12 = vld [vmem:[#allocation10 + $0x38] sm:$0xff]  ;;  %4860 = vmatprep.subr.bf16.mxu1 %v4859_v4  ;;  %v154_v15 = vld [vmem:[#allocation10 + $0x30] sm:$0xff] }
  0x82   :  { %v6561_v13 = vpack.c.bf16 %v460_v11, %v457_v10  ;;  %v157_v16 = vld [vmem:[#allocation10 + $0x48] sm:$0xff]  ;;  %4862 = vmatpush1.bf16.msra.mxu1 %v4861_v8  ;;  %v4863_v17 = vpack.c.bf16 %v158_v14, %v155_v12  ;;  %v464_v19 = vld [vmem:[#allocation11 + $0x38] sm:$0xff]  ;;  %v467_v20 = vld [vmem:[#allocation11 + $0x50] sm:$0xff] }
  0x83   :  { %4924 = vmatprep.subr.bf16.mxu0 %v6559_v9  ;;  %v4865_v18 = vpack.c.bf16 %v157_v16, %v154_v15  ;;  %v463_v21 = vld [vmem:[#allocation11 + $0x30] sm:$0xff]  ;;  %v6565_v22 = vpack.c.bf16 %v467_v20, %v464_v19  ;;  %v466_v23 = vld [vmem:[#allocation11 + $0x48] sm:$0xff]  ;;  %v164_v25 = vld [vmem:[#allocation10 + $0x80] sm:$0xff] }
  0x84   :  { %4926 = vmatpush1.bf16.msra.mxu0 %v6561_v13  ;;  %v161_v24 = vld [vmem:[#allocation10 + $0x68] sm:$0xff]  ;;  %4864 = vmatprep.subr.bf16.mxu1 %v4863_v17  ;;  %v6567_v26 = vpack.c.bf16 %v466_v23, %v463_v21  ;;  %v160_v28 = vld [vmem:[#allocation10 + $0x60] sm:$0xff]  ;;  %v163_v29 = vld [vmem:[#allocation10 + $0x78] sm:$0xff] }
  0x85   :  { %v4867_v27 = vpack.c.bf16 %v164_v25, %v161_v24  ;;  %v470_v30 = vld [vmem:[#allocation11 + $0x68] sm:$0xff]  ;;  %4928 = vmatprep.subr.bf16.mxu0 %v6565_v22  ;;  %v473_v31 = vld [vmem:[#allocation11 + $0x80] sm:$0xff]  ;;  %v472_v33 = vld [vmem:[#allocation11 + $0x78] sm:$0xff]  ;;  %v4869_v34 = vpack.c.bf16 %v163_v29, %v160_v28 }
  0x86   :  { %v469_v32 = vld [vmem:[#allocation11 + $0x60] sm:$0xff]  ;;  %4866 = vmatpush1.bf16.msra.mxu1 %v4865_v18  ;;  %v6570_v35 = vpack.c.bf16 %v473_v31, %v470_v30  ;;  %v167_v36 = vld [vmem:[#allocation10 + $0x98] sm:$0xff]  ;;  %v170_v37 = vld [vmem:[#allocation10 + $0xb0] sm:$0xff] }
  0x87   :  { %v166_v38 = vld [vmem:[#allocation10 + $0x90] sm:$0xff]  ;;  %4868 = vmatprep.subr.bf16.mxu1 %v4867_v27  ;;  %v6573_v39 = vpack.c.bf16 %v472_v33, %v469_v32  ;;  %v4871_v40 = vpack.c.bf16 %v170_v37, %v167_v36  ;;  %v169_v41 = vld [vmem:[#allocation10 + $0xa8] sm:$0xff]  ;;  %v476_v42 = vld [vmem:[#allocation11 + $0x98] sm:$0xff] }
  0x88   :  { %4930 = vmatpush1.bf16.msra.mxu0 %v6567_v26  ;;  %v479_v43 = vld [vmem:[#allocation11 + $0xb0] sm:$0xff]  ;;  %v478_v46 = vld [vmem:[#allocation11 + $0xa8] sm:$0xff]  ;;  %v176_v48 = vld [vmem:[#allocation10 + $0xe0] sm:$0xff]  ;;  %v4873_v49 = vpack.c.bf16 %v169_v41, %v166_v38 }
  0x89   :  { %4932 = vmatprep.subr.bf16.mxu0 %v6570_v35  ;;  %v6576_v44 = vpack.c.bf16 %v479_v43, %v476_v42  ;;  %v475_v45 = vld [vmem:[#allocation11 + $0x90] sm:$0xff]  ;;  %v173_v47 = vld [vmem:[#allocation10 + $0xc8] sm:$0xff]  ;;  %v485_v51 = vld [vmem:[#allocation11 + $0xe0] sm:$0xff] }
  0x8a   :  { %4870 = vmatpush1.bf16.msra.mxu1 %v4869_v34  ;;  %v482_v50 = vld [vmem:[#allocation11 + $0xc8] sm:$0xff]  ;;  %v6579_v52 = vpack.c.bf16 %v478_v46, %v475_v45  ;;  %v4875_v53 = vpack.c.bf16 %v176_v48, %v173_v47  ;;  %v172_v54 = vld [vmem:[#allocation10 + $0xc0] sm:$0xff]  ;;  %v175_v55 = vld [vmem:[#allocation10 + $0xd8] sm:$0xff] }
  0x8b   :  { %4872 = vmatprep.subr.bf16.mxu1 %v4871_v40  ;;  %v481_v56 = vld [vmem:[#allocation11 + $0xc0] sm:$0xff]  ;;  %v6582_v57 = vpack.c.bf16 %v485_v51, %v482_v50  ;;  %v484_v58 = vld [vmem:[#allocation11 + $0xd8] sm:$0xff]  ;;  %v182_v60 = vld [vmem:[#allocation10 + $0x110] sm:$0xff]  ;;  %v4877_v63 = vpack.c.bf16 %v175_v55, %v172_v54 }
  0x8c   :  { %4934 = vmatpush1.bf16.msra.mxu0 %v6573_v39  ;;  %v179_v59 = vld [vmem:[#allocation10 + $0xf8] sm:$0xff]  ;;  %v491_v62 = vld [vmem:[#allocation11 + $0x110] sm:$0xff]  ;;  %v6585_v1 = vpack.c.bf16 %v484_v58, %v481_v56  ;;  %v181_v4 = vld [vmem:[#allocation10 + $0x108] sm:$0xff] }
  0x8d   :  { %4936 = vmatprep.subr.bf16.mxu0 %v6576_v44  ;;  %v488_v61 = vld [vmem:[#allocation11 + $0xf8] sm:$0xff]  ;;  %v4879_v2 = vpack.c.bf16 %v182_v60, %v179_v59  ;;  %v178_v3 = vld [vmem:[#allocation10 + $0xf0] sm:$0xff]  ;;  %v490_v7 = vld [vmem:[#allocation11 + $0x108] sm:$0xff] }
  0x8e   :  { %4874 = vmatpush1.bf16.msra.mxu1 %v4873_v49  ;;  %v487_v5 = vld [vmem:[#allocation11 + $0xf0] sm:$0xff]  ;;  %v6588_v6 = vpack.c.bf16 %v491_v62, %v488_v61  ;;  %v185_v8 = vld [vmem:[#allocation10 + $0x128] sm:$0xff]  ;;  %v188_v10 = vld [vmem:[#allocation10 + $0x140] sm:$0xff]  ;;  %v4881_v14 = vpack.c.bf16 %v181_v4, %v178_v3 }
  0x8f   :  { %4876 = vmatprep.subr.bf16.mxu1 %v4875_v53  ;;  %v494_v11 = vld [vmem:[#allocation11 + $0x128] sm:$0xff]  ;;  %v497_v12 = vld [vmem:[#allocation11 + $0x140] sm:$0xff]  ;;  %v6591_v15 = vpack.c.bf16 %v490_v7, %v487_v5  ;;  %v4883_v16 = vpack.c.bf16 %v188_v10, %v185_v8  ;;  %v187_v18 = vld [vmem:[#allocation10 + $0x138] sm:$0xff] }
  0x90   :  { %4938 = vmatpush1.bf16.msra.mxu0 %v6579_v52  ;;  %v184_v17 = vld [vmem:[#allocation10 + $0x120] sm:$0xff]  ;;  %v6594_v20 = vpack.c.bf16 %v497_v12, %v494_v11  ;;  %v496_v21 = vld [vmem:[#allocation11 + $0x138] sm:$0xff]  ;;  %v194_v24 = vld [vmem:[#allocation10 + $0x170] sm:$0xff] }
  0x91   :  { %4940 = vmatprep.subr.bf16.mxu0 %v6582_v57  ;;  %v493_v19 = vld [vmem:[#allocation11 + $0x120] sm:$0xff]  ;;  %v191_v23 = vld [vmem:[#allocation10 + $0x158] sm:$0xff]  ;;  %v503_v27 = vld [vmem:[#allocation11 + $0x170] sm:$0xff]  ;;  %v4885_v28 = vpack.c.bf16 %v187_v18, %v184_v17 }
  0x92   :  { %4878 = vmatpush1.bf16.msra.mxu1 %v4877_v63  ;;  %v500_v25 = vld [vmem:[#allocation11 + $0x158] sm:$0xff]  ;;  %v6597_v29 = vpack.c.bf16 %v496_v21, %v493_v19  ;;  %v4887_v30 = vpack.c.bf16 %v194_v24, %v191_v23  ;;  %v190_v31 = vld [vmem:[#allocation10 + $0x150] sm:$0xff]  ;;  %v193_v32 = vld [vmem:[#allocation10 + $0x168] sm:$0xff]  ;;  %v7562_v23 = vmov 0.0|0.0  }
  0x93   :  { %4880 = vmatprep.subr.bf16.mxu1 %v4879_v2  ;;  %v499_v33 = vld [vmem:[#allocation11 + $0x150] sm:$0xff]  ;;  %v6600_v34 = vpack.c.bf16 %v503_v27, %v500_v25  ;;  %v502_v36 = vld [vmem:[#allocation11 + $0x168] sm:$0xff]  ;;  %v4889_v40 = vpack.c.bf16 %v193_v32, %v190_v31  ;;  %v156_v43 = vld [vmem:[#allocation10 + $0x40] sm:$0xff] }
  0x94   :  { %4942 = vmatpush1.bf16.msra.mxu0 %v6585_v1  ;;  %v150_v37 = vld [vmem:[#allocation10 + $0x10] sm:$0xff]  ;;  %v153_v38 = vld [vmem:[#allocation10 + $0x28] sm:$0xff]  ;;  %v6603_v41 = vpack.c.bf16 %v502_v36, %v499_v33  ;;  %v159_v45 = vld [vmem:[#allocation10 + $0x58] sm:$0xff] }
  0x95   :  { %4944 = vmatprep.subr.bf16.mxu0 %v6588_v6  ;;  %v4891_v42 = vpack.c.bf16 %v153_v38, %v150_v37  ;;  %v6606_v46 = vld [vmem:[#allocation5] sm:$0xff]  ;;  %v4895_v48 = vpack.c.bf16 %v159_v45, %v156_v43  ;;  %v165_v50 = vld [vmem:[#allocation10 + $0x88] sm:$0xff]  ;;  %v6614_v51 = vld [vmem:[#allocation5 + $0x8] sm:$0xff] }
  0x96   :  { %4882 = vmatpush1.bf16.msra.mxu1 %v4881_v14  ;;  %v6609_v47 = vld [vmem:[#allocation8] sm:$0xff]  ;;  %v168_v54 = vld [vmem:[#allocation10 + $0xa0] sm:$0xff]  ;;  %v171_v55 = vld [vmem:[#allocation10 + $0xb8] sm:$0xff] }
  0x97   :  { %4884 = vmatprep.subr.bf16.mxu1 %v4883_v16  ;;  %v162_v49 = vld [vmem:[#allocation10 + $0x70] sm:$0xff]  ;;  %v6622_v56 = vld [vmem:[#allocation5 + $0x10] sm:$0xff]  ;;  %v4903_v58 = vpack.c.bf16 %v171_v55, %v168_v54  ;;  %v177_v60 = vld [vmem:[#allocation10 + $0xe8] sm:$0xff]  ;;  %v198_v54 = vlaneseq }
  0x98   :  { %4946 = vmatpush1.bf16.msra.mxu0 %v6591_v15  ;;  %v4899_v53 = vpack.c.bf16 %v165_v50, %v162_v49  ;;  %v174_v59 = vld [vmem:[#allocation10 + $0xd0] sm:$0xff]  ;;  %v143_v61 = vld [vmem:[#allocation5 + $0x18] sm:$0xff]  ;;  %v180_v63 = vld [vmem:[#allocation10 + $0x100] sm:$0xff] }
  0x99   :  { %4948 = vmatprep.subr.bf16.mxu0 %v6594_v20  ;;  %v4907_v62 = vpack.c.bf16 %v177_v60, %v174_v59  ;;  %v183_v2 = vld [vmem:[#allocation10 + $0x118] sm:$0xff]  ;;  %v144_v3 = vld [vmem:[#allocation5 + $0x20] sm:$0xff]  ;;  %v189_v7 = vld [vmem:[#allocation10 + $0x148] sm:$0xff]  ;;  %v6701_v55 = vshrl.u32 %v198_v54, 7 }
  0x9a   :  { %4886 = vmatpush1.bf16.msra.mxu1 %v4885_v28  ;;  %v4911_v4 = vpack.c.bf16 %v183_v2, %v180_v63  ;;  %v186_v5 = vld [vmem:[#allocation10 + $0x130] sm:$0xff]  ;;  %v145_v8 = vld [vmem:[#allocation5 + $0x28] sm:$0xff]  ;;  %v192_v11 = vld [vmem:[#allocation10 + $0x160] sm:$0xff] }
  0x9b   :  { %4888 = vmatprep.subr.bf16.mxu1 %v4887_v30  ;;  %v4915_v10 = vpack.c.bf16 %v189_v7, %v186_v5  ;;  %v195_v12 = vld [vmem:[#allocation10 + $0x178] sm:$0xff]  ;;  %v146_v14 = vld [vmem:[#allocation5 + $0x30] sm:$0xff]  ;;  %v147_v17 = vld [vmem:[#allocation5 + $0x38] sm:$0xff]  ;;  %7566 = vst [vmem:[#allocation26_spill] sm:$0xff] %v6701_v55  ;;  %v7558_v59 = vsub.s32 1, %v6701_v55 }
  0x9c   :  { %4950 = vmatpush1.bf16.msra.mxu0 %v6597_v29  ;;  %v4919_v16 = vpack.c.bf16 %v195_v12, %v192_v11  ;;  %v459_v18 = vld [vmem:[#allocation11 + $0x10] sm:$0xff]  ;;  %v462_v19 = vld [vmem:[#allocation11 + $0x28] sm:$0xff]  ;;  %v465_v24 = vld [vmem:[#allocation11 + $0x40] sm:$0xff] }
  0x9d   :  { %4952 = vmatprep.subr.bf16.mxu0 %v6600_v34  ;;  %v6643_v21 = vpack.c.bf16 %v462_v19, %v459_v18  ;;  %v468_v25 = vld [vmem:[#allocation11 + $0x58] sm:$0xff]  ;;  %v471_v28 = vld [vmem:[#allocation11 + $0x70] sm:$0xff]  ;;  %v474_v30 = vld [vmem:[#allocation11 + $0x88] sm:$0xff] }
  0x9e   :  { %4890 = vmatpush1.bf16.msra.mxu1 %v4889_v40  ;;  %v6650_v27 = vpack.c.bf16 %v468_v25, %v465_v24  ;;  %v6655_v31 = vpack.c.bf16 %v474_v30, %v471_v28  ;;  %v477_v32 = vld [vmem:[#allocation11 + $0xa0] sm:$0xff]  ;;  %v480_v33 = vld [vmem:[#allocation11 + $0xb8] sm:$0xff]  ;;  %v483_v37 = vld [vmem:[#allocation11 + $0xd0] sm:$0xff] }
  0x9f   :  { %4892 = vmatprep.subr.bf16.mxu1 %v4891_v42  ;;  %v6659_v36 = vpack.c.bf16 %v480_v33, %v477_v32  ;;  %v486_v38 = vld [vmem:[#allocation11 + $0xe8] sm:$0xff]  ;;  %v492_v43 = vld [vmem:[#allocation11 + $0x118] sm:$0xff]  ;;  %v501_v50 = vld [vmem:[#allocation11 + $0x160] sm:$0xff] }
  0xa0   :  { %4954 = vmatpush1.bf16.msra.mxu0 %v6603_v41  ;;  %v6663_v40 = vpack.c.bf16 %v486_v38, %v483_v37 }
  0xa1   :  { %4980 = vmatprep.subr.bf16.mxu0 %v6559_v9  ;;  %278 = vmatmul.mubr.f32.vlgmr.msra.gmra.mrb[0].mxu1 %v6606_v46 }
  0xa2   :  { %4894 = vmatpush3.bf16.msra.mxu1 %v4891_v42  ;;  %283 = vmatprep.mubr.f32.mxu1 %v7560_v0  ;;  %v489_v42 = vld [vmem:[#allocation11 + $0x100] sm:$0xff] }
  0xa3   :  { %575 = vmatmul.mubr.f32.vlgmr.msra.gmra.mrb[0].mxu0 %v6609_v47  ;;  %4896 = vmatprep.subr.bf16.mxu1 %v4895_v48  ;;  %v6669_v45 = vpack.c.bf16 %v492_v43, %v489_v42 }
  0xa4   :  { %4982 = vmatpush1.bf16.msra.mxu0 %v6561_v13  ;;  %750 = vmatprep.mubr.f32.mxu0 %v7560_v0 }
  0xa5   :  { %284 = vmatmul.mubr.f32.gmra.mrb[2].mxu1 %v6614_v51  ;;  %4984 = vmatprep.subr.bf16.mxu0 %v6565_v22 }
  0xa6   :  { %4898 = vmatpush3.bf16.msra.mxu1 %v4895_v48  ;;  %289 = vmatprep.mubr.f32.mxu1 %v7560_v0  ;;  %v498_v48 = vld [vmem:[#allocation11 + $0x148] sm:$0xff] }
  0xa7   :  { %4900 = vmatprep.subr.bf16.mxu1 %v4899_v53 }
  0xa8   :  { %4986 = vmatpush1.bf16.msra.mxu0 %v6567_v26 }
  0xa9   :  { %290 = vmatmul.mubr.f32.gmra.mrb[4].mxu1 %v6622_v56  ;;  %4988 = vmatprep.subr.bf16.mxu0 %v6570_v35 }
  0xaa   :  { %4902 = vmatpush3.bf16.msra.mxu1 %v4899_v53  ;;  %295 = vmatprep.mubr.f32.mxu1 %v7560_v0 }
  0xab   :  { %4904 = vmatprep.subr.bf16.mxu1 %v4903_v58 }
  0xac   :  { %4990 = vmatpush1.bf16.msra.mxu0 %v6573_v39 }
  0xad   :  { %296 = vmatmul.mubr.f32.gmra.mrb[6].mxu1 %v143_v61  ;;  %4992 = vmatprep.subr.bf16.mxu0 %v6576_v44 }
  0xae   :  { %4906 = vmatpush3.bf16.msra.mxu1 %v4903_v58  ;;  %301 = vmatprep.mubr.f32.mxu1 %v7560_v0  ;;  %v196_v58 = vld [vmem:[%s7547_s4] sm:$0x7] }
  0xaf   :  { %4908 = vmatprep.subr.bf16.mxu1 %v4907_v62 }
  0xb0   :  { %4994 = vmatpush1.bf16.msra.mxu0 %v6579_v52 }
  0xb1   :  { %302 = vmatmul.mubr.f32.gmra.mrb[8].mxu1 %v144_v3  ;;  %4996 = vmatprep.subr.bf16.mxu0 %v6582_v57 }
  0xb2   :  { %4910 = vmatpush3.bf16.msra.mxu1 %v4907_v62  ;;  %307 = vmatprep.mubr.f32.mxu1 %v7560_v0 }
  0xb3   :  { %4912 = vmatprep.subr.bf16.mxu1 %v4911_v4 }
  0xb4   :  { %4998 = vmatpush1.bf16.msra.mxu0 %v6585_v1 }
  0xb5   :  { %308 = vmatmul.mubr.f32.gmra.mrb[10].mxu1 %v145_v8  ;;  %5000 = vmatprep.subr.bf16.mxu0 %v6588_v6 }
  0xb6   :  { %4914 = vmatpush3.bf16.msra.mxu1 %v4911_v4  ;;  %313 = vmatprep.mubr.f32.mxu1 %v7560_v0 }
  0xb7   :  { %4916 = vmatprep.subr.bf16.mxu1 %v4915_v10 }
  0xb8   :  { %5002 = vmatpush1.bf16.msra.mxu0 %v6591_v15 }
  0xb9   :  { %314 = vmatmul.mubr.f32.gmra.mrb[12].mxu1 %v146_v14  ;;  %5004 = vmatprep.subr.bf16.mxu0 %v6594_v20 }
  0xba   :  { %4918 = vmatpush3.bf16.msra.mxu1 %v4915_v10  ;;  %319 = vmatprep.mubr.f32.mxu1 %v7560_v0 }
  0xbb   :  { %4920 = vmatprep.subr.bf16.mxu1 %v4919_v16 }
  0xbc   :  { %5006 = vmatpush1.bf16.msra.mxu0 %v6597_v29 }
  0xbd   :  { %320 = vmatmul.mubr.f32.gmra.mrb[14].mxu1 %v147_v17  ;;  %5008 = vmatprep.subr.bf16.mxu0 %v6600_v34 }
  0xbe   :  { %4922 = vmatpush3.bf16.msra.mxu1 %v4919_v16  ;;  %4199 = vmatprep.mubr.f32.mxu1 %v6606_v46  ;;  %v495_v46 = vld [vmem:[#allocation11 + $0x130] sm:$0xff] }
  0xbf   :  { %4955 = vmatprep.subr.bf16.mxu1 %v7562_v23  ;;  %v6673_v49 = vpack.c.bf16 %v498_v48, %v495_v46 }
  0xc0   :  { %5010 = vmatpush1.bf16.msra.mxu0 %v6603_v41 }
  0xc1   :  { %4200 = vmatmul.mubr.f32.vlgmr.msra.gmra.mrb[16].mxu1 %v6614_v51  ;;  %5036 = vmatprep.subr.bf16.mxu0 %v6559_v9  ;;  %v504_v51 = vld [vmem:[#allocation11 + $0x178] sm:$0xff] }
  0xc2   :  { %4957 = vmatpush3.bf16.msra.mxu1 %v6643_v21  ;;  %4202 = vmatprep.mubr.f32.mxu1 %v6622_v56  ;;  %v6677_v53 = vpack.c.bf16 %v504_v51, %v501_v50  ;;  %v7559_v56 = vsub.s32 0, %v6701_v55 }
  0xc3   :  { %4958 = vmatprep.subr.bf16.mxu1 %v7562_v23 }
  0xc4   :  { %v201_v60 = vrot.slane %v196_v58, %v7559_v56 }
  0xc5   :  { %4203 = vmatmul.mubr.f32.gmra.mrb[18].mxu1 %v143_v61  ;;  %v205_v61 = vrot.slane %v196_v58, %v7558_v59 }
  0xc6   :  { %4960 = vmatpush3.bf16.msra.mxu1 %v6650_v27  ;;  %4205 = vmatprep.mubr.f32.mxu1 %v144_v3 }
  0xc7   :  { %4961 = vmatprep.subr.bf16.mxu1 %v7562_v23 }
  0xc9   :  { %4206 = vmatmul.mubr.f32.gmra.mrb[20].mxu1 %v145_v8 }
  0xca   :  { %4963 = vmatpush3.bf16.msra.mxu1 %v6655_v31  ;;  %4208 = vmatprep.mubr.f32.mxu1 %v146_v14 }
  0xcb   :  { %4964 = vmatprep.subr.bf16.mxu1 %v7562_v23 }
  0xcd   :  { %4209 = vmatmul.mubr.f32.gmra.mrb[22].mxu1 %v147_v17 }
  0xce   :  { %4966 = vmatpush3.bf16.msra.mxu1 %v6659_v36  ;;  %4243 = vmatprep.mubr.msk.f32.mxu1 %vm6379_vm0, %v7560_v0 }
  0xcf   :  { %4967 = vmatprep.subr.bf16.mxu1 %v7562_v23 }
  0xd2   :  { %4969 = vmatpush3.bf16.msra.mxu1 %v6663_v40 }
  0xd3   :  { %4970 = vmatprep.subr.bf16.mxu1 %v7562_v23 }
  0xd6   :  { %4972 = vmatpush3.bf16.msra.mxu1 %v6669_v45 }
  0xd7   :  { %4973 = vmatprep.subr.bf16.mxu1 %v7562_v23 }
  0xda   :  { %4975 = vmatpush3.bf16.msra.mxu1 %v6673_v49 }
  0xdb   :  { %4976 = vmatprep.subr.bf16.mxu1 %v7562_v23 }
  0xde   :  { %4978 = vmatpush3.bf16.msra.mxu1 %v6677_v53 }
  0xdf   :  { %5011 = vmatprep.subr.bf16.mxu1 %v7562_v23 }
  0xe1   :  { %4244 = vmatmul.mubr.f32.vlgmr.msra.gmra.mrb[24].mxu1 %v6609_v47 }
  0xe2   :  { %5013 = vmatpush3.bf16.msra.mxu1 %v6643_v21  ;;  %4278 = vmatprep.mubr.msk.f32.mxu1 %vm6379_vm0, %v7560_v0 }
  0xe3   :  { %5014 = vmatprep.subr.bf16.mxu1 %v7562_v23 }
  0xe6   :  { %5016 = vmatpush3.bf16.msra.mxu1 %v6650_v27 }
  0xe7   :  { %5017 = vmatprep.subr.bf16.mxu1 %v7562_v23 }
  0xea   :  { %5019 = vmatpush3.bf16.msra.mxu1 %v6655_v31 }
  0xeb   :  { %5020 = vmatprep.subr.bf16.mxu1 %v7562_v23 }
  0xee   :  { %5022 = vmatpush3.bf16.msra.mxu1 %v6659_v36 }
  0xef   :  { %5023 = vmatprep.subr.bf16.mxu1 %v7562_v23 }
  0xf2   :  { %5025 = vmatpush3.bf16.msra.mxu1 %v6663_v40 }
  0xf3   :  { %5026 = vmatprep.subr.bf16.mxu1 %v7562_v23 }
  0xf6   :  { %5028 = vmatpush3.bf16.msra.mxu1 %v6669_v45 }
  0xf7   :  { %5029 = vmatprep.subr.bf16.mxu1 %v7562_v23 }
  0xfa   :  { %5031 = vmatpush3.bf16.msra.mxu1 %v6673_v49 }
  0xfb   :  { %5032 = vmatprep.subr.bf16.mxu1 %v7562_v23 }
  0xfe   :  { %5034 = vmatpush3.bf16.msra.mxu1 %v6677_v53 }
  0xff   :  { %5067 = vmatprep.subr.bf16.mxu1 %v7562_v23 }
 0x174   :  { %v279_v62 = vpop.f32.mrb[0].mxu1 }
 0x175   :  { %v280_v63 = vadd.f32 %v279_v62, %v201_v60  ;;  %v281_v2 = vpop.f32.mrb[1].mxu1  ;;  %v7557_v62 = vsub.s32 2, %v6701_v55 }
 0x176   :  { %v576_v3 = vpop.f32.mrb[0].mxu0  ;;  %v282_v4 = vadd.f32 %v281_v2, %v205_v61 }
 0x177   :  { %v578_v5 = vpop.f32.mrb[1].mxu0  ;;  %v651_v7 = vadd.f32 %v576_v3, %v280_v63 }
 0x178   :  { %v658_v8 = vadd.f32 %v578_v5, %v282_v4  ;;  %v285_v10 = vpop.f32.mrb[2].mxu1  ;;  %v209_v5 = vrot.slane %v196_v58, %v7557_v62 }
 0x179   :  { %v6712_v11 = vadd.f32 %v285_v10, %v201_v60  ;;  %v287_v12 = vpop.f32.mrb[3].mxu1 }
 0x17a   :  { %v6714_v14 = vadd.f32 %v287_v12, %v205_v61 }
 0x17c   :  { %v291_v16 = vpop.f32.mrb[4].mxu1 }
 0x17d   :  { %v6716_v17 = vadd.f32 %v291_v16, %v201_v60  ;;  %v293_v18 = vpop.f32.mrb[5].mxu1 }
 0x17e   :  { %v6718_v19 = vadd.f32 %v293_v18, %v205_v61 }
 0x180   :  { %v297_v24 = vpop.f32.mrb[6].mxu1 }
 0x181   :  { %v6720_v25 = vadd.f32 %v297_v24, %v201_v60  ;;  %v299_v28 = vpop.f32.mrb[7].mxu1  ;;  %v3788_v24 = vmul.f32 -1.442695, %v651_v7 }
 0x182   :  { %v6722_v30 = vadd.f32 %v299_v28, %v205_v61 }
 0x183   :  { %5995 = vpow2.f32 %v3788_v24  ;;  %v6760_v24 = vld [vmem:[%s7548_s5] ss:$0 sm:$0xff] }
 0x184   :  { %v303_v32 = vpop.f32.mrb[8].mxu1 }
 0x185   :  { %v6724_v33 = vadd.f32 %v303_v32, %v201_v60  ;;  %v305_v37 = vpop.f32.mrb[9].mxu1 }
 0x186   :  { %v6726_v38 = vadd.f32 %v305_v37, %v205_v61 }
 0x188   :  { %v309_v42 = vpop.f32.mrb[10].mxu1 }
 0x189   :  { %v6728_v43 = vadd.f32 %v309_v42, %v201_v60  ;;  %v311_v46 = vpop.f32.mrb[11].mxu1 }
 0x18a   :  { %v6730_v48 = vadd.f32 %v311_v46, %v205_v61 }
 0x18c   :  { %v315_v50 = vpop.f32.mrb[12].mxu1 }
 0x18d   :  { %v6732_v51 = vadd.f32 %v315_v50, %v201_v60  ;;  %v317_v54 = vpop.f32.mrb[13].mxu1  ;;  %v5996_v7 = vpop.eup %5995 }
 0x18e   :  { %v6735_v63 = vadd.f32 %v317_v54, %v205_v61 }
 0x190   :  { %v321_v2 = vpop.f32.mrb[14].mxu1 }
 0x191   :  { %v6737_v3 = vadd.f32 %v321_v2, %v201_v60  ;;  %v323_v4 = vpop.f32.mrb[15].mxu1 }
 0x192   :  { %v6741_v10 = vadd.f32 %v323_v4, %v205_v61  ;;  %v3789_v4 = vmul.f32 -1.442695, %v658_v8 }
 0x194   :  { %v4201_v12 = vpop.f32.mrb[16].mxu1  ;;  %5997 = vpow2.f32 %v3789_v4 }
 0x195   :  { %v6743_v16 = vadd.f32 %v4201_v12, %v209_v5  ;;  %v392_v18 = vpop.f32.mrb[17].mxu1 }
 0x196   :  { %v393_v8 = vadd.f32 %v392_v18, %v209_v5 }
 0x198   :  { %v4204_v28 = vpop.f32.mrb[18].mxu1 }
 0x199   :  { %v6745_v32 = vadd.f32 %v4204_v28, %v209_v5  ;;  %v402_v37 = vpop.f32.mrb[19].mxu1  ;;  %v655_v28 = vadd.f32 1.0, %v5996_v7 }
 0x19a   :  { %v6747_v42 = vadd.f32 %v402_v37, %v209_v5 }
 0x19b   :  { %5999 = vrcp.f32 %v655_v28 }
 0x19c   :  { %v4207_v60 = vpop.f32.mrb[20].mxu1 }
 0x19d   :  { %v6749_v46 = vadd.f32 %v4207_v60, %v209_v5  ;;  %v412_v50 = vpop.f32.mrb[21].mxu1 }
 0x19e   :  { %v6751_v54 = vadd.f32 %v412_v50, %v209_v5  ;;  %v5998_v37 = vpop.eup %5997 }
 0x19f   :  { %v662_v60 = vadd.f32 1.0, %v5998_v37 }
 0x1a0   :  { %v4210_v58 = vpop.f32.mrb[22].mxu1 }
 0x1a1   :  { %v6753_v61 = vadd.f32 %v4210_v58, %v209_v5  ;;  %v422_v2 = vpop.f32.mrb[23].mxu1  ;;  %6001 = vrcp.f32 %v662_v60 }
 0x1a2   :  { %v6755_v12 = vadd.f32 %v422_v2, %v209_v5 }
 0x1a5   :  { %v6000_v59 = vpop.eup %5999 }
 0x1ab   :  { %v6002_v4 = vpop.eup %6001 }
 0x1ac   :  { %v675_v7 = vsub.f32 1.0, %v6002_v4  ;;  %v677_v23 = vmul.f32 %v6002_v4, %v6609_v47 }
 0x1b4   :  { %v647_v50 = vpop.f32.mrb[24].mxu1 }
 0x1b5   :  { %v671_v62 = vadd.f32 %v6760_v24, %v647_v50  ;;  %v4245_v58 = vpop.f32.mrb[25].mxu1 }
 0x1b7   :  { %v672_v2 = vmul.f32 %v6000_v59, %v671_v62  ;;  %v7567_v59 = vmov 0.0|0.0  }
 0x1b9   :  { %v673_v56 = vadd.f32 %v672_v2, %v393_v8 }
 0x1bb   :  { %6003 = vtanh.f32 %v673_v56  ;;  %v7568_v56 = vmov 0.0  }
 0x1c5   :  { %v6004_v28 = vpop.eup %6003 }
 0x1c6   :  { %v676_v0 = vmul.f32 %v6004_v28, %v675_v7 }
 0x1c8   :  { %v6764_v55 = vadd.f32 %v677_v23, %v676_v0 }
 0x1ca   :  { %751 = vmatmul.mubr.f32.vlgmr.msra.gmra.mrb[2].mxu0 %v6764_v55  ;;  %4279 = vmatmul.mubr.f32.vlgmr.msra.gmra.mrb[26].mxu1 %v6764_v55 }
 0x1cb   :  { %5038 = vmatpush1.bf16.msra.mxu0 %v6561_v13  ;;  %5069 = vmatpush3.bf16.msra.mxu1 %v6643_v21 }
 0x1cc   :  { %5040 = vmatprep.subr.bf16.mxu0 %v6565_v22  ;;  %5070 = vmatprep.subr.bf16.mxu1 %v7567_v59 }
 0x1cd   :  { %921 = vmatprep.mubr.f32.mxu0 %v7568_v56  ;;  %4313 = vmatprep.mubr.msk.f32.mxu1 %vm6379_vm0, %v7568_v56 }
 0x1cf   :  { %5042 = vmatpush1.bf16.msra.mxu0 %v6567_v26  ;;  %5072 = vmatpush3.bf16.msra.mxu1 %v6650_v27 }
 0x1d0   :  { %5044 = vmatprep.subr.bf16.mxu0 %v6570_v35  ;;  %5073 = vmatprep.subr.bf16.mxu1 %v7567_v59 }
 0x1d3   :  { %5046 = vmatpush1.bf16.msra.mxu0 %v6573_v39  ;;  %5075 = vmatpush3.bf16.msra.mxu1 %v6655_v31 }
 0x1d4   :  { %5048 = vmatprep.subr.bf16.mxu0 %v6576_v44  ;;  %5076 = vmatprep.subr.bf16.mxu1 %v7567_v59 }
 0x1d7   :  { %5050 = vmatpush1.bf16.msra.mxu0 %v6579_v52  ;;  %5078 = vmatpush3.bf16.msra.mxu1 %v6659_v36 }
 0x1d8   :  { %5052 = vmatprep.subr.bf16.mxu0 %v6582_v57  ;;  %5079 = vmatprep.subr.bf16.mxu1 %v7567_v59 }
 0x1db   :  { %5054 = vmatpush1.bf16.msra.mxu0 %v6585_v1  ;;  %5081 = vmatpush3.bf16.msra.mxu1 %v6663_v40 }
 0x1dc   :  { %5056 = vmatprep.subr.bf16.mxu0 %v6588_v6  ;;  %5082 = vmatprep.subr.bf16.mxu1 %v7567_v59 }
 0x1df   :  { %5058 = vmatpush1.bf16.msra.mxu0 %v6591_v15  ;;  %5084 = vmatpush3.bf16.msra.mxu1 %v6669_v45 }
 0x1e0   :  { %5060 = vmatprep.subr.bf16.mxu0 %v6594_v20  ;;  %5085 = vmatprep.subr.bf16.mxu1 %v7567_v59 }
 0x1e3   :  { %5062 = vmatpush1.bf16.msra.mxu0 %v6597_v29  ;;  %5087 = vmatpush3.bf16.msra.mxu1 %v6673_v49 }
 0x1e4   :  { %5064 = vmatprep.subr.bf16.mxu0 %v6600_v34  ;;  %5088 = vmatprep.subr.bf16.mxu1 %v7567_v59 }
 0x1e7   :  { %5066 = vmatpush1.bf16.msra.mxu0 %v6603_v41  ;;  %5090 = vmatpush3.bf16.msra.mxu1 %v6677_v53 }
 0x1e8   :  { %5092 = vmatprep.subr.bf16.mxu0 %v6559_v9  ;;  %5123 = vmatprep.subr.bf16.mxu1 %v7567_v59 }
 0x29d   :  { %v752_v0 = vpop.f32.mrb[2].mxu0  ;;  %v823_v47 = vpop.f32.mrb[26].mxu1 }
 0x29e   :  { %v827_v23 = vadd.f32 %v752_v0, %v6712_v11  ;;  %v754_v62 = vpop.f32.mrb[3].mxu0  ;;  %v4280_v5 = vpop.f32.mrb[27].mxu1  ;;  %v841_v4 = vadd.f32 %v6760_v24, %v823_v47 }
 0x29f   :  { %v834_v18 = vadd.f32 %v754_v62, %v6714_v14 }
 0x2a0   :  { %v3791_v37 = vmul.f32 -1.442695, %v827_v23 }
 0x2a1   :  { %v3792_v60 = vmul.f32 -1.442695, %v834_v18 }
 0x2a2   :  { %6005 = vpow2.f32 %v3791_v37 }
 0x2a3   :  { %6007 = vpow2.f32 %v3792_v60 }
 0x2ac   :  { %v6006_v50 = vpop.eup %6005 }
 0x2ad   :  { %v831_v58 = vadd.f32 1.0, %v6006_v50  ;;  %v6008_v8 = vpop.eup %6007 }
 0x2ae   :  { %v838_v2 = vadd.f32 1.0, %v6008_v8 }
 0x2af   :  { %6009 = vrcp.f32 %v831_v58 }
 0x2b0   :  { %6011 = vrcp.f32 %v838_v2 }
 0x2b9   :  { %v6010_v7 = vpop.eup %6009 }
 0x2ba   :  { %v842_v28 = vmul.f32 %v6010_v7, %v841_v4  ;;  %v6012_v0 = vpop.eup %6011 }
 0x2bb   :  { %v845_v5 = vsub.f32 1.0, %v6012_v0  ;;  %v847_v62 = vmul.f32 %v6012_v0, %v6764_v55 }
 0x2bc   :  { %v843_v11 = vadd.f32 %v842_v28, %v6743_v16 }
 0x2be   :  { %6013 = vtanh.f32 %v843_v11 }
 0x2c8   :  { %v6014_v14 = vpop.eup %6013 }
 0x2c9   :  { %v846_v23 = vmul.f32 %v6014_v14, %v845_v5 }
 0x2cb   :  { %v6808_v18 = vadd.f32 %v847_v62, %v846_v23 }
 0x2cd   :  { %922 = vmatmul.mubr.f32.vlgmr.msra.gmra.mrb[4].mxu0 %v6808_v18  ;;  %4314 = vmatmul.mubr.f32.vlgmr.msra.gmra.mrb[28].mxu1 %v6808_v18 }
 0x2ce   :  { %5094 = vmatpush1.bf16.msra.mxu0 %v6561_v13  ;;  %5125 = vmatpush3.bf16.msra.mxu1 %v6643_v21 }
 0x2cf   :  { %5096 = vmatprep.subr.bf16.mxu0 %v6565_v22  ;;  %5126 = vmatprep.subr.bf16.mxu1 %v7567_v59 }
 0x2d0   :  { %1092 = vmatprep.mubr.f32.mxu0 %v7568_v56  ;;  %4348 = vmatprep.mubr.msk.f32.mxu1 %vm6379_vm0, %v7568_v56 }
 0x2d2   :  { %5098 = vmatpush1.bf16.msra.mxu0 %v6567_v26  ;;  %5128 = vmatpush3.bf16.msra.mxu1 %v6650_v27 }
 0x2d3   :  { %5100 = vmatprep.subr.bf16.mxu0 %v6570_v35  ;;  %5129 = vmatprep.subr.bf16.mxu1 %v7567_v59 }
 0x2d6   :  { %5102 = vmatpush1.bf16.msra.mxu0 %v6573_v39  ;;  %5131 = vmatpush3.bf16.msra.mxu1 %v6655_v31 }
 0x2d7   :  { %5104 = vmatprep.subr.bf16.mxu0 %v6576_v44  ;;  %5132 = vmatprep.subr.bf16.mxu1 %v7567_v59 }
 0x2da   :  { %5106 = vmatpush1.bf16.msra.mxu0 %v6579_v52  ;;  %5134 = vmatpush3.bf16.msra.mxu1 %v6659_v36 }
 0x2db   :  { %5108 = vmatprep.subr.bf16.mxu0 %v6582_v57  ;;  %5135 = vmatprep.subr.bf16.mxu1 %v7567_v59 }
 0x2de   :  { %5110 = vmatpush1.bf16.msra.mxu0 %v6585_v1  ;;  %5137 = vmatpush3.bf16.msra.mxu1 %v6663_v40 }
 0x2df   :  { %5112 = vmatprep.subr.bf16.mxu0 %v6588_v6  ;;  %5138 = vmatprep.subr.bf16.mxu1 %v7567_v59 }
 0x2e2   :  { %5114 = vmatpush1.bf16.msra.mxu0 %v6591_v15  ;;  %5140 = vmatpush3.bf16.msra.mxu1 %v6669_v45 }
 0x2e3   :  { %5116 = vmatprep.subr.bf16.mxu0 %v6594_v20  ;;  %5141 = vmatprep.subr.bf16.mxu1 %v7567_v59 }
 0x2e6   :  { %5118 = vmatpush1.bf16.msra.mxu0 %v6597_v29  ;;  %5143 = vmatpush3.bf16.msra.mxu1 %v6673_v49 }
 0x2e7   :  { %5120 = vmatprep.subr.bf16.mxu0 %v6600_v34  ;;  %5144 = vmatprep.subr.bf16.mxu1 %v7567_v59 }
 0x2ea   :  { %5122 = vmatpush1.bf16.msra.mxu0 %v6603_v41  ;;  %5146 = vmatpush3.bf16.msra.mxu1 %v6677_v53 }
 0x2eb   :  { %5148 = vmatprep.subr.bf16.mxu0 %v6559_v9  ;;  %5179 = vmatprep.subr.bf16.mxu1 %v7567_v59 }
 0x3a0   :  { %v923_v16 = vpop.f32.mrb[4].mxu0  ;;  %v994_v47 = vpop.f32.mrb[28].mxu1 }
 0x3a1   :  { %v998_v37 = vadd.f32 %v923_v16, %v6716_v17  ;;  %v925_v60 = vpop.f32.mrb[5].mxu0  ;;  %v4315_v50 = vpop.f32.mrb[29].mxu1  ;;  %v1012_v0 = vadd.f32 %v6760_v24, %v994_v47 }
 0x3a2   :  { %v1005_v58 = vadd.f32 %v925_v60, %v6718_v19 }
 0x3a3   :  { %v3793_v8 = vmul.f32 -1.442695, %v998_v37 }
 0x3a4   :  { %v3794_v2 = vmul.f32 -1.442695, %v1005_v58 }
 0x3a5   :  { %6015 = vpow2.f32 %v3793_v8 }
 0x3a6   :  { %6017 = vpow2.f32 %v3794_v2 }
 0x3af   :  { %v6016_v4 = vpop.eup %6015 }
 0x3b0   :  { %v1002_v7 = vadd.f32 1.0, %v6016_v4  ;;  %v6018_v28 = vpop.eup %6017 }
 0x3b1   :  { %v1009_v11 = vadd.f32 1.0, %v6018_v28 }
 0x3b2   :  { %6019 = vrcp.f32 %v1002_v7 }
 0x3b3   :  { %6021 = vrcp.f32 %v1009_v11 }
 0x3bc   :  { %v6020_v5 = vpop.eup %6019 }
 0x3bd   :  { %v1013_v14 = vmul.f32 %v6020_v5, %v1012_v0  ;;  %v6022_v23 = vpop.eup %6021 }
 0x3be   :  { %v1016_v62 = vsub.f32 1.0, %v6022_v23  ;;  %v1018_v37 = vmul.f32 %v6022_v23, %v6808_v18 }
 0x3bf   :  { %v1014_v17 = vadd.f32 %v1013_v14, %v6747_v42 }
 0x3c1   :  { %6023 = vtanh.f32 %v1014_v17 }
 0x3cb   :  { %v6024_v19 = vpop.eup %6023 }
 0x3cc   :  { %v1017_v16 = vmul.f32 %v6024_v19, %v1016_v62 }
 0x3ce   :  { %v6852_v60 = vadd.f32 %v1018_v37, %v1017_v16 }
 0x3d0   :  { %1093 = vmatmul.mubr.f32.vlgmr.msra.gmra.mrb[6].mxu0 %v6852_v60  ;;  %4349 = vmatmul.mubr.f32.vlgmr.msra.gmra.mrb[30].mxu1 %v6852_v60 }
 0x3d1   :  { %5150 = vmatpush1.bf16.msra.mxu0 %v6561_v13  ;;  %5181 = vmatpush3.bf16.msra.mxu1 %v6643_v21 }
 0x3d2   :  { %5152 = vmatprep.subr.bf16.mxu0 %v6565_v22  ;;  %5182 = vmatprep.subr.bf16.mxu1 %v7567_v59 }
 0x3d3   :  { %1263 = vmatprep.mubr.f32.mxu0 %v7568_v56  ;;  %4383 = vmatprep.mubr.msk.f32.mxu1 %vm6379_vm0, %v7568_v56 }
 0x3d5   :  { %5154 = vmatpush1.bf16.msra.mxu0 %v6567_v26  ;;  %5184 = vmatpush3.bf16.msra.mxu1 %v6650_v27 }
 0x3d6   :  { %5156 = vmatprep.subr.bf16.mxu0 %v6570_v35  ;;  %5185 = vmatprep.subr.bf16.mxu1 %v7567_v59 }
 0x3d9   :  { %5158 = vmatpush1.bf16.msra.mxu0 %v6573_v39  ;;  %5187 = vmatpush3.bf16.msra.mxu1 %v6655_v31 }
 0x3da   :  { %5160 = vmatprep.subr.bf16.mxu0 %v6576_v44  ;;  %5188 = vmatprep.subr.bf16.mxu1 %v7567_v59 }
 0x3dd   :  { %5162 = vmatpush1.bf16.msra.mxu0 %v6579_v52  ;;  %5190 = vmatpush3.bf16.msra.mxu1 %v6659_v36 }
 0x3de   :  { %5164 = vmatprep.subr.bf16.mxu0 %v6582_v57  ;;  %5191 = vmatprep.subr.bf16.mxu1 %v7567_v59 }
 0x3e1   :  { %5166 = vmatpush1.bf16.msra.mxu0 %v6585_v1  ;;  %5193 = vmatpush3.bf16.msra.mxu1 %v6663_v40 }
 0x3e2   :  { %5168 = vmatprep.subr.bf16.mxu0 %v6588_v6  ;;  %5194 = vmatprep.subr.bf16.mxu1 %v7567_v59 }
 0x3e5   :  { %5170 = vmatpush1.bf16.msra.mxu0 %v6591_v15  ;;  %5196 = vmatpush3.bf16.msra.mxu1 %v6669_v45 }
 0x3e6   :  { %5172 = vmatprep.subr.bf16.mxu0 %v6594_v20  ;;  %5197 = vmatprep.subr.bf16.mxu1 %v7567_v59 }
 0x3e9   :  { %5174 = vmatpush1.bf16.msra.mxu0 %v6597_v29  ;;  %5199 = vmatpush3.bf16.msra.mxu1 %v6673_v49 }
 0x3ea   :  { %5176 = vmatprep.subr.bf16.mxu0 %v6600_v34  ;;  %5200 = vmatprep.subr.bf16.mxu1 %v7567_v59 }
 0x3ed   :  { %5178 = vmatpush1.bf16.msra.mxu0 %v6603_v41  ;;  %5202 = vmatpush3.bf16.msra.mxu1 %v6677_v53 }
 0x3ee   :  { %5204 = vmatprep.subr.bf16.mxu0 %v6559_v9  ;;  %5235 = vmatprep.subr.bf16.mxu1 %v7567_v59 }
 0x4a3   :  { %v1094_v42 = vpop.f32.mrb[6].mxu0  ;;  %v1165_v47 = vpop.f32.mrb[30].mxu1 }
 0x4a4   :  { %v1169_v50 = vadd.f32 %v1094_v42, %v6720_v25  ;;  %v1096_v58 = vpop.f32.mrb[7].mxu0  ;;  %v4350_v8 = vpop.f32.mrb[31].mxu1  ;;  %v1183_v14 = vadd.f32 %v6760_v24, %v1165_v47 }
 0x4a5   :  { %v1176_v2 = vadd.f32 %v1096_v58, %v6722_v30 }
 0x4a6   :  { %v3795_v4 = vmul.f32 -1.442695, %v1169_v50 }
 0x4a7   :  { %v3796_v7 = vmul.f32 -1.442695, %v1176_v2 }
 0x4a8   :  { %6025 = vpow2.f32 %v3795_v4 }
 0x4a9   :  { %6027 = vpow2.f32 %v3796_v7 }
 0x4b2   :  { %v6026_v28 = vpop.eup %6025 }
 0x4b3   :  { %v1173_v11 = vadd.f32 1.0, %v6026_v28  ;;  %v6028_v0 = vpop.eup %6027 }
 0x4b4   :  { %v1180_v5 = vadd.f32 1.0, %v6028_v0 }
 0x4b5   :  { %6029 = vrcp.f32 %v1173_v11 }
 0x4b6   :  { %6031 = vrcp.f32 %v1180_v5 }
 0x4bf   :  { %v6030_v17 = vpop.eup %6029 }
 0x4c0   :  { %v1184_v23 = vmul.f32 %v6030_v17, %v1183_v14  ;;  %v6032_v62 = vpop.eup %6031 }
 0x4c1   :  { %v1187_v19 = vsub.f32 1.0, %v6032_v62  ;;  %v1189_v37 = vmul.f32 %v6032_v62, %v6852_v60 }
 0x4c2   :  { %v1185_v25 = vadd.f32 %v1184_v23, %v6745_v32 }
 0x4c4   :  { %6033 = vtanh.f32 %v1185_v25 }
 0x4ce   :  { %v6034_v30 = vpop.eup %6033 }
 0x4cf   :  { %v1188_v16 = vmul.f32 %v6034_v30, %v1187_v19 }
 0x4d1   :  { %v6896_v42 = vadd.f32 %v1189_v37, %v1188_v16 }
 0x4d3   :  { %1264 = vmatmul.mubr.f32.vlgmr.msra.gmra.mrb[8].mxu0 %v6896_v42  ;;  %4384 = vmatmul.mubr.f32.vlgmr.msra.gmra.mrb[32].mxu1 %v6896_v42 }
 0x4d4   :  { %5206 = vmatpush1.bf16.msra.mxu0 %v6561_v13  ;;  %5237 = vmatpush3.bf16.msra.mxu1 %v6643_v21 }
 0x4d5   :  { %5208 = vmatprep.subr.bf16.mxu0 %v6565_v22  ;;  %5238 = vmatprep.subr.bf16.mxu1 %v7567_v59 }
 0x4d6   :  { %1434 = vmatprep.mubr.f32.mxu0 %v7568_v56  ;;  %4418 = vmatprep.mubr.msk.f32.mxu1 %vm6379_vm0, %v7568_v56 }
 0x4d8   :  { %5210 = vmatpush1.bf16.msra.mxu0 %v6567_v26  ;;  %5240 = vmatpush3.bf16.msra.mxu1 %v6650_v27 }
 0x4d9   :  { %5212 = vmatprep.subr.bf16.mxu0 %v6570_v35  ;;  %5241 = vmatprep.subr.bf16.mxu1 %v7567_v59 }
 0x4dc   :  { %5214 = vmatpush1.bf16.msra.mxu0 %v6573_v39  ;;  %5243 = vmatpush3.bf16.msra.mxu1 %v6655_v31 }
 0x4dd   :  { %5216 = vmatprep.subr.bf16.mxu0 %v6576_v44  ;;  %5244 = vmatprep.subr.bf16.mxu1 %v7567_v59 }
 0x4e0   :  { %5218 = vmatpush1.bf16.msra.mxu0 %v6579_v52  ;;  %5246 = vmatpush3.bf16.msra.mxu1 %v6659_v36 }
 0x4e1   :  { %5220 = vmatprep.subr.bf16.mxu0 %v6582_v57  ;;  %5247 = vmatprep.subr.bf16.mxu1 %v7567_v59 }
 0x4e4   :  { %5222 = vmatpush1.bf16.msra.mxu0 %v6585_v1  ;;  %5249 = vmatpush3.bf16.msra.mxu1 %v6663_v40 }
 0x4e5   :  { %5224 = vmatprep.subr.bf16.mxu0 %v6588_v6  ;;  %5250 = vmatprep.subr.bf16.mxu1 %v7567_v59 }
 0x4e8   :  { %5226 = vmatpush1.bf16.msra.mxu0 %v6591_v15  ;;  %5252 = vmatpush3.bf16.msra.mxu1 %v6669_v45 }
 0x4e9   :  { %5228 = vmatprep.subr.bf16.mxu0 %v6594_v20  ;;  %5253 = vmatprep.subr.bf16.mxu1 %v7567_v59 }
 0x4ec   :  { %5230 = vmatpush1.bf16.msra.mxu0 %v6597_v29  ;;  %5255 = vmatpush3.bf16.msra.mxu1 %v6673_v49 }
 0x4ed   :  { %5232 = vmatprep.subr.bf16.mxu0 %v6600_v34  ;;  %5256 = vmatprep.subr.bf16.mxu1 %v7567_v59 }
 0x4f0   :  { %5234 = vmatpush1.bf16.msra.mxu0 %v6603_v41  ;;  %5258 = vmatpush3.bf16.msra.mxu1 %v6677_v53 }
 0x4f1   :  { %5260 = vmatprep.subr.bf16.mxu0 %v6559_v9  ;;  %5291 = vmatprep.subr.bf16.mxu1 %v7567_v59 }
 0x5a6   :  { %v1265_v32 = vpop.f32.mrb[8].mxu0  ;;  %v1336_v47 = vpop.f32.mrb[32].mxu1 }
 0x5a7   :  { %v1340_v50 = vadd.f32 %v1265_v32, %v6724_v33  ;;  %v1267_v58 = vpop.f32.mrb[9].mxu0  ;;  %v4385_v8 = vpop.f32.mrb[33].mxu1  ;;  %v1354_v14 = vadd.f32 %v6760_v24, %v1336_v47 }
 0x5a8   :  { %v1347_v2 = vadd.f32 %v1267_v58, %v6726_v38 }
 0x5a9   :  { %v3797_v4 = vmul.f32 -1.442695, %v1340_v50 }
 0x5aa   :  { %v3798_v7 = vmul.f32 -1.442695, %v1347_v2 }
 0x5ab   :  { %6035 = vpow2.f32 %v3797_v4 }
 0x5ac   :  { %6037 = vpow2.f32 %v3798_v7 }
 0x5b5   :  { %v6036_v28 = vpop.eup %6035 }
 0x5b6   :  { %v1344_v11 = vadd.f32 1.0, %v6036_v28  ;;  %v6038_v0 = vpop.eup %6037 }
 0x5b7   :  { %v1351_v5 = vadd.f32 1.0, %v6038_v0 }
 0x5b8   :  { %6039 = vrcp.f32 %v1344_v11 }
 0x5b9   :  { %6041 = vrcp.f32 %v1351_v5 }
 0x5c2   :  { %v6040_v17 = vpop.eup %6039 }
 0x5c3   :  { %v1355_v23 = vmul.f32 %v6040_v17, %v1354_v14  ;;  %v6042_v25 = vpop.eup %6041 }
 0x5c4   :  { %v1358_v62 = vsub.f32 1.0, %v6042_v25  ;;  %v1360_v30 = vmul.f32 %v6042_v25, %v6896_v42 }
 0x5c5   :  { %v1356_v33 = vadd.f32 %v1355_v23, %v6751_v54 }
 0x5c7   :  { %6043 = vtanh.f32 %v1356_v33 }
 0x5d1   :  { %v6044_v38 = vpop.eup %6043 }
 0x5d2   :  { %v1359_v19 = vmul.f32 %v6044_v38, %v1358_v62  ;;  %v1895_v38 = vld [vmem:[#allocation13 + $0x38] sm:$0xff] }
 0x5d4   :  { %v6940_v16 = vadd.f32 %v1360_v30, %v1359_v19  ;;  %v1898_v19 = vld [vmem:[#allocation13 + $0x50] sm:$0xff] }
 0x5d6   :  { %1435 = vmatmul.mubr.f32.vlgmr.msra.gmra.mrb[10].mxu0 %v6940_v16  ;;  %4419 = vmatmul.mubr.f32.vlgmr.msra.gmra.mrb[34].mxu1 %v6940_v16 }
 0x5d7   :  { %5262 = vmatpush1.bf16.msra.mxu0 %v6561_v13  ;;  %5293 = vmatpush3.bf16.msra.mxu1 %v6643_v21 }
 0x5d8   :  { %5264 = vmatprep.subr.bf16.mxu0 %v6565_v22  ;;  %5294 = vmatprep.subr.bf16.mxu1 %v7567_v59 }
 0x5d9   :  { %1605 = vmatprep.mubr.f32.mxu0 %v7568_v56  ;;  %4453 = vmatprep.mubr.msk.f32.mxu1 %vm6379_vm0, %v7568_v56 }
 0x5db   :  { %5266 = vmatpush1.bf16.msra.mxu0 %v6567_v26  ;;  %5296 = vmatpush3.bf16.msra.mxu1 %v6650_v27 }
 0x5dc   :  { %5268 = vmatprep.subr.bf16.mxu0 %v6570_v35  ;;  %5297 = vmatprep.subr.bf16.mxu1 %v7567_v59 }
 0x5df   :  { %5270 = vmatpush1.bf16.msra.mxu0 %v6573_v39  ;;  %5299 = vmatpush3.bf16.msra.mxu1 %v6655_v31 }
 0x5e0   :  { %5272 = vmatprep.subr.bf16.mxu0 %v6576_v44  ;;  %5300 = vmatprep.subr.bf16.mxu1 %v7567_v59 }
 0x5e3   :  { %5274 = vmatpush1.bf16.msra.mxu0 %v6579_v52  ;;  %5302 = vmatpush3.bf16.msra.mxu1 %v6659_v36 }
 0x5e4   :  { %5276 = vmatprep.subr.bf16.mxu0 %v6582_v57  ;;  %5303 = vmatprep.subr.bf16.mxu1 %v7567_v59 }
 0x5e7   :  { %5278 = vmatpush1.bf16.msra.mxu0 %v6585_v1  ;;  %5305 = vmatpush3.bf16.msra.mxu1 %v6663_v40 }
 0x5e8   :  { %5280 = vmatprep.subr.bf16.mxu0 %v6588_v6  ;;  %5306 = vmatprep.subr.bf16.mxu1 %v7567_v59 }
 0x5eb   :  { %5282 = vmatpush1.bf16.msra.mxu0 %v6591_v15  ;;  %5308 = vmatpush3.bf16.msra.mxu1 %v6669_v45 }
 0x5ec   :  { %5284 = vmatprep.subr.bf16.mxu0 %v6594_v20  ;;  %5309 = vmatprep.subr.bf16.mxu1 %v7567_v59 }
 0x5ef   :  { %5286 = vmatpush1.bf16.msra.mxu0 %v6597_v29  ;;  %5311 = vmatpush3.bf16.msra.mxu1 %v6673_v49 }
 0x5f0   :  { %5288 = vmatprep.subr.bf16.mxu0 %v6600_v34  ;;  %5312 = vmatprep.subr.bf16.mxu1 %v7567_v59 }
 0x5f3   :  { %5290 = vmatpush1.bf16.msra.mxu0 %v6603_v41  ;;  %5314 = vmatpush3.bf16.msra.mxu1 %v6677_v53 }
 0x5f4   :  { %5316 = vmatprep.subr.bf16.mxu0 %v6559_v9  ;;  %5347 = vmatprep.subr.bf16.mxu1 %v7567_v59 }
 0x6a9   :  { %v1436_v54 = vpop.f32.mrb[10].mxu0  ;;  %v1507_v37 = vpop.f32.mrb[34].mxu1 }
 0x6aa   :  { %v1511_v32 = vadd.f32 %v1436_v54, %v6728_v43  ;;  %v1438_v47 = vpop.f32.mrb[11].mxu0  ;;  %v4420_v50 = vpop.f32.mrb[35].mxu1  ;;  %v1525_v9 = vadd.f32 %v6760_v24, %v1507_v37  ;;  %v1896_v37 = vld [vmem:[#allocation13 + $0x40] sm:$0xff] }
 0x6ab   :  { %v1518_v58 = vadd.f32 %v1438_v47, %v6730_v48  ;;  %v5375_v50 = vpack.c.bf16 %v1898_v19, %v1895_v38 }
 0x6ac   :  { %v3799_v8 = vmul.f32 -1.442695, %v1511_v32  ;;  %v1899_v32 = vld [vmem:[#allocation13 + $0x58] sm:$0xff] }
 0x6ad   :  { %v3800_v2 = vmul.f32 -1.442695, %v1518_v58  ;;  %v1894_v58 = vld [vmem:[#allocation13 + $0x30] sm:$0xff] }
 0x6ae   :  { %6045 = vpow2.f32 %v3799_v8  ;;  %v1897_v8 = vld [vmem:[#allocation13 + $0x48] sm:$0xff] }
 0x6af   :  { %6047 = vpow2.f32 %v3800_v2  ;;  %v5407_v2 = vpack.c.bf16 %v1899_v32, %v1896_v37  ;;  %v1931_v37 = vld [vmem:[#allocation13 + $0x158] sm:$0xff]  ;;  %v1934_v32 = vld [vmem:[#allocation13 + $0x170] sm:$0xff] }
 0x6b8   :  { %v6046_v4 = vpop.eup %6045 }
 0x6b9   :  { %v1515_v7 = vadd.f32 1.0, %v6046_v4  ;;  %v6048_v28 = vpop.eup %6047  ;;  %v1904_v4 = vld [vmem:[#allocation13 + $0x80] sm:$0xff] }
 0x6ba   :  { %v1522_v11 = vadd.f32 1.0, %v6048_v28  ;;  %v1905_v28 = vld [vmem:[#allocation13 + $0x88] sm:$0xff] }
 0x6bb   :  { %6049 = vrcp.f32 %v1515_v7  ;;  %v1902_v7 = vld [vmem:[#allocation13 + $0x70] sm:$0xff] }
 0x6bc   :  { %6051 = vrcp.f32 %v1522_v11  ;;  %v5377_v11 = vpack.c.bf16 %v1897_v8, %v1894_v58  ;;  %v5399_v8 = vpack.c.bf16 %v1934_v32, %v1931_v37  ;;  %v2240_v37 = vld [vmem:[#allocation14 + $0x150] sm:$0xff]  ;;  %v2243_v32 = vld [vmem:[#allocation14 + $0x168] sm:$0xff] }
 0x6c5   :  { %v6050_v0 = vpop.eup %6049 }
 0x6c6   :  { %v1526_v5 = vmul.f32 %v6050_v0, %v1525_v9  ;;  %v6052_v14 = vpop.eup %6051  ;;  %v5411_v0 = vpack.c.bf16 %v1905_v28, %v1902_v7  ;;  %v2198_v28 = vld [vmem:[#allocation14] sm:$0xff] }
 0x6c7   :  { %v1529_v17 = vsub.f32 1.0, %v6052_v14  ;;  %v1531_v33 = vmul.f32 %v6052_v14, %v6940_v16  ;;  %v1907_v14 = vld [vmem:[#allocation13 + $0x98] sm:$0xff] }
 0x6c8   :  { %v1527_v43 = vadd.f32 %v1526_v5, %v6749_v46  ;;  %v1891_v46 = vld [vmem:[#allocation13 + $0x18] sm:$0xff]  ;;  %v1900_v5 = vld [vmem:[#allocation13 + $0x60] sm:$0xff] }
 0x6ca   :  { %6053 = vtanh.f32 %v1527_v43  ;;  %v1903_v43 = vld [vmem:[#allocation13 + $0x78] sm:$0xff] }
 0x6d4   :  { %v6054_v48 = vpop.eup %6053 }
 0x6d5   :  { %v1530_v23 = vmul.f32 %v6054_v48, %v1529_v17  ;;  %v1910_v17 = vld [vmem:[#allocation13 + $0xb0] sm:$0xff]  ;;  %v1908_v48 = vld [vmem:[#allocation13 + $0xa0] sm:$0xff] }
 0x6d7   :  { %v6984_v25 = vadd.f32 %v1531_v33, %v1530_v23  ;;  %v1911_v23 = vld [vmem:[#allocation13 + $0xb8] sm:$0xff]  ;;  %v5381_v33 = vpack.c.bf16 %v1903_v43, %v1900_v5  ;;  %v2207_v5 = vld [vmem:[#allocation14 + $0x48] sm:$0xff] }
 0x6d9   :  { %1606 = vmatmul.mubr.f32.vlgmr.msra.gmra.mrb[12].mxu0 %v6984_v25  ;;  %4454 = vmatmul.mubr.f32.vlgmr.msra.gmra.mrb[36].mxu1 %v6984_v25 }
 0x6da   :  { %5318 = vmatpush1.bf16.msra.mxu0 %v6561_v13  ;;  %5349 = vmatpush3.bf16.msra.mxu1 %v6643_v21  ;;  %v1889_v13 = vld [vmem:[#allocation13 + $0x8] sm:$0xff] }
 0x6db   :  { %5320 = vmatprep.subr.bf16.mxu0 %v6565_v22  ;;  %5350 = vmatprep.subr.bf16.mxu1 %v7567_v59  ;;  %v1892_v22 = vld [vmem:[#allocation13 + $0x20] sm:$0xff] }
 0x6dc   :  { %1776 = vmatprep.mubr.f32.mxu0 %v7568_v56  ;;  %4488 = vmatprep.mubr.msk.f32.mxu1 %vm6379_vm0, %v7568_v56 }
 0x6de   :  { %5322 = vmatpush1.bf16.msra.mxu0 %v6567_v26  ;;  %5352 = vmatpush3.bf16.msra.mxu1 %v6650_v27  ;;  %v1890_v26 = vld [vmem:[#allocation13 + $0x10] sm:$0xff] }
 0x6df   :  { %5324 = vmatprep.subr.bf16.mxu0 %v6570_v35  ;;  %5353 = vmatprep.subr.bf16.mxu1 %v7567_v59  ;;  %v5371_v35 = vpack.c.bf16 %v1892_v22, %v1889_v13  ;;  %v5383_v13 = vpack.c.bf16 %v1910_v17, %v1907_v14  ;;  %v5415_v22 = vpack.c.bf16 %v1911_v23, %v1908_v48  ;;  %v2211_v14 = vld [vmem:[#allocation14 + $0x68] sm:$0xff]  ;;  %v2214_v17 = vld [vmem:[#allocation14 + $0x80] sm:$0xff] }
 0x6e0   :  { %v7065_v48 = vpack.c.bf16 %v2214_v17, %v2211_v14  ;;  %v2210_v23 = vld [vmem:[#allocation14 + $0x60] sm:$0xff]  ;;  %v2236_v14 = vld [vmem:[#allocation14 + $0x130] sm:$0xff]  ;;  %v2239_v17 = vld [vmem:[#allocation14 + $0x148] sm:$0xff] }
 0x6e2   :  { %5326 = vmatpush1.bf16.msra.mxu0 %v6573_v39  ;;  %5355 = vmatpush3.bf16.msra.mxu1 %v6655_v31  ;;  %v1893_v39 = vld [vmem:[#allocation13 + $0x28] sm:$0xff] }
 0x6e3   :  { %5328 = vmatprep.subr.bf16.mxu0 %v6576_v44  ;;  %5356 = vmatprep.subr.bf16.mxu1 %v7567_v59  ;;  %v5403_v44 = vpack.c.bf16 %v1893_v39, %v1890_v26  ;;  %v1906_v26 = vld [vmem:[#allocation13 + $0x90] sm:$0xff]  ;;  %v1913_v39 = vld [vmem:[#allocation13 + $0xc8] sm:$0xff] }
 0x6e6   :  { %5330 = vmatpush1.bf16.msra.mxu0 %v6579_v52  ;;  %5358 = vmatpush3.bf16.msra.mxu1 %v6659_v36 }
 0x6e7   :  { %5332 = vmatprep.subr.bf16.mxu0 %v6582_v57  ;;  %5359 = vmatprep.subr.bf16.mxu1 %v7567_v59 }
 0x6ea   :  { %5334 = vmatpush1.bf16.msra.mxu0 %v6585_v1  ;;  %5361 = vmatpush3.bf16.msra.mxu1 %v6663_v40 }
 0x6eb   :  { %5336 = vmatprep.subr.bf16.mxu0 %v6588_v6  ;;  %5362 = vmatprep.subr.bf16.mxu1 %v7567_v59 }
 0x6ee   :  { %5338 = vmatpush1.bf16.msra.mxu0 %v6591_v15  ;;  %5364 = vmatpush3.bf16.msra.mxu1 %v6669_v45 }
 0x6ef   :  { %5340 = vmatprep.subr.bf16.mxu0 %v6594_v20  ;;  %5365 = vmatprep.subr.bf16.mxu1 %v7567_v59 }
 0x6f2   :  { %5342 = vmatpush1.bf16.msra.mxu0 %v6597_v29  ;;  %5367 = vmatpush3.bf16.msra.mxu1 %v6673_v49 }
 0x6f3   :  { %5344 = vmatprep.subr.bf16.mxu0 %v6600_v34  ;;  %5368 = vmatprep.subr.bf16.mxu1 %v7567_v59 }
 0x6f6   :  { %5346 = vmatpush1.bf16.msra.mxu0 %v6603_v41  ;;  %5370 = vmatpush3.bf16.msra.mxu1 %v6677_v53 }
 0x6f7   :  { %5372 = vmatprep.subr.bf16.mxu0 %v5371_v35  ;;  %5404 = vmatprep.subr.bf16.mxu1 %v5403_v44  ;;  %v1909_v35 = vld [vmem:[#allocation13 + $0xa8] sm:$0xff] }
 0x7ac   :  { %v1607_v52 = vpop.f32.mrb[12].mxu0  ;;  %v1678_v57 = vpop.f32.mrb[36].mxu1 }
 0x7ad   :  { %v1682_v1 = vadd.f32 %v1607_v52, %v6732_v51  ;;  %v1609_v6 = vpop.f32.mrb[13].mxu0  ;;  %v4455_v15 = vpop.f32.mrb[37].mxu1  ;;  %v1696_v36 = vadd.f32 %v6760_v24, %v1678_v57  ;;  %v1914_v52 = vld [vmem:[#allocation13 + $0xd0] sm:$0xff]  ;;  %v1917_v57 = vld [vmem:[#allocation13 + $0xe8] sm:$0xff] }
 0x7ae   :  { %v1689_v20 = vadd.f32 %v1609_v6, %v6735_v63  ;;  %v1888_v63 = vld [vmem:[#allocation13] sm:$0xff]  ;;  %v5419_v15 = vpack.c.bf16 %v1917_v57, %v1914_v52  ;;  %v2223_v57 = vld [vmem:[#allocation14 + $0xc8] sm:$0xff] }
 0x7af   :  { %v3801_v29 = vmul.f32 -1.442695, %v1682_v1  ;;  %v5373_v47 = vpack.c.bf16 %v1891_v46, %v1888_v63  ;;  %v5385_v1 = vpack.c.bf16 %v1909_v35, %v1906_v26  ;;  %v1926_v63 = vld [vmem:[#allocation13 + $0x130] sm:$0xff]  ;;  %v1929_v46 = vld [vmem:[#allocation13 + $0x148] sm:$0xff] }
 0x7b0   :  { %v3802_v34 = vmul.f32 -1.442695, %v1689_v20  ;;  %v1912_v20 = vld [vmem:[#allocation13 + $0xc0] sm:$0xff]  ;;  %v5427_v19 = vpack.c.bf16 %v1929_v46, %v1926_v63  ;;  %v2220_v26 = vld [vmem:[#allocation14 + $0xb0] sm:$0xff]  ;;  %v2203_v46 = vld [vmem:[#allocation14 + $0x28] sm:$0xff] }
 0x7b1   :  { %6055 = vpow2.f32 %v3801_v29  ;;  %v1915_v29 = vld [vmem:[#allocation13 + $0xd8] sm:$0xff]  ;;  %v2200_v63 = vld [vmem:[#allocation14 + $0x10] sm:$0xff] }
 0x7b2   :  { %6057 = vpow2.f32 %v3802_v34  ;;  %v1919_v34 = vld [vmem:[#allocation13 + $0xf8] sm:$0xff] }
 0x7bb   :  { %v6056_v41 = vpop.eup %6055 }
 0x7bc   :  { %v1686_v21 = vadd.f32 1.0, %v6056_v41  ;;  %v6058_v27 = vpop.eup %6057  ;;  %v1922_v41 = vld [vmem:[#allocation13 + $0x110] sm:$0xff] }
 0x7bd   :  { %v1693_v31 = vadd.f32 1.0, %v6058_v27  ;;  %v1923_v27 = vld [vmem:[#allocation13 + $0x118] sm:$0xff] }
 0x7be   :  { %6059 = vrcp.f32 %v1686_v21  ;;  %v1920_v21 = vld [vmem:[#allocation13 + $0x100] sm:$0xff] }
 0x7bf   :  { %6061 = vrcp.f32 %v1693_v31  ;;  %v5389_v31 = vpack.c.bf16 %v1915_v29, %v1912_v20  ;;  %v2225_v20 = vld [vmem:[#allocation14 + $0xd8] sm:$0xff] }
 0x7c8   :  { %v6060_v40 = vpop.eup %6059 }
 0x7c9   :  { %v1697_v45 = vmul.f32 %v6060_v40, %v1696_v36  ;;  %v6062_v53 = vpop.eup %6061  ;;  %v5391_v36 = vpack.c.bf16 %v1922_v41, %v1919_v34  ;;  %v5423_v40 = vpack.c.bf16 %v1923_v27, %v1920_v21  ;;  %v2229_v34 = vld [vmem:[#allocation14 + $0xf8] sm:$0xff]  ;;  %v2232_v41 = vld [vmem:[#allocation14 + $0x110] sm:$0xff] }
 0x7ca   :  { %v1700_v51 = vsub.f32 1.0, %v6062_v53  ;;  %v1702_v54 = vmul.f32 %v6062_v53, %v6984_v25  ;;  %v1925_v53 = vld [vmem:[#allocation13 + $0x128] sm:$0xff]  ;;  %v7083_v21 = vpack.c.bf16 %v2232_v41, %v2229_v34  ;;  %v2228_v27 = vld [vmem:[#allocation14 + $0xf0] sm:$0xff] }
 0x7cb   :  { %v1698_v49 = vadd.f32 %v1697_v45, %v6755_v12  ;;  %v1901_v12 = vld [vmem:[#allocation13 + $0x68] sm:$0xff]  ;;  %v1918_v45 = vld [vmem:[#allocation13 + $0xf0] sm:$0xff] }
 0x7cc   :  { %v5379_v9 = vpack.c.bf16 %v1904_v4, %v1901_v12  ;;  %v1933_v4 = vld [vmem:[#allocation13 + $0x168] sm:$0xff] }
 0x7cd   :  { %6063 = vtanh.f32 %v1698_v49  ;;  %v1921_v49 = vld [vmem:[#allocation13 + $0x108] sm:$0xff] }
 0x7d7   :  { %v6064_v62 = vpop.eup %6063 }
 0x7d8   :  { %v1701_v30 = vmul.f32 %v6064_v62, %v1700_v51  ;;  %v1928_v51 = vld [vmem:[#allocation13 + $0x140] sm:$0xff]  ;;  %v5393_v62 = vpack.c.bf16 %v1921_v49, %v1918_v45 }
 0x7d9   :  { %v5395_v38 = vpack.c.bf16 %v1928_v51, %v1925_v53  ;;  %v2238_v45 = vld [vmem:[#allocation14 + $0x140] sm:$0xff]  ;;  %v2237_v51 = vld [vmem:[#allocation14 + $0x138] sm:$0xff] }
 0x7da   :  { %v7026_v24 = vadd.f32 %v1702_v54, %v1701_v30  ;;  %v1924_v30 = vld [vmem:[#allocation13 + $0x120] sm:$0xff]  ;;  %v1927_v54 = vld [vmem:[#allocation13 + $0x138] sm:$0xff] }
 0x7db   :  { %v5397_v58 = vpack.c.bf16 %v1927_v54, %v1924_v30  ;;  %v2234_v49 = vld [vmem:[#allocation14 + $0x120] sm:$0xff]  ;;  %v2244_v30 = vld [vmem:[#allocation14 + $0x170] sm:$0xff] }
 0x7dc   :  { %1777 = vmatmul.mubr.f32.vlgmr.msra.gmra.mrb[14].mxu0 %v7026_v24  ;;  %4489 = vmatmul.mubr.f32.vlgmr.msra.gmra.mrb[38].mxu1 %v7026_v24 }
 0x7dd   :  { %5374 = vmatpush1.bf16.msra.mxu0 %v5373_v47  ;;  %5406 = vmatpush3.bf16.msra.mxu1 %v5403_v44  ;;  %v1916_v44 = vld [vmem:[#allocation13 + $0xe0] sm:$0xff] }
 0x7de   :  { %4523 = vmatprep.mubr.f32.mxu1 %v6764_v55  ;;  %5376 = vmatprep.subr.bf16.mxu0 %v5375_v50  ;;  %v5387_v6 = vpack.c.bf16 %v1916_v44, %v1913_v39  ;;  %v1932_v47 = vld [vmem:[#allocation13 + $0x160] sm:$0xff]  ;;  %v1935_v50 = vld [vmem:[#allocation13 + $0x178] sm:$0xff]  ;;  %v2216_v39 = vld [vmem:[#allocation14 + $0x90] sm:$0xff] }
 0x7df   :  { %5408 = vmatprep.subr.bf16.mxu1 %v5407_v2  ;;  %2017 = vmatprep.mubr.f32.mxu0 %v7568_v56  ;;  %v5431_v12 = vpack.c.bf16 %v1935_v50, %v1932_v47  ;;  %v2219_v44 = vld [vmem:[#allocation14 + $0xa8] sm:$0xff]  ;;  %v7102_v47 = vpack.c.bf16 %v2243_v32, %v2240_v37  ;;  %v2206_v50 = vld [vmem:[#allocation14 + $0x40] sm:$0xff] }
 0x7e0   :  { %v7073_v52 = vpack.c.bf16 %v2219_v44, %v2216_v39 }
 0x7e1   :  { %5378 = vmatpush1.bf16.msra.mxu0 %v5377_v11  ;;  %5410 = vmatpush3.bf16.msra.mxu1 %v5407_v2  ;;  %v1930_v2 = vld [vmem:[#allocation13 + $0x150] sm:$0xff] }
 0x7e2   :  { %5380 = vmatprep.subr.bf16.mxu0 %v5379_v9  ;;  %5412 = vmatprep.subr.bf16.mxu1 %v5411_v0  ;;  %v5401_v7 = vpack.c.bf16 %v1933_v4, %v1930_v2  ;;  %v2215_v2 = vld [vmem:[#allocation14 + $0x88] sm:$0xff]  ;;  %v2218_v4 = vld [vmem:[#allocation14 + $0xa0] sm:$0xff] }
 0x7e5   :  { %5382 = vmatpush1.bf16.msra.mxu0 %v5381_v33  ;;  %5414 = vmatpush3.bf16.msra.mxu1 %v5411_v0  ;;  %v2204_v0 = vld [vmem:[#allocation14 + $0x30] sm:$0xff]  ;;  %v2213_v33 = vld [vmem:[#allocation14 + $0x78] sm:$0xff] }
 0x7e6   :  { %5384 = vmatprep.subr.bf16.mxu0 %v5383_v13  ;;  %5416 = vmatprep.subr.bf16.mxu1 %v5415_v22  ;;  %v7061_v43 = vpack.c.bf16 %v2207_v5, %v2204_v0  ;;  %v7067_v13 = vpack.c.bf16 %v2213_v33, %v2210_v23  ;;  %v2233_v0 = vld [vmem:[#allocation14 + $0x118] sm:$0xff]  ;;  %v7125_v23 = vpack.c.bf16 %v2239_v17, %v2236_v14  ;;  %v2242_v33 = vld [vmem:[#allocation14 + $0x160] sm:$0xff] }
 0x7e9   :  { %5386 = vmatpush1.bf16.msra.mxu0 %v5385_v1  ;;  %5418 = vmatpush3.bf16.msra.mxu1 %v5415_v22  ;;  %v2217_v22 = vld [vmem:[#allocation14 + $0x98] sm:$0xff]  ;;  %v2226_v1 = vld [vmem:[#allocation14 + $0xe0] sm:$0xff] }
 0x7ea   :  { %5388 = vmatprep.subr.bf16.mxu0 %v5387_v6  ;;  %5420 = vmatprep.subr.bf16.mxu1 %v5419_v15  ;;  %v7071_v35 = vpack.c.bf16 %v2220_v26, %v2217_v22  ;;  %v7077_v6 = vpack.c.bf16 %v2226_v1, %v2223_v57  ;;  %v2245_v22 = vld [vmem:[#allocation14 + $0x178] sm:$0xff] }
 0x7eb   :  { %v7129_v26 = vpack.c.bf16 %v2245_v22, %v2242_v33 }
 0x7ed   :  { %5390 = vmatpush1.bf16.msra.mxu0 %v5389_v31  ;;  %5422 = vmatpush3.bf16.msra.mxu1 %v5419_v15  ;;  %v2222_v15 = vld [vmem:[#allocation14 + $0xc0] sm:$0xff]  ;;  %v2231_v31 = vld [vmem:[#allocation14 + $0x108] sm:$0xff] }
 0x7ee   :  { %5392 = vmatprep.subr.bf16.mxu0 %v5391_v36  ;;  %5424 = vmatprep.subr.bf16.mxu1 %v5423_v40  ;;  %v7079_v29 = vpack.c.bf16 %v2225_v20, %v2222_v15  ;;  %v7085_v36 = vpack.c.bf16 %v2231_v31, %v2228_v27 }
 0x7f1   :  { %5394 = vmatpush1.bf16.msra.mxu0 %v5393_v62  ;;  %5426 = vmatpush3.bf16.msra.mxu1 %v5423_v40  ;;  %v2235_v40 = vld [vmem:[#allocation14 + $0x128] sm:$0xff]  ;;  %v7091_v62 = vpack.c.bf16 %v2237_v51, %v2234_v49  ;;  %v6155_v49 = vld [vmem:[%s7548_s5] ss:$0 sm:$0xff] }
 0x7f2   :  { %5396 = vmatprep.subr.bf16.mxu0 %v5395_v38  ;;  %5428 = vmatprep.subr.bf16.mxu1 %v5427_v19  ;;  %v7089_v53 = vpack.c.bf16 %v2238_v45, %v2235_v40  ;;  %v7093_v38 = vpack.c.bf16 %v2203_v46, %v2200_v63 }
 0x7f5   :  { %5398 = vmatpush1.bf16.msra.mxu0 %v5397_v58  ;;  %5430 = vmatpush3.bf16.msra.mxu1 %v5427_v19  ;;  %v2241_v19 = vld [vmem:[#allocation14 + $0x158] sm:$0xff] }
 0x7f6   :  { %5400 = vmatprep.subr.bf16.mxu0 %v5399_v8  ;;  %5432 = vmatprep.subr.bf16.mxu1 %v5431_v12  ;;  %v7096_v54 = vpack.c.bf16 %v2244_v30, %v2241_v19  ;;  %v2209_v58 = vld [vmem:[#allocation14 + $0x58] sm:$0xff] }
 0x7f7   :  { %v7104_v8 = vpack.c.bf16 %v2209_v58, %v2206_v50 }
 0x7f9   :  { %5402 = vmatpush1.bf16.msra.mxu0 %v5401_v7  ;;  %5434 = vmatpush3.bf16.msra.mxu1 %v5431_v12  ;;  %v2212_v12 = vld [vmem:[#allocation14 + $0x70] sm:$0xff] }
 0x7fa   :  { %5467 = vmatprep.subr.bf16.mxu1 %v7567_v59  ;;  %v7110_v7 = vpack.c.bf16 %v2215_v2, %v2212_v12 }
 0x7fc   :  { %2018 = vmatmul.mubr.f32.vlgmr.msra.gmra.mrb[16].mxu0 %v6764_v55  ;;  %4524 = vmatmul.mubr.f32.vlgmr.msra.gmra.mrb[40].mxu1 %v6808_v18  ;;  %v2199_v55 = vld [vmem:[#allocation14 + $0x8] sm:$0xff] }
 0x7fd   :  { %4526 = vmatprep.mubr.f32.mxu1 %v6852_v60  ;;  %2023 = vmatprep.mubr.f32.mxu0 %v7568_v56 }
 0x7fe   :  { %5469 = vmatpush3.bf16.msra.mxu1 %v7093_v38 }
 0x7ff   :  { %5470 = vmatprep.subr.bf16.mxu1 %v7567_v59 }
 0x800   :  { %2024 = vmatmul.mubr.f32.gmra.mrb[18].mxu0 %v6808_v18  ;;  %4527 = vmatmul.mubr.f32.gmra.mrb[42].mxu1 %v6896_v42  ;;  %v2202_v18 = vld [vmem:[#allocation14 + $0x20] sm:$0xff] }
 0x801   :  { %4529 = vmatprep.mubr.f32.mxu1 %v6940_v16  ;;  %2029 = vmatprep.mubr.f32.mxu0 %v7568_v56 }
 0x802   :  { %5472 = vmatpush3.bf16.msra.mxu1 %v7104_v8 }
 0x803   :  { %5473 = vmatprep.subr.bf16.mxu1 %v7567_v59 }
 0x804   :  { %2030 = vmatmul.mubr.f32.gmra.mrb[20].mxu0 %v6852_v60  ;;  %4530 = vmatmul.mubr.f32.gmra.mrb[44].mxu1 %v6984_v25  ;;  %v7053_v60 = vpack.c.bf16 %v2202_v18, %v2199_v55  ;;  %v2221_v55 = vld [vmem:[#allocation14 + $0xb8] sm:$0xff] }
 0x805   :  { %4532 = vmatprep.mubr.f32.mxu1 %v7026_v24  ;;  %2035 = vmatprep.mubr.f32.mxu0 %v7568_v56  ;;  %v7113_v18 = vpack.c.bf16 %v2221_v55, %v2218_v4 }
 0x806   :  { %5436 = vmatprep.subr.bf16.mxu0 %v7053_v60  ;;  %5475 = vmatpush3.bf16.msra.mxu1 %v7110_v7 }
 0x807   :  { %5476 = vmatprep.subr.bf16.mxu1 %v7567_v59 }
 0x808   :  { %2036 = vmatmul.mubr.f32.gmra.mrb[22].mxu0 %v6896_v42  ;;  %v2201_v42 = vld [vmem:[#allocation14 + $0x18] sm:$0xff] }
 0x809   :  { %2041 = vmatprep.mubr.f32.mxu0 %v7568_v56  ;;  %v7055_v11 = vpack.c.bf16 %v2201_v42, %v2198_v28  ;;  %v2224_v28 = vld [vmem:[#allocation14 + $0xd0] sm:$0xff]  ;;  %v2227_v42 = vld [vmem:[#allocation14 + $0xe8] sm:$0xff] }
 0x80a   :  { %5478 = vmatpush3.bf16.msra.mxu1 %v7113_v18 }
 0x80b   :  { %5438 = vmatpush1.bf16.msra.mxu0 %v7055_v11  ;;  %5479 = vmatprep.subr.bf16.mxu1 %v7567_v59 }
 0x80c   :  { %2042 = vmatmul.mubr.f32.gmra.mrb[24].mxu0 %v6940_v16  ;;  %v2205_v16 = vld [vmem:[#allocation14 + $0x38] sm:$0xff] }
 0x80d   :  { %2047 = vmatprep.mubr.f32.mxu0 %v7568_v56 }
 0x810   :  { %2048 = vmatmul.mubr.f32.gmra.mrb[26].mxu0 %v6984_v25  ;;  %v2208_v25 = vld [vmem:[#allocation14 + $0x50] sm:$0xff] }
 0x811   :  { %2053 = vmatprep.mubr.f32.mxu0 %v7568_v56  ;;  %v7059_v9 = vpack.c.bf16 %v2208_v25, %v2205_v16  ;;  %v7117_v16 = vpack.c.bf16 %v2227_v42, %v2224_v28  ;;  %v2230_v25 = vld [vmem:[#allocation14 + $0x100] sm:$0xff]  ;;  %v7154_v28 = vld [vmem:[#allocation8 + $0x8] sm:$0xff] }
 0x812   :  { %v7121_v5 = vpack.c.bf16 %v2233_v0, %v2230_v25  ;;  %v7569_v0 = vld [vmem:[#allocation26_spill] sm:$0xff] }
 0x813   :  { %5440 = vmatprep.subr.bf16.mxu0 %v7059_v9  ;;  %5481 = vmatpush3.bf16.msra.mxu1 %v7117_v16  ;;  %v7570_v14 = vsub.s32 0, %v7569_v0  ;;  %v7571_v22 = vsub.s32 1, %v7569_v0 }
 0x814   :  { %2054 = vmatmul.mubr.f32.gmra.mrb[28].mxu0 %v7026_v24  ;;  %5482 = vmatprep.subr.bf16.mxu1 %v7567_v59 }
 0x815   :  { %2059 = vmatprep.mubr.f32.mxu0 %v7568_v56  ;;  %5442 = vmatpush1.bf16.msra.mxu0 %v7061_v43 }
 0x816   :  { %5444 = vmatprep.subr.bf16.mxu0 %v7065_v48 }
 0x817   :  { %5484 = vmatpush3.bf16.msra.mxu1 %v7121_v5 }
 0x818   :  { %5485 = vmatprep.subr.bf16.mxu1 %v7567_v59 }
 0x819   :  { %5446 = vmatpush1.bf16.msra.mxu0 %v7067_v13 }
 0x81a   :  { %5448 = vmatprep.subr.bf16.mxu0 %v7071_v35 }
 0x81b   :  { %5487 = vmatpush3.bf16.msra.mxu1 %v7125_v23 }
 0x81c   :  { %5488 = vmatprep.subr.bf16.mxu1 %v7567_v59 }
 0x81d   :  { %5450 = vmatpush1.bf16.msra.mxu0 %v7073_v52 }
 0x81e   :  { %5452 = vmatprep.subr.bf16.mxu0 %v7077_v6 }
 0x81f   :  { %5490 = vmatpush3.bf16.msra.mxu1 %v7129_v26 }
 0x820   :  { %5523 = vmatprep.subr.bf16.mxu1 %v7567_v59 }
 0x821   :  { %5454 = vmatpush1.bf16.msra.mxu0 %v7079_v29 }
 0x822   :  { %5456 = vmatprep.subr.bf16.mxu0 %v7083_v21 }
 0x825   :  { %5458 = vmatpush1.bf16.msra.mxu0 %v7085_v36 }
 0x826   :  { %5460 = vmatprep.subr.bf16.mxu0 %v7089_v53 }
 0x829   :  { %5462 = vmatpush1.bf16.msra.mxu0 %v7091_v62 }
 0x82a   :  { %5464 = vmatprep.subr.bf16.mxu0 %v7096_v54 }
 0x82d   :  { %5466 = vmatpush1.bf16.msra.mxu0 %v7102_v47 }
 0x82e   :  { %5492 = vmatprep.subr.bf16.mxu0 %v7053_v60 }
 0x8af   :  { %v1778_v39 = vpop.f32.mrb[14].mxu0  ;;  %v1849_v44 = vpop.f32.mrb[38].mxu1 }
 0x8b0   :  { %v1853_v57 = vadd.f32 %v1778_v39, %v6737_v3  ;;  %v1780_v1 = vpop.f32.mrb[15].mxu0  ;;  %v4490_v15 = vpop.f32.mrb[39].mxu1  ;;  %v1867_v51 = vadd.f32 %v6155_v49, %v1849_v44  ;;  %v7572_v49 = vsub.s32 2, %v7569_v0 }
 0x8b1   :  { %v1860_v20 = vadd.f32 %v1780_v1, %v6741_v10 }
 0x8b2   :  { %v3803_v34 = vmul.f32 -1.442695, %v1853_v57 }
 0x8b3   :  { %v3804_v41 = vmul.f32 -1.442695, %v1860_v20 }
 0x8b4   :  { %6065 = vpow2.f32 %v3803_v34 }
 0x8b5   :  { %6067 = vpow2.f32 %v3804_v41 }
 0x8be   :  { %v6066_v27 = vpop.eup %6065 }
 0x8bf   :  { %v1857_v31 = vadd.f32 1.0, %v6066_v27  ;;  %v6068_v40 = vpop.eup %6067 }
 0x8c0   :  { %v1864_v45 = vadd.f32 1.0, %v6068_v40 }
 0x8c1   :  { %6069 = vrcp.f32 %v1857_v31 }
 0x8c2   :  { %6071 = vrcp.f32 %v1864_v45  ;;  %v7215_v45 = vld [vmem:[%s7552_s9] ss:$0 sm:$0xff] }
 0x8cb   :  { %v6070_v63 = vpop.eup %6069 }
 0x8cc   :  { %v1868_v3 = vmul.f32 %v6070_v63, %v1867_v51  ;;  %v6072_v32 = vpop.eup %6071 }
 0x8cd   :  { %v1871_v12 = vsub.f32 1.0, %v6072_v32  ;;  %v1873_v55 = vmul.f32 %v6072_v32, %v7026_v24  ;;  %v1936_v24 = vld [vmem:[%s7551_s8] sm:$0x7] }
 0x8ce   :  { %v1869_v46 = vadd.f32 %v1868_v3, %v6753_v61  ;;  %v7204_v17 = vrot.slane %v1936_v24, %v7570_v14  ;;  %v7208_v39 = vrot.slane %v1936_v24, %v7571_v22  ;;  %v7219_v51 = vrot.slane %v1936_v24, %v7572_v49 }
 0x8cf   :  { %v7140_v10 = vpop.f32.mrb[40].mxu1 }
 0x8d0   :  { %6073 = vtanh.f32 %v1869_v46  ;;  %v7142_v19 = vpop.f32.mrb[41].mxu1  ;;  %v2138_v49 = vadd.f32 %v7140_v10, %v7219_v51 }
 0x8d1   :  { %v2133_v32 = vadd.f32 %v7142_v19, %v7219_v51 }
 0x8d3   :  { %v7144_v30 = vpop.f32.mrb[42].mxu1 }
 0x8d4   :  { %v7146_v37 = vpop.f32.mrb[43].mxu1 }
 0x8d7   :  { %v7148_v50 = vpop.f32.mrb[44].mxu1 }
 0x8d8   :  { %v7150_v58 = vpop.f32.mrb[45].mxu1 }
 0x8da   :  { %v6074_v2 = vpop.eup %6073 }
 0x8db   :  { %v1872_v4 = vmul.f32 %v6074_v2, %v1871_v12 }
 0x8dd   :  { %v1874_v61 = vadd.f32 %v1873_v55, %v1872_v4 }
 0x8df   :  { %2060 = vmatmul.mubr.f32.gmra.mrb[30].mxu0 %v1874_v61  ;;  %1879 = vst [vmem:[#allocation18] sm:$0xff] %v1874_v61  ;;  %4533 = vmatmul.mubr.f32.gmra.mrb[46].mxu1 %v1874_v61 }
 0x8e0   :  { %2315 = vmatprep.mubr.f32.mxu0 %v7568_v56  ;;  %4567 = vmatprep.mubr.msk.f32.mxu1 %vm6379_vm0, %v7568_v56 }
 0x8e3   :  { %2316 = vmatmul.mubr.f32.vlgmr.msra.gmra.mrb[16].mxu0 %v7154_v28  ;;  %4568 = vmatmul.mubr.f32.vlgmr.msra.gmra.mrb[48].mxu1 %v7154_v28 }
 0x8e4   :  { %5494 = vmatpush1.bf16.msra.mxu0 %v7055_v11  ;;  %5525 = vmatpush3.bf16.msra.mxu1 %v7093_v38 }
 0x8e5   :  { %5496 = vmatprep.subr.bf16.mxu0 %v7059_v9  ;;  %5526 = vmatprep.subr.bf16.mxu1 %v7567_v59 }
 0x8e6   :  { %2490 = vmatprep.mubr.f32.mxu0 %v7568_v56  ;;  %4602 = vmatprep.mubr.msk.f32.mxu1 %vm6379_vm0, %v7568_v56 }
 0x8e8   :  { %5498 = vmatpush1.bf16.msra.mxu0 %v7061_v43  ;;  %5528 = vmatpush3.bf16.msra.mxu1 %v7104_v8 }
 0x8e9   :  { %5500 = vmatprep.subr.bf16.mxu0 %v7065_v48  ;;  %5529 = vmatprep.subr.bf16.mxu1 %v7567_v59 }
 0x8ec   :  { %5502 = vmatpush1.bf16.msra.mxu0 %v7067_v13  ;;  %5531 = vmatpush3.bf16.msra.mxu1 %v7110_v7 }
 0x8ed   :  { %5504 = vmatprep.subr.bf16.mxu0 %v7071_v35  ;;  %5532 = vmatprep.subr.bf16.mxu1 %v7567_v59 }
 0x8f0   :  { %5506 = vmatpush1.bf16.msra.mxu0 %v7073_v52  ;;  %5534 = vmatpush3.bf16.msra.mxu1 %v7113_v18 }
 0x8f1   :  { %5508 = vmatprep.subr.bf16.mxu0 %v7077_v6  ;;  %5535 = vmatprep.subr.bf16.mxu1 %v7567_v59 }
 0x8f4   :  { %5510 = vmatpush1.bf16.msra.mxu0 %v7079_v29  ;;  %5537 = vmatpush3.bf16.msra.mxu1 %v7117_v16 }
 0x8f5   :  { %5512 = vmatprep.subr.bf16.mxu0 %v7083_v21  ;;  %5538 = vmatprep.subr.bf16.mxu1 %v7567_v59 }
 0x8f8   :  { %5514 = vmatpush1.bf16.msra.mxu0 %v7085_v36  ;;  %5540 = vmatpush3.bf16.msra.mxu1 %v7121_v5 }
 0x8f9   :  { %5516 = vmatprep.subr.bf16.mxu0 %v7089_v53  ;;  %5541 = vmatprep.subr.bf16.mxu1 %v7567_v59 }
 0x8fc   :  { %5518 = vmatpush1.bf16.msra.mxu0 %v7091_v62  ;;  %5543 = vmatpush3.bf16.msra.mxu1 %v7125_v23 }
 0x8fd   :  { %5520 = vmatprep.subr.bf16.mxu0 %v7096_v54  ;;  %5544 = vmatprep.subr.bf16.mxu1 %v7567_v59 }
 0x900   :  { %5522 = vmatpush1.bf16.msra.mxu0 %v7102_v47  ;;  %5546 = vmatpush3.bf16.msra.mxu1 %v7129_v26 }
 0x901   :  { %5548 = vmatprep.subr.bf16.mxu0 %v7053_v60  ;;  %5579 = vmatprep.subr.bf16.mxu1 %v7567_v59 }
 0x9b2   :  { %v7198_v42 = vpop.f32.mrb[46].mxu1 }
 0x9b3   :  { %v7200_v25 = vpop.f32.mrb[47].mxu1 }
 0x9b6   :  { %v2317_v33 = vpop.f32.mrb[16].mxu0  ;;  %v2388_v44 = vpop.f32.mrb[48].mxu1 }
 0x9b7   :  { %v5947_v57 = vadd.f32 %v2317_v33, %v7204_v17  ;;  %v2319_v1 = vpop.f32.mrb[17].mxu0  ;;  %v4569_v15 = vpop.f32.mrb[49].mxu1  ;;  %v2412_v3 = vadd.f32 %v7215_v45, %v2388_v44 }
 0x9b8   :  { %v5948_v34 = vadd.f32 %v2319_v1, %v7208_v39 }
 0x9b9   :  { %v3805_v20 = vmul.f32 -1.442695, %v5947_v57 }
 0x9ba   :  { %v3806_v41 = vmul.f32 -1.442695, %v5948_v34 }
 0x9bb   :  { %6075 = vpow2.f32 %v3805_v20 }
 0x9bc   :  { %6077 = vpow2.f32 %v3806_v41 }
 0x9c5   :  { %v6076_v27 = vpop.eup %6075 }
 0x9c6   :  { %v2396_v31 = vadd.f32 1.0, %v6076_v27  ;;  %v6078_v40 = vpop.eup %6077 }
 0x9c7   :  { %v2403_v63 = vadd.f32 1.0, %v6078_v40 }
 0x9c8   :  { %6079 = vrcp.f32 %v2396_v31 }
 0x9c9   :  { %6081 = vrcp.f32 %v2403_v63 }
 0x9d2   :  { %v6080_v46 = vpop.eup %6079 }
 0x9d3   :  { %v2413_v12 = vmul.f32 %v6080_v46, %v2412_v3  ;;  %v6082_v4 = vpop.eup %6081 }
 0x9d4   :  { %v2416_v55 = vsub.f32 1.0, %v6082_v4  ;;  %v2418_v33 = vmul.f32 %v6082_v4, %v7154_v28 }
 0x9d5   :  { %v2414_v2 = vadd.f32 %v2413_v12, %v2133_v32 }
 0x9d7   :  { %6083 = vtanh.f32 %v2414_v2 }
 0x9e1   :  { %v6084_v61 = vpop.eup %6083 }
 0x9e2   :  { %v2417_v14 = vmul.f32 %v6084_v61, %v2416_v55 }
 0x9e4   :  { %v7225_v0 = vadd.f32 %v2418_v33, %v2417_v14 }
 0x9e6   :  { %2491 = vmatmul.mubr.f32.vlgmr.msra.gmra.mrb[18].mxu0 %v7225_v0  ;;  %4603 = vmatmul.mubr.f32.vlgmr.msra.gmra.mrb[50].mxu1 %v7225_v0 }
 0x9e7   :  { %5550 = vmatpush1.bf16.msra.mxu0 %v7055_v11  ;;  %5581 = vmatpush3.bf16.msra.mxu1 %v7093_v38 }
 0x9e8   :  { %5552 = vmatprep.subr.bf16.mxu0 %v7059_v9  ;;  %5582 = vmatprep.subr.bf16.mxu1 %v7567_v59 }
 0x9e9   :  { %2659 = vmatprep.mubr.f32.mxu0 %v7568_v56  ;;  %4637 = vmatprep.mubr.msk.f32.mxu1 %vm6379_vm0, %v7568_v56 }
 0x9eb   :  { %5554 = vmatpush1.bf16.msra.mxu0 %v7061_v43  ;;  %5584 = vmatpush3.bf16.msra.mxu1 %v7104_v8 }
 0x9ec   :  { %5556 = vmatprep.subr.bf16.mxu0 %v7065_v48  ;;  %5585 = vmatprep.subr.bf16.mxu1 %v7567_v59 }
 0x9ef   :  { %5558 = vmatpush1.bf16.msra.mxu0 %v7067_v13  ;;  %5587 = vmatpush3.bf16.msra.mxu1 %v7110_v7 }
 0x9f0   :  { %5560 = vmatprep.subr.bf16.mxu0 %v7071_v35  ;;  %5588 = vmatprep.subr.bf16.mxu1 %v7567_v59 }
 0x9f3   :  { %5562 = vmatpush1.bf16.msra.mxu0 %v7073_v52  ;;  %5590 = vmatpush3.bf16.msra.mxu1 %v7113_v18 }
 0x9f4   :  { %5564 = vmatprep.subr.bf16.mxu0 %v7077_v6  ;;  %5591 = vmatprep.subr.bf16.mxu1 %v7567_v59 }
 0x9f7   :  { %5566 = vmatpush1.bf16.msra.mxu0 %v7079_v29  ;;  %5593 = vmatpush3.bf16.msra.mxu1 %v7117_v16 }
 0x9f8   :  { %5568 = vmatprep.subr.bf16.mxu0 %v7083_v21  ;;  %5594 = vmatprep.subr.bf16.mxu1 %v7567_v59 }
 0x9fb   :  { %5570 = vmatpush1.bf16.msra.mxu0 %v7085_v36  ;;  %5596 = vmatpush3.bf16.msra.mxu1 %v7121_v5 }
 0x9fc   :  { %5572 = vmatprep.subr.bf16.mxu0 %v7089_v53  ;;  %5597 = vmatprep.subr.bf16.mxu1 %v7567_v59 }
 0x9ff   :  { %5574 = vmatpush1.bf16.msra.mxu0 %v7091_v62  ;;  %5599 = vmatpush3.bf16.msra.mxu1 %v7125_v23 }
 0xa00   :  { %5576 = vmatprep.subr.bf16.mxu0 %v7096_v54  ;;  %5600 = vmatprep.subr.bf16.mxu1 %v7567_v59 }
 0xa03   :  { %5578 = vmatpush1.bf16.msra.mxu0 %v7102_v47  ;;  %5602 = vmatpush3.bf16.msra.mxu1 %v7129_v26 }
 0xa04   :  { %5604 = vmatprep.subr.bf16.mxu0 %v7053_v60  ;;  %5635 = vmatprep.subr.bf16.mxu1 %v7567_v59 }
 0xab9   :  { %v2492_v19 = vpop.f32.mrb[18].mxu0  ;;  %v2563_v28 = vpop.f32.mrb[50].mxu1 }
 0xaba   :  { %v5949_v24 = vadd.f32 %v2492_v19, %v7204_v17  ;;  %v2494_v22 = vpop.f32.mrb[19].mxu0  ;;  %v4604_v44 = vpop.f32.mrb[51].mxu1  ;;  %v2581_v31 = vadd.f32 %v7215_v45, %v2563_v28 }
 0xabb   :  { %v5950_v1 = vadd.f32 %v2494_v22, %v7208_v39 }
 0xabc   :  { %v3808_v57 = vmul.f32 -1.442695, %v5949_v24 }
 0xabd   :  { %v3809_v15 = vmul.f32 -1.442695, %v5950_v1 }
 0xabe   :  { %6085 = vpow2.f32 %v3808_v57 }
 0xabf   :  { %6087 = vpow2.f32 %v3809_v15 }
 0xac8   :  { %v6086_v20 = vpop.eup %6085 }
 0xac9   :  { %v2571_v34 = vadd.f32 1.0, %v6086_v20  ;;  %v6088_v41 = vpop.eup %6087 }
 0xaca   :  { %v2578_v27 = vadd.f32 1.0, %v6088_v41  ;;  %v2143_v41 = vadd.f32 %v7146_v37, %v7219_v51 }
 0xacb   :  { %6089 = vrcp.f32 %v2571_v34 }
 0xacc   :  { %6091 = vrcp.f32 %v2578_v27 }
 0xad5   :  { %v6090_v40 = vpop.eup %6089 }
 0xad6   :  { %v2582_v63 = vmul.f32 %v6090_v40, %v2581_v31  ;;  %v6092_v46 = vpop.eup %6091 }
 0xad7   :  { %v2585_v32 = vsub.f32 1.0, %v6092_v46  ;;  %v2587_v4 = vmul.f32 %v6092_v46, %v7225_v0 }
 0xad8   :  { %v2583_v3 = vadd.f32 %v2582_v63, %v2138_v49 }
 0xada   :  { %6093 = vtanh.f32 %v2583_v3 }
 0xae4   :  { %v6094_v12 = vpop.eup %6093 }
 0xae5   :  { %v2586_v2 = vmul.f32 %v6094_v12, %v2585_v32 }
 0xae7   :  { %v7270_v55 = vadd.f32 %v2587_v4, %v2586_v2 }
 0xae9   :  { %2660 = vmatmul.mubr.f32.vlgmr.msra.gmra.mrb[20].mxu0 %v7270_v55  ;;  %4638 = vmatmul.mubr.f32.vlgmr.msra.gmra.mrb[52].mxu1 %v7270_v55 }
 0xaea   :  { %5606 = vmatpush1.bf16.msra.mxu0 %v7055_v11  ;;  %5637 = vmatpush3.bf16.msra.mxu1 %v7093_v38 }
 0xaeb   :  { %5608 = vmatprep.subr.bf16.mxu0 %v7059_v9  ;;  %5638 = vmatprep.subr.bf16.mxu1 %v7567_v59 }
 0xaec   :  { %2828 = vmatprep.mubr.f32.mxu0 %v7568_v56  ;;  %4672 = vmatprep.mubr.msk.f32.mxu1 %vm6379_vm0, %v7568_v56 }
 0xaee   :  { %5610 = vmatpush1.bf16.msra.mxu0 %v7061_v43  ;;  %5640 = vmatpush3.bf16.msra.mxu1 %v7104_v8 }
 0xaef   :  { %5612 = vmatprep.subr.bf16.mxu0 %v7065_v48  ;;  %5641 = vmatprep.subr.bf16.mxu1 %v7567_v59 }
 0xaf2   :  { %5614 = vmatpush1.bf16.msra.mxu0 %v7067_v13  ;;  %5643 = vmatpush3.bf16.msra.mxu1 %v7110_v7 }
 0xaf3   :  { %5616 = vmatprep.subr.bf16.mxu0 %v7071_v35  ;;  %5644 = vmatprep.subr.bf16.mxu1 %v7567_v59 }
 0xaf6   :  { %5618 = vmatpush1.bf16.msra.mxu0 %v7073_v52  ;;  %5646 = vmatpush3.bf16.msra.mxu1 %v7113_v18 }
 0xaf7   :  { %5620 = vmatprep.subr.bf16.mxu0 %v7077_v6  ;;  %5647 = vmatprep.subr.bf16.mxu1 %v7567_v59 }
 0xafa   :  { %5622 = vmatpush1.bf16.msra.mxu0 %v7079_v29  ;;  %5649 = vmatpush3.bf16.msra.mxu1 %v7117_v16 }
 0xafb   :  { %5624 = vmatprep.subr.bf16.mxu0 %v7083_v21  ;;  %5650 = vmatprep.subr.bf16.mxu1 %v7567_v59 }
 0xafe   :  { %5626 = vmatpush1.bf16.msra.mxu0 %v7085_v36  ;;  %5652 = vmatpush3.bf16.msra.mxu1 %v7121_v5 }
 0xaff   :  { %5628 = vmatprep.subr.bf16.mxu0 %v7089_v53  ;;  %5653 = vmatprep.subr.bf16.mxu1 %v7567_v59 }
 0xb02   :  { %5630 = vmatpush1.bf16.msra.mxu0 %v7091_v62  ;;  %5655 = vmatpush3.bf16.msra.mxu1 %v7125_v23 }
 0xb03   :  { %5632 = vmatprep.subr.bf16.mxu0 %v7096_v54  ;;  %5656 = vmatprep.subr.bf16.mxu1 %v7567_v59 }
 0xb06   :  { %5634 = vmatpush1.bf16.msra.mxu0 %v7102_v47  ;;  %5658 = vmatpush3.bf16.msra.mxu1 %v7129_v26 }
 0xb07   :  { %5660 = vmatprep.subr.bf16.mxu0 %v7053_v60  ;;  %5691 = vmatprep.subr.bf16.mxu1 %v7567_v59 }
 0xbbc   :  { %v2661_v10 = vpop.f32.mrb[20].mxu0  ;;  %v2732_v61 = vpop.f32.mrb[52].mxu1 }
 0xbbd   :  { %v5951_v14 = vadd.f32 %v2661_v10, %v7204_v17  ;;  %v2663_v33 = vpop.f32.mrb[21].mxu0  ;;  %v4639_v19 = vpop.f32.mrb[53].mxu1  ;;  %v2750_v20 = vadd.f32 %v7215_v45, %v2732_v61 }
 0xbbe   :  { %v5952_v24 = vadd.f32 %v2663_v33, %v7208_v39 }
 0xbbf   :  { %v3810_v28 = vmul.f32 -1.442695, %v5951_v14 }
 0xbc0   :  { %v3811_v22 = vmul.f32 -1.442695, %v5952_v24 }
 0xbc1   :  { %6095 = vpow2.f32 %v3810_v28 }
 0xbc2   :  { %6097 = vpow2.f32 %v3811_v22 }
 0xbcb   :  { %v6096_v44 = vpop.eup %6095 }
 0xbcc   :  { %v2740_v57 = vadd.f32 1.0, %v6096_v44  ;;  %v6098_v1 = vpop.eup %6097 }
 0xbcd   :  { %v2747_v15 = vadd.f32 1.0, %v6098_v1  ;;  %v2148_v1 = vadd.f32 %v7144_v30, %v7219_v51 }
 0xbce   :  { %6099 = vrcp.f32 %v2740_v57 }
 0xbcf   :  { %6101 = vrcp.f32 %v2747_v15 }
 0xbd8   :  { %v6100_v34 = vpop.eup %6099 }
 0xbd9   :  { %v2751_v27 = vmul.f32 %v6100_v34, %v2750_v20  ;;  %v6102_v40 = vpop.eup %6101 }
 0xbda   :  { %v2754_v49 = vsub.f32 1.0, %v6102_v40  ;;  %v2756_v46 = vmul.f32 %v6102_v40, %v7270_v55 }
 0xbdb   :  { %v2752_v31 = vadd.f32 %v2751_v27, %v2143_v41 }
 0xbdd   :  { %6103 = vtanh.f32 %v2752_v31 }
 0xbe7   :  { %v6104_v63 = vpop.eup %6103 }
 0xbe8   :  { %v2755_v3 = vmul.f32 %v6104_v63, %v2754_v49 }
 0xbea   :  { %v7315_v32 = vadd.f32 %v2756_v46, %v2755_v3 }
 0xbec   :  { %2829 = vmatmul.mubr.f32.vlgmr.msra.gmra.mrb[22].mxu0 %v7315_v32  ;;  %4673 = vmatmul.mubr.f32.vlgmr.msra.gmra.mrb[54].mxu1 %v7315_v32 }
 0xbed   :  { %5662 = vmatpush1.bf16.msra.mxu0 %v7055_v11  ;;  %5693 = vmatpush3.bf16.msra.mxu1 %v7093_v38 }
 0xbee   :  { %5664 = vmatprep.subr.bf16.mxu0 %v7059_v9  ;;  %5694 = vmatprep.subr.bf16.mxu1 %v7567_v59 }
 0xbef   :  { %2997 = vmatprep.mubr.f32.mxu0 %v7568_v56  ;;  %4707 = vmatprep.mubr.msk.f32.mxu1 %vm6379_vm0, %v7568_v56 }
 0xbf1   :  { %5666 = vmatpush1.bf16.msra.mxu0 %v7061_v43  ;;  %5696 = vmatpush3.bf16.msra.mxu1 %v7104_v8 }
 0xbf2   :  { %5668 = vmatprep.subr.bf16.mxu0 %v7065_v48  ;;  %5697 = vmatprep.subr.bf16.mxu1 %v7567_v59 }
 0xbf5   :  { %5670 = vmatpush1.bf16.msra.mxu0 %v7067_v13  ;;  %5699 = vmatpush3.bf16.msra.mxu1 %v7110_v7 }
 0xbf6   :  { %5672 = vmatprep.subr.bf16.mxu0 %v7071_v35  ;;  %5700 = vmatprep.subr.bf16.mxu1 %v7567_v59 }
 0xbf9   :  { %5674 = vmatpush1.bf16.msra.mxu0 %v7073_v52  ;;  %5702 = vmatpush3.bf16.msra.mxu1 %v7113_v18 }
 0xbfa   :  { %5676 = vmatprep.subr.bf16.mxu0 %v7077_v6  ;;  %5703 = vmatprep.subr.bf16.mxu1 %v7567_v59 }
 0xbfd   :  { %5678 = vmatpush1.bf16.msra.mxu0 %v7079_v29  ;;  %5705 = vmatpush3.bf16.msra.mxu1 %v7117_v16 }
 0xbfe   :  { %5680 = vmatprep.subr.bf16.mxu0 %v7083_v21  ;;  %5706 = vmatprep.subr.bf16.mxu1 %v7567_v59 }
 0xc01   :  { %5682 = vmatpush1.bf16.msra.mxu0 %v7085_v36  ;;  %5708 = vmatpush3.bf16.msra.mxu1 %v7121_v5 }
 0xc02   :  { %5684 = vmatprep.subr.bf16.mxu0 %v7089_v53  ;;  %5709 = vmatprep.subr.bf16.mxu1 %v7567_v59 }
 0xc05   :  { %5686 = vmatpush1.bf16.msra.mxu0 %v7091_v62  ;;  %5711 = vmatpush3.bf16.msra.mxu1 %v7125_v23 }
 0xc06   :  { %5688 = vmatprep.subr.bf16.mxu0 %v7096_v54  ;;  %5712 = vmatprep.subr.bf16.mxu1 %v7567_v59 }
 0xc09   :  { %5690 = vmatpush1.bf16.msra.mxu0 %v7102_v47  ;;  %5714 = vmatpush3.bf16.msra.mxu1 %v7129_v26 }
 0xc0a   :  { %5716 = vmatprep.subr.bf16.mxu0 %v7053_v60  ;;  %5747 = vmatprep.subr.bf16.mxu1 %v7567_v59 }
 0xcbf   :  { %v2830_v37 = vpop.f32.mrb[22].mxu0  ;;  %v2901_v12 = vpop.f32.mrb[54].mxu1 }
 0xcc0   :  { %v5953_v2 = vadd.f32 %v2830_v37, %v7204_v17  ;;  %v2832_v4 = vpop.f32.mrb[23].mxu0  ;;  %v4674_v10 = vpop.f32.mrb[55].mxu1  ;;  %v2919_v44 = vadd.f32 %v7215_v45, %v2901_v12 }
 0xcc1   :  { %v5954_v14 = vadd.f32 %v2832_v4, %v7208_v39 }
 0xcc2   :  { %v3812_v61 = vmul.f32 -1.442695, %v5953_v2 }
 0xcc3   :  { %v3813_v33 = vmul.f32 -1.442695, %v5954_v14 }
 0xcc4   :  { %6105 = vpow2.f32 %v3812_v61 }
 0xcc5   :  { %6107 = vpow2.f32 %v3813_v33 }
 0xcce   :  { %v6106_v19 = vpop.eup %6105 }
 0xccf   :  { %v2909_v28 = vadd.f32 1.0, %v6106_v19  ;;  %v6108_v24 = vpop.eup %6107 }
 0xcd0   :  { %v2916_v22 = vadd.f32 1.0, %v6108_v24  ;;  %v2153_v24 = vadd.f32 %v7150_v58, %v7219_v51 }
 0xcd1   :  { %6109 = vrcp.f32 %v2909_v28 }
 0xcd2   :  { %6111 = vrcp.f32 %v2916_v22 }
 0xcdb   :  { %v6110_v57 = vpop.eup %6109 }
 0xcdc   :  { %v2920_v15 = vmul.f32 %v6110_v57, %v2919_v44  ;;  %v6112_v34 = vpop.eup %6111 }
 0xcdd   :  { %v2923_v41 = vsub.f32 1.0, %v6112_v34  ;;  %v2925_v40 = vmul.f32 %v6112_v34, %v7315_v32 }
 0xcde   :  { %v2921_v20 = vadd.f32 %v2920_v15, %v2148_v1 }
 0xce0   :  { %6113 = vtanh.f32 %v2921_v20 }
 0xcea   :  { %v6114_v27 = vpop.eup %6113 }
 0xceb   :  { %v2924_v31 = vmul.f32 %v6114_v27, %v2923_v41 }
 0xced   :  { %v7360_v49 = vadd.f32 %v2925_v40, %v2924_v31 }
 0xcef   :  { %2998 = vmatmul.mubr.f32.vlgmr.msra.gmra.mrb[24].mxu0 %v7360_v49  ;;  %4708 = vmatmul.mubr.f32.vlgmr.msra.gmra.mrb[56].mxu1 %v7360_v49 }
 0xcf0   :  { %5718 = vmatpush1.bf16.msra.mxu0 %v7055_v11  ;;  %5749 = vmatpush3.bf16.msra.mxu1 %v7093_v38 }
 0xcf1   :  { %5720 = vmatprep.subr.bf16.mxu0 %v7059_v9  ;;  %5750 = vmatprep.subr.bf16.mxu1 %v7567_v59 }
 0xcf2   :  { %3166 = vmatprep.mubr.f32.mxu0 %v7568_v56  ;;  %4742 = vmatprep.mubr.msk.f32.mxu1 %vm6379_vm0, %v7568_v56 }
 0xcf4   :  { %5722 = vmatpush1.bf16.msra.mxu0 %v7061_v43  ;;  %5752 = vmatpush3.bf16.msra.mxu1 %v7104_v8 }
 0xcf5   :  { %5724 = vmatprep.subr.bf16.mxu0 %v7065_v48  ;;  %5753 = vmatprep.subr.bf16.mxu1 %v7567_v59 }
 0xcf8   :  { %5726 = vmatpush1.bf16.msra.mxu0 %v7067_v13  ;;  %5755 = vmatpush3.bf16.msra.mxu1 %v7110_v7 }
 0xcf9   :  { %5728 = vmatprep.subr.bf16.mxu0 %v7071_v35  ;;  %5756 = vmatprep.subr.bf16.mxu1 %v7567_v59 }
 0xcfc   :  { %5730 = vmatpush1.bf16.msra.mxu0 %v7073_v52  ;;  %5758 = vmatpush3.bf16.msra.mxu1 %v7113_v18 }
 0xcfd   :  { %5732 = vmatprep.subr.bf16.mxu0 %v7077_v6  ;;  %5759 = vmatprep.subr.bf16.mxu1 %v7567_v59 }
 0xd00   :  { %5734 = vmatpush1.bf16.msra.mxu0 %v7079_v29  ;;  %5761 = vmatpush3.bf16.msra.mxu1 %v7117_v16 }
 0xd01   :  { %5736 = vmatprep.subr.bf16.mxu0 %v7083_v21  ;;  %5762 = vmatprep.subr.bf16.mxu1 %v7567_v59 }
 0xd04   :  { %5738 = vmatpush1.bf16.msra.mxu0 %v7085_v36  ;;  %5764 = vmatpush3.bf16.msra.mxu1 %v7121_v5 }
 0xd05   :  { %5740 = vmatprep.subr.bf16.mxu0 %v7089_v53  ;;  %5765 = vmatprep.subr.bf16.mxu1 %v7567_v59 }
 0xd08   :  { %5742 = vmatpush1.bf16.msra.mxu0 %v7091_v62  ;;  %5767 = vmatpush3.bf16.msra.mxu1 %v7125_v23 }
 0xd09   :  { %5744 = vmatprep.subr.bf16.mxu0 %v7096_v54  ;;  %5768 = vmatprep.subr.bf16.mxu1 %v7567_v59 }
 0xd0c   :  { %5746 = vmatpush1.bf16.msra.mxu0 %v7102_v47  ;;  %5770 = vmatpush3.bf16.msra.mxu1 %v7129_v26 }
 0xd0d   :  { %5772 = vmatprep.subr.bf16.mxu0 %v7053_v60  ;;  %5803 = vmatprep.subr.bf16.mxu1 %v7567_v59 }
 0xdc2   :  { %v2999_v30 = vpop.f32.mrb[24].mxu0  ;;  %v3070_v63 = vpop.f32.mrb[56].mxu1 }
 0xdc3   :  { %v5955_v3 = vadd.f32 %v2999_v30, %v7204_v17  ;;  %v3001_v46 = vpop.f32.mrb[25].mxu0  ;;  %v4709_v37 = vpop.f32.mrb[57].mxu1  ;;  %v3088_v19 = vadd.f32 %v7215_v45, %v3070_v63 }
 0xdc4   :  { %v5956_v2 = vadd.f32 %v3001_v46, %v7208_v39 }
 0xdc5   :  { %v3814_v12 = vmul.f32 -1.442695, %v5955_v3 }
 0xdc6   :  { %v3815_v4 = vmul.f32 -1.442695, %v5956_v2 }
 0xdc7   :  { %6115 = vpow2.f32 %v3814_v12 }
 0xdc8   :  { %6117 = vpow2.f32 %v3815_v4 }
 0xdd1   :  { %v6116_v10 = vpop.eup %6115 }
 0xdd2   :  { %v3078_v61 = vadd.f32 1.0, %v6116_v10  ;;  %v6118_v14 = vpop.eup %6117 }
 0xdd3   :  { %v3085_v33 = vadd.f32 1.0, %v6118_v14 }
 0xdd4   :  { %6119 = vrcp.f32 %v3078_v61  ;;  %v2158_v61 = vadd.f32 %v7148_v50, %v7219_v51 }
 0xdd5   :  { %6121 = vrcp.f32 %v3085_v33 }
 0xdde   :  { %v6120_v28 = vpop.eup %6119 }
 0xddf   :  { %v3089_v22 = vmul.f32 %v6120_v28, %v3088_v19  ;;  %v6122_v57 = vpop.eup %6121 }
 0xde0   :  { %v3092_v1 = vsub.f32 1.0, %v6122_v57  ;;  %v3094_v34 = vmul.f32 %v6122_v57, %v7360_v49 }
 0xde1   :  { %v3090_v44 = vadd.f32 %v3089_v22, %v2153_v24 }
 0xde3   :  { %6123 = vtanh.f32 %v3090_v44 }
 0xded   :  { %v6124_v15 = vpop.eup %6123 }
 0xdee   :  { %v3093_v20 = vmul.f32 %v6124_v15, %v3092_v1 }
 0xdf0   :  { %v7405_v41 = vadd.f32 %v3094_v34, %v3093_v20  ;;  %v3620_v34 = vld [vmem:[#allocation16 + $0x20] sm:$0xff] }
 0xdf2   :  { %3167 = vmatmul.mubr.f32.vlgmr.msra.gmra.mrb[26].mxu0 %v7405_v41  ;;  %4743 = vmatmul.mubr.f32.vlgmr.msra.gmra.mrb[58].mxu1 %v7405_v41 }
 0xdf3   :  { %5774 = vmatpush1.bf16.msra.mxu0 %v7055_v11  ;;  %5805 = vmatpush3.bf16.msra.mxu1 %v7093_v38 }
 0xdf4   :  { %5776 = vmatprep.subr.bf16.mxu0 %v7059_v9  ;;  %5806 = vmatprep.subr.bf16.mxu1 %v7567_v59 }
 0xdf5   :  { %3335 = vmatprep.mubr.f32.mxu0 %v7568_v56  ;;  %4777 = vmatprep.mubr.msk.f32.mxu1 %vm6379_vm0, %v7568_v56 }
 0xdf7   :  { %5778 = vmatpush1.bf16.msra.mxu0 %v7061_v43  ;;  %5808 = vmatpush3.bf16.msra.mxu1 %v7104_v8 }
 0xdf8   :  { %5780 = vmatprep.subr.bf16.mxu0 %v7065_v48  ;;  %5809 = vmatprep.subr.bf16.mxu1 %v7567_v59 }
 0xdfb   :  { %5782 = vmatpush1.bf16.msra.mxu0 %v7067_v13  ;;  %5811 = vmatpush3.bf16.msra.mxu1 %v7110_v7 }
 0xdfc   :  { %5784 = vmatprep.subr.bf16.mxu0 %v7071_v35  ;;  %5812 = vmatprep.subr.bf16.mxu1 %v7567_v59 }
 0xdff   :  { %5786 = vmatpush1.bf16.msra.mxu0 %v7073_v52  ;;  %5814 = vmatpush3.bf16.msra.mxu1 %v7113_v18 }
 0xe00   :  { %5788 = vmatprep.subr.bf16.mxu0 %v7077_v6  ;;  %5815 = vmatprep.subr.bf16.mxu1 %v7567_v59 }
 0xe03   :  { %5790 = vmatpush1.bf16.msra.mxu0 %v7079_v29  ;;  %5817 = vmatpush3.bf16.msra.mxu1 %v7117_v16 }
 0xe04   :  { %5792 = vmatprep.subr.bf16.mxu0 %v7083_v21  ;;  %5818 = vmatprep.subr.bf16.mxu1 %v7567_v59 }
 0xe07   :  { %5794 = vmatpush1.bf16.msra.mxu0 %v7085_v36  ;;  %5820 = vmatpush3.bf16.msra.mxu1 %v7121_v5 }
 0xe08   :  { %5796 = vmatprep.subr.bf16.mxu0 %v7089_v53  ;;  %5821 = vmatprep.subr.bf16.mxu1 %v7567_v59 }
 0xe0b   :  { %5798 = vmatpush1.bf16.msra.mxu0 %v7091_v62  ;;  %5823 = vmatpush3.bf16.msra.mxu1 %v7125_v23 }
 0xe0c   :  { %5800 = vmatprep.subr.bf16.mxu0 %v7096_v54  ;;  %5824 = vmatprep.subr.bf16.mxu1 %v7567_v59 }
 0xe0f   :  { %5802 = vmatpush1.bf16.msra.mxu0 %v7102_v47  ;;  %5826 = vmatpush3.bf16.msra.mxu1 %v7129_v26 }
 0xe10   :  { %5828 = vmatprep.subr.bf16.mxu0 %v7053_v60  ;;  %5859 = vmatprep.subr.bf16.mxu1 %v7567_v59 }
 0xec5   :  { %v3168_v58 = vpop.f32.mrb[26].mxu0  ;;  %v3239_v27 = vpop.f32.mrb[58].mxu1 }
 0xec6   :  { %v5957_v31 = vadd.f32 %v3168_v58, %v7204_v17  ;;  %v3170_v40 = vpop.f32.mrb[27].mxu0  ;;  %v4744_v30 = vpop.f32.mrb[59].mxu1  ;;  %v3257_v60 = vadd.f32 %v7215_v45, %v3239_v27  ;;  %v3621_v58 = vld [vmem:[#allocation16 + $0x28] sm:$0xff]  ;;  %v3622_v27 = vld [vmem:[#allocation16 + $0x30] sm:$0xff] }
 0xec7   :  { %v5958_v3 = vadd.f32 %v3170_v40, %v7208_v39  ;;  %v3624_v30 = vld [vmem:[#allocation16 + $0x40] sm:$0xff] }
 0xec8   :  { %v3816_v63 = vmul.f32 -1.442695, %v5957_v31  ;;  %v3623_v31 = vld [vmem:[#allocation16 + $0x38] sm:$0xff] }
 0xec9   :  { %v3817_v46 = vmul.f32 -1.442695, %v5958_v3  ;;  %v5895_v40 = vpack.c.bf16 %v3623_v31, %v3622_v27 }
 0xeca   :  { %6125 = vpow2.f32 %v3816_v63  ;;  %v3625_v63 = vld [vmem:[#allocation16 + $0x48] sm:$0xff] }
 0xecb   :  { %6127 = vpow2.f32 %v3817_v46  ;;  %v5899_v3 = vpack.c.bf16 %v3625_v63, %v3624_v30  ;;  %v3626_v46 = vld [vmem:[#allocation16 + $0x50] sm:$0xff] }
 0xed4   :  { %v6126_v37 = vpop.eup %6125 }
 0xed5   :  { %v3247_v12 = vadd.f32 1.0, %v6126_v37  ;;  %v6128_v2 = vpop.eup %6127  ;;  %v3627_v37 = vld [vmem:[#allocation16 + $0x58] sm:$0xff] }
 0xed6   :  { %v3254_v4 = vadd.f32 1.0, %v6128_v2  ;;  %v3628_v2 = vld [vmem:[#allocation16 + $0x60] sm:$0xff] }
 0xed7   :  { %6129 = vrcp.f32 %v3247_v12  ;;  %v5903_v12 = vpack.c.bf16 %v3627_v37, %v3626_v46 }
 0xed8   :  { %6131 = vrcp.f32 %v3254_v4  ;;  %v3629_v4 = vld [vmem:[#allocation16 + $0x68] sm:$0xff] }
 0xee1   :  { %v6130_v10 = vpop.eup %6129 }
 0xee2   :  { %v3258_v14 = vmul.f32 %v6130_v10, %v3257_v60  ;;  %v6132_v19 = vpop.eup %6131  ;;  %v3630_v60 = vld [vmem:[#allocation16 + $0x70] sm:$0xff]  ;;  %v3631_v10 = vld [vmem:[#allocation16 + $0x78] sm:$0xff] }
 0xee3   :  { %v3261_v28 = vsub.f32 1.0, %v6132_v19  ;;  %v3263_v44 = vmul.f32 %v6132_v19, %v7405_v41 }
 0xee4   :  { %v3259_v33 = vadd.f32 %v3258_v14, %v2158_v61  ;;  %v5911_v61 = vpack.c.bf16 %v3631_v10, %v3630_v60 }
 0xee6   :  { %6133 = vtanh.f32 %v3259_v33 }
 0xef0   :  { %v6134_v24 = vpop.eup %6133 }
 0xef1   :  { %v3262_v22 = vmul.f32 %v6134_v24, %v3261_v28 }
 0xef3   :  { %v7450_v57 = vadd.f32 %v3263_v44, %v3262_v22 }
 0xef5   :  { %3336 = vmatmul.mubr.f32.vlgmr.msra.gmra.mrb[28].mxu0 %v7450_v57  ;;  %4778 = vmatmul.mubr.f32.vlgmr.msra.gmra.mrb[60].mxu1 %v7450_v57 }
 0xef6   :  { %5830 = vmatpush1.bf16.msra.mxu0 %v7055_v11  ;;  %5861 = vmatpush3.bf16.msra.mxu1 %v7093_v38  ;;  %v3617_v11 = vld [vmem:[#allocation16 + $0x8] sm:$0xff] }
 0xef7   :  { %5832 = vmatprep.subr.bf16.mxu0 %v7059_v9  ;;  %5862 = vmatprep.subr.bf16.mxu1 %v7567_v59 }
 0xef8   :  { %3504 = vmatprep.mubr.f32.mxu0 %v7568_v56  ;;  %4812 = vmatprep.mubr.msk.f32.mxu1 %vm6379_vm0, %v7568_v56  ;;  %v3616_v56 = vld [vmem:[#allocation16] sm:$0xff] }
 0xef9   :  { %v5883_v9 = vpack.c.bf16 %v3617_v11, %v3616_v56 }
 0xefa   :  { %5834 = vmatpush1.bf16.msra.mxu0 %v7061_v43  ;;  %5864 = vmatpush3.bf16.msra.mxu1 %v7104_v8 }
 0xefb   :  { %5836 = vmatprep.subr.bf16.mxu0 %v7065_v48  ;;  %5865 = vmatprep.subr.bf16.mxu1 %v7567_v59 }
 0xefe   :  { %5838 = vmatpush1.bf16.msra.mxu0 %v7067_v13  ;;  %5867 = vmatpush3.bf16.msra.mxu1 %v7110_v7 }
 0xeff   :  { %5840 = vmatprep.subr.bf16.mxu0 %v7071_v35  ;;  %5868 = vmatprep.subr.bf16.mxu1 %v7567_v59 }
 0xf02   :  { %5842 = vmatpush1.bf16.msra.mxu0 %v7073_v52  ;;  %5870 = vmatpush3.bf16.msra.mxu1 %v7113_v18 }
 0xf03   :  { %5844 = vmatprep.subr.bf16.mxu0 %v7077_v6  ;;  %5871 = vmatprep.subr.bf16.mxu1 %v7567_v59 }
 0xf06   :  { %5846 = vmatpush1.bf16.msra.mxu0 %v7079_v29  ;;  %5873 = vmatpush3.bf16.msra.mxu1 %v7117_v16 }
 0xf07   :  { %5848 = vmatprep.subr.bf16.mxu0 %v7083_v21  ;;  %5874 = vmatprep.subr.bf16.mxu1 %v7567_v59 }
 0xf0a   :  { %5850 = vmatpush1.bf16.msra.mxu0 %v7085_v36  ;;  %5876 = vmatpush3.bf16.msra.mxu1 %v7121_v5 }
 0xf0b   :  { %5852 = vmatprep.subr.bf16.mxu0 %v7089_v53  ;;  %5877 = vmatprep.subr.bf16.mxu1 %v7567_v59 }
 0xf0e   :  { %5854 = vmatpush1.bf16.msra.mxu0 %v7091_v62  ;;  %5879 = vmatpush3.bf16.msra.mxu1 %v7125_v23  ;;  %v3618_v23 = vld [vmem:[#allocation16 + $0x10] sm:$0xff] }
 0xf0f   :  { %5856 = vmatprep.subr.bf16.mxu0 %v7096_v54  ;;  %5880 = vmatprep.subr.bf16.mxu1 %v7567_v59 }
 0xf12   :  { %5858 = vmatpush1.bf16.msra.mxu0 %v7102_v47  ;;  %5882 = vmatpush3.bf16.msra.mxu1 %v7129_v26  ;;  %v2163_v47 = vadd.f32 %v7200_v25, %v7219_v51  ;;  %v3619_v26 = vld [vmem:[#allocation16 + $0x18] sm:$0xff]  ;;  %v5891_v25 = vpack.c.bf16 %v3621_v58, %v3620_v34 }
 0xf13   :  { %5884 = vmatprep.subr.bf16.mxu0 %v5883_v9  ;;  %v5887_v20 = vpack.c.bf16 %v3619_v26, %v3618_v23 }
 0xfc8   :  { %v3337_v43 = vpop.f32.mrb[28].mxu0  ;;  %v3408_v48 = vpop.f32.mrb[60].mxu1 }
 0xfc9   :  { %v5959_v13 = vadd.f32 %v3337_v43, %v7204_v17  ;;  %v3339_v35 = vpop.f32.mrb[29].mxu0  ;;  %v4779_v52 = vpop.f32.mrb[61].mxu1  ;;  %v3426_v38 = vadd.f32 %v7215_v45, %v3408_v48 }
 0xfca   :  { %v5960_v29 = vadd.f32 %v3339_v35, %v7208_v39 }
 0xfcb   :  { %v3818_v6 = vmul.f32 -1.442695, %v5959_v13 }
 0xfcc   :  { %v3819_v21 = vmul.f32 -1.442695, %v5960_v29 }
 0xfcd   :  { %6135 = vpow2.f32 %v3818_v6 }
 0xfce   :  { %6137 = vpow2.f32 %v3819_v21 }
 0xfd7   :  { %v6136_v59 = vpop.eup %6135 }
 0xfd8   :  { %v3416_v36 = vadd.f32 1.0, %v6136_v59  ;;  %v6138_v53 = vpop.eup %6137 }
 0xfd9   :  { %v3423_v62 = vadd.f32 1.0, %v6138_v53 }
 0xfda   :  { %6139 = vrcp.f32 %v3416_v36 }
 0xfdb   :  { %6141 = vrcp.f32 %v3423_v62 }
 0xfe4   :  { %v6140_v54 = vpop.eup %6139 }
 0xfe5   :  { %v3427_v8 = vmul.f32 %v6140_v54, %v3426_v38  ;;  %v6142_v18 = vpop.eup %6141 }
 0xfe6   :  { %v3430_v16 = vsub.f32 1.0, %v6142_v18  ;;  %v3432_v1 = vmul.f32 %v6142_v18, %v7450_v57 }
 0xfe7   :  { %v3428_v7 = vadd.f32 %v3427_v8, %v2163_v47 }
 0xfe9   :  { %6143 = vtanh.f32 %v3428_v7 }
 0xff3   :  { %v6144_v5 = vpop.eup %6143 }
 0xff4   :  { %v3431_v50 = vmul.f32 %v6144_v5, %v3430_v16 }
 0xff6   :  { %v7493_v15 = vadd.f32 %v3432_v1, %v3431_v50 }
 0xff8   :  { %3505 = vmatmul.mubr.f32.vlgmr.msra.gmra.mrb[30].mxu0 %v7493_v15  ;;  %4813 = vmatmul.mubr.f32.vlgmr.msra.gmra.mrb[62].mxu1 %v7493_v15 }
 0xff9   :  { %5886 = vmatpush3.bf16.msra.mxu0 %v5883_v9  ;;  %4847 = vmatprep.mubr.f32.mxu0 %v7225_v0  ;;  %v5907_v0 = vpack.c.bf16 %v3629_v4, %v3628_v2  ;;  %v2168_v9 = vadd.f32 %v7198_v42, %v7219_v51 }
 0xffa   :  { %5888 = vmatprep.subr.bf16.mxu0 %v5887_v20 }
 0xffd   :  { %5890 = vmatpush3.bf16.msra.mxu0 %v5887_v20 }
 0xffe   :  { %5892 = vmatprep.subr.bf16.mxu0 %v5891_v25 }
0x1001   :  { %5894 = vmatpush3.bf16.msra.mxu0 %v5891_v25 }
0x1002   :  { %5896 = vmatprep.subr.bf16.mxu0 %v5895_v40 }
0x1005   :  { %5898 = vmatpush3.bf16.msra.mxu0 %v5895_v40 }
0x1006   :  { %5900 = vmatprep.subr.bf16.mxu0 %v5899_v3 }
0x1009   :  { %5902 = vmatpush3.bf16.msra.mxu0 %v5899_v3 }
0x100a   :  { %5904 = vmatprep.subr.bf16.mxu0 %v5903_v12 }
0x100d   :  { %5906 = vmatpush3.bf16.msra.mxu0 %v5903_v12 }
0x100e   :  { %5908 = vmatprep.subr.bf16.mxu0 %v5907_v0 }
0x1011   :  { %5910 = vmatpush3.bf16.msra.mxu0 %v5907_v0 }
0x1012   :  { %5912 = vmatprep.subr.bf16.mxu0 %v5911_v61 }
0x1015   :  { %5914 = vmatpush3.bf16.msra.mxu0 %v5911_v61 }
0x1018   :  { %4848 = vmatmul.mubr.f32.vlgmr.msra.gmra.mrb[32].mxu0 %v7270_v55 }
0x1019   :  { %4850 = vmatprep.mubr.f32.mxu0 %v7315_v32 }
0x101c   :  { %4851 = vmatmul.mubr.f32.gmra.mrb[34].mxu0 %v7360_v49 }
0x101d   :  { %4853 = vmatprep.mubr.f32.mxu0 %v7405_v41 }
0x1020   :  { %4854 = vmatmul.mubr.f32.gmra.mrb[36].mxu0 %v7450_v57 }
0x1021   :  { %4856 = vmatprep.mubr.f32.mxu0 %v7493_v15 }
0x10cb   :  { %v3506_v14 = vpop.f32.mrb[30].mxu0  ;;  %v3577_v33 = vpop.f32.mrb[62].mxu1 }
0x10cc   :  { %v5961_v19 = vadd.f32 %v3506_v14, %v7204_v17  ;;  %v3508_v28 = vpop.f32.mrb[31].mxu0  ;;  %v4814_v24 = vpop.f32.mrb[63].mxu1  ;;  %v3595_v57 = vadd.f32 %v7215_v45, %v3577_v33 }
0x10cd   :  { %v5962_v44 = vadd.f32 %v3508_v28, %v7208_v39  ;;  %v3822_v39 = vld [vmem:[%s7554_s11] ss:$0 sm:$0xff]  ;;  %s6380_s11 = smov [#allocation18]  }
0x10ce   :  { %v3820_v22 = vmul.f32 -1.442695, %v5961_v19  ;;  %s3769_s22 = sshll.u32 %s6380_s11, 4  ;;  %s3770_s22 = int_to_ptr.vmem [resolvable:$true] %s3769_s22 }
0x10cf   :  { %v3821_v55 = vmul.f32 -1.442695, %v5962_v44  ;;  %s6310_s2 = scalar_lea.vmem %s3770_s22, 256  ;;  %p6315_p1 = scmp.lt.s32.totalorder %s3770_s22, %s3770_s22 }
0x10d0   :  { %6145 = vpow2.f32 %v3820_v22  ;;  %p6311_p0 = scmp.ne.s32.totalorder %s3770_s22, %s6310_s2  ;;  %p6316_p2 = scmp.lt.s32.totalorder %s6310_s2, %s6310_s2 }
0x10d1   :  { %6147 = vpow2.f32 %v3821_v55 }
0x10d2   :  { %p6317_p3 = por %p6316_p2, %p6315_p1 }
0x10d4   :  { %p6318_p4 = pnand %p6317_p3, %p6311_p0 }
0x10da   :  { %v6146_v32 = vpop.eup %6145 }
0x10db   :  { %v3585_v49 = vadd.f32 1.0, %v6146_v32  ;;  %v6148_v41 = vpop.eup %6147 }
0x10dc   :  { %v3592_v56 = vadd.f32 1.0, %v6148_v41 }
0x10dd   :  { %6149 = vrcp.f32 %v3585_v49 }
0x10de   :  { %6151 = vrcp.f32 %v3592_v56 }
0x10e7   :  { %v6150_v11 = vpop.eup %6149 }
0x10e8   :  { %v3596_v17 = vmul.f32 %v6150_v11, %v3595_v57  ;;  %v6152_v59 = vpop.eup %6151 }
0x10e9   :  { %v3599_v62 = vsub.f32 1.0, %v6152_v59  ;;  %v3601_v47 = vmul.f32 %v6152_v59, %v7493_v15 }
0x10ea   :  { %v3597_v43 = vadd.f32 %v3596_v17, %v2168_v9 }
0x10eb   :  { %v4849_v48 = vpop.f32.mrb[32].mxu0 }
0x10ec   :  { %6153 = vtanh.f32 %v3597_v43  ;;  %v3711_v13 = vadd.f32 %v4849_v48, %v3822_v39  ;;  %v3705_v35 = vpop.f32.mrb[33].mxu0 }
0x10ed   :  { %v3706_v52 = vadd.f32 %v3822_v39, %v3705_v35 }
0x10ee   :  { %3745 = vst [vmem:[#allocation17 + $0x8] sm:$0xff] %v3711_v13 }
0x10ef   :  { %3744 = vst [vmem:[#allocation17] sm:$0xff] %v3706_v52  ;;  %v4852_v6 = vpop.f32.mrb[34].mxu0 }
0x10f0   :  { %v3721_v45 = vadd.f32 %v4852_v6, %v3822_v39  ;;  %v3715_v29 = vpop.f32.mrb[35].mxu0 }
0x10f1   :  { %v3716_v21 = vadd.f32 %v3822_v39, %v3715_v29 }
0x10f2   :  { %3747 = vst [vmem:[#allocation17 + $0x18] sm:$0xff] %v3721_v45 }
0x10f3   :  { %3746 = vst [vmem:[#allocation17 + $0x10] sm:$0xff] %v3716_v21  ;;  %v4855_v42 = vpop.f32.mrb[36].mxu0 }
0x10f4   :  { %v3731_v51 = vadd.f32 %v4855_v42, %v3822_v39  ;;  %v3725_v36 = vpop.f32.mrb[37].mxu0 }
0x10f5   :  { %v3726_v53 = vadd.f32 %v3822_v39, %v3725_v36 }
0x10f6   :  { %v6154_v38 = vpop.eup %6153  ;;  %3749 = vst [vmem:[#allocation17 + $0x28] sm:$0xff] %v3731_v51 }
0x10f7   :  { %3748 = vst [vmem:[#allocation17 + $0x20] sm:$0xff] %v3726_v53  ;;  %v3600_v54 = vmul.f32 %v6154_v38, %v3599_v62 }
0x10f9   :  { %v3602_v8 = vadd.f32 %v3601_v47, %v3600_v54 }
0x10fb   :  { %4857 = vmatmul.mubr.f32.gmra.mrb[38].mxu0 %v3602_v8  ;;  %3607 = vst [vmem:[#allocation18 + $0x8] sm:$0xff] %v3602_v8 }
0x10fc   :  { %6321 = shalt.err (!%p6318_p4)
}
0x10fd   :  { %s6322_s27 = scalar_lea.hbm %s7556_s13, 256 }
0x10fe   :  { %p6323_p5 = scmp.ne.s32.totalorder %s7556_s13, %s6322_s27  ;;  %p6326_p6 = scmp.lt.u32.totalorder %s6322_s27, %s7556_s13 }
0x1100   :  { %p6328_p7 = pnand %p6326_p6, %p6323_p5 }
0x1102   :  { %6331 = shalt.err (!%p6328_p7)
}
0x1103   :  { %3775 = dma.vmem_to_hbm [thread:$0]  %s3770_s22, 256, %s7556_s13, [#allocation19], %s6367_s18, %s6367_s18, %s6368_s19  }
0x1104   :  { %s6381_s15 = smov [#allocation17]  }
0x1105   :  { %s3757_s6 = sshll.u32 %s6381_s15, 4  ;;  %s3758_s6 = int_to_ptr.vmem [resolvable:$true] %s3757_s6 }
0x1106   :  { %s6332_s26 = scalar_lea.vmem %s3758_s6, 1024  ;;  %p6337_p9 = scmp.lt.s32.totalorder %s3758_s6, %s3758_s6 }
0x1107   :  { %p6333_p8 = scmp.ne.s32.totalorder %s3758_s6, %s6332_s26  ;;  %p6338_p10 = scmp.lt.s32.totalorder %s6332_s26, %s6332_s26 }
0x1109   :  { %p6339_p11 = por %p6338_p10, %p6337_p9 }
0x110b   :  { %p6340_p12 = pnand %p6339_p11, %p6333_p8 }
0x11ce   :  { %v4858_v7 = vpop.f32.mrb[38].mxu0 }
0x11cf   :  { %v3741_v18 = vadd.f32 %v4858_v7, %v3822_v39  ;;  %v3735_v16 = vpop.f32.mrb[39].mxu0 }
0x11d0   :  { %v3736_v5 = vadd.f32 %v3822_v39, %v3735_v16 }
0x11d1   :  { %3751 = vst [vmem:[#allocation17 + $0x38] sm:$0xff] %v3741_v18 }
0x11d2   :  { %3750 = vst [vmem:[#allocation17 + $0x30] sm:$0xff] %v3736_v5 }
0x11d3   :  { %6343 = shalt.err (!%p6340_p12)
}
0x11d4   :  { %s6344_s13 = scalar_lea.hbm %s7555_s12, 1024 }
0x11d5   :  { %p6345_p13 = scmp.ne.s32.totalorder %s7555_s12, %s6344_s13  ;;  %p6348_p0 = scmp.lt.u32.totalorder %s6344_s13, %s7555_s12 }
0x11d7   :  { %p6350_p1 = pnand %p6348_p0, %p6345_p13 }
0x11d9   :  { %6353 = shalt.err (!%p6350_p1)
}
0x11da   :  { %3763 = dma.vmem_to_hbm [thread:$0]  %s3758_s6, 1024, %s7555_s12, [#allocation7], %s6367_s18, %s6367_s18, %s6368_s19  }
0x11db   :  { %6362 = dma.done.wait [#allocation7], 1024  }
0x11dc   :  { %6363 = vsyncadd [#allocation7], 4294966272 }
0x11dd   :  { %6364 = dma.done.wait [#allocation19], 256  }
0x11de   :  { %6365 = vsyncadd [#allocation19], 4294967040 }
0x11df   :  { %3782 = vsyncpa [#allocation6], 1 }
0x11e0   :  { %3783 = vsyncpa [#allocation9], 1 }
0x11e1   :  { %3784 = vsyncpa [#allocation12], 1 }
0x11e2   :  { %3785 = vsyncpa [#allocation15], 1 }
0x11e3   :  { %3786 = vsyncpa [#allocation7], 1 }
0x11e4   :  { %3787 = vsyncpa [#allocation19], 1 }

</bundles_post_ra>
